<compile_context>
chip_gen: v7x
topology: tpu7x:2x2x1
jax: 0.10.0
libtpu: 0.0.40
codegen_flags: <defaults>
</compile_context>

<pallas_src>
import jax
import jax.numpy as jnp
from jax import lax
from jax.experimental import pallas as pl
from jax.experimental.pallas import tpu as pltpu


# Contract lhs dim 1 against rhs dim 1  ->  x @ W^T  for PyTorch (out, in) weights.
_DN_T = (((1,), (1,)), ((), ()))

_VMEM_SPEC = pl.BlockSpec(memory_space=pltpu.MemorySpace.VMEM)


# --------------------------------------------------------------------------
# Kernels
# --------------------------------------------------------------------------
def conv_tanh_pool_kernel(p_ref, w_ref, b_ref, o_ref):
    """Fused conv-as-GEMM + bias + tanh + 2x2 avg-pool (single merged GEMM).

    p_ref: (4*Mp, K) -- im2col patches, 4 contiguous row-groups of Mp rows, one
                        per position (dh, dw) of the 2x2 pool window; Mp is a
                        multiple of 8 (wrapper pads with zero rows if needed).
    w_ref: (Cout, K) -- PyTorch-layout conv weight, flattened over (Cin, KH, KW)
    b_ref: (1, Cout)
    o_ref: (Mp, Cout) -- pooled activations (rows ordered b, ph, pw; padded rows
                         at the tail are garbage and dropped by the wrapper)
    """
    mp = o_ref.shape[0]
    # One MXU GEMM over all 4 pool positions at once (single push / drain).
    y = lax.dot_general(p_ref[...], w_ref[...], _DN_T,
                        preferred_element_type=jnp.float32)
    # One bias broadcast + one tanh stream over the whole (4*Mp, Cout) slab.
    t = jnp.tanh(y + b_ref[...])
    # 2x2 average pool: sum the 4 row-groups (8-aligned static slices) and scale.
    pooled = (t[0:mp] + t[mp:2 * mp] + t[2 * mp:3 * mp] + t[3 * mp:4 * mp]) * 0.25
    o_ref[...] = pooled.astype(o_ref.dtype)


def classifier_kernel(x_ref, w1_ref, b1_ref, w2_ref, b2_ref, w3_ref, b3_ref, o_ref):
    """Fused FC(400->120)+tanh -> FC(120->84)+tanh -> FC(84->num_classes)."""
    h = jnp.tanh(
        lax.dot_general(x_ref[...], w1_ref[...], _DN_T,
                        preferred_element_type=jnp.float32) + b1_ref[...])
    h = jnp.tanh(
        lax.dot_general(h, w2_ref[...], _DN_T,
                        preferred_element_type=jnp.float32) + b2_ref[...])
    o = lax.dot_general(h, w3_ref[...], _DN_T,
                        preferred_element_type=jnp.float32) + b3_ref[...]
    o_ref[...] = o.astype(o_ref.dtype)


# --------------------------------------------------------------------------
# Wrapper-side layout glue (pure data movement, no FLOPs)
# --------------------------------------------------------------------------
def _im2col_nhwc(x, ksize):
    """x: (B, H, W, C) -> (B, OH, OW, C*ksize*ksize); feature order = (cin, kh, kw)."""
    B, H, W, C = x.shape
    OH, OW = H - ksize + 1, W - ksize + 1
    cols = []
    for kh in range(ksize):
        for kw in range(ksize):
            cols.append(x[:, kh:kh + OH, kw:kw + OW, :])
    p = jnp.stack(cols, axis=3)                # (B, OH, OW, KH*KW, C)
    p = jnp.transpose(p, (0, 1, 2, 4, 3))      # (B, OH, OW, C, KH*KW)
    return p.reshape(B, OH, OW, C * ksize * ksize)


def _pool_group_merge(p):
    """(B, OH, OW, F) with even OH/OW -> merged (4*Mp_pad, F) slab.

    Rows are ordered (dh, dw, b, ph, pw); each of the 4 (dh,dw) groups is padded
    with zero rows up to Mp_pad (a multiple of 8) so the kernel's pool slices
    stay sublane-aligned.  Returns (slab, mp, mp_pad).
    """
    B, OH, OW, F = p.shape
    PH, PW = OH // 2, OW // 2
    mp = B * PH * PW
    mp_pad = -(-mp // 8) * 8
    p = p.reshape(B, PH, 2, PW, 2, F)
    p = jnp.transpose(p, (2, 4, 0, 1, 3, 5))   # (dh, dw, B, ph, pw, F)
    p = p.reshape(4, mp, F)
    if mp_pad != mp:
        p = jnp.pad(p, ((0, 0), (0, mp_pad - mp), (0, 0)))
    return p.reshape(4 * mp_pad, F), mp, mp_pad


def _conv_tanh_pool(p_merged, w_flat, b_row, mp_pad):
    cout = w_flat.shape[0]
    return pl.pallas_call(
        conv_tanh_pool_kernel,
        out_shape=jax.ShapeDtypeStruct((mp_pad, cout), jnp.float32),
        in_specs=[_VMEM_SPEC] * 3,
        out_specs=_VMEM_SPEC,
    )(p_merged, w_flat, b_row)


def prepare_params(params):
    """One-time conversion of PyTorch-layout params into kernel-friendly form."""
    (w1, b1), (w2, b2), (fw1, fb1), (fw2, fb2), (fw3, fb3) = params
    c1, c2 = w1.shape[0], w2.shape[0]
    w1f = w1.reshape(c1, -1)                       # (6, 25),  features (cin,kh,kw)
    w2f = w2.reshape(c2, -1)                       # (16, 150)
    # Permute fc1 columns from torch (C,H,W) flatten order to (H,W,C) order so the
    # pooled NHWC activations flatten with a plain reshape (no transpose op).
    fw1p = fw1.reshape(fw1.shape[0], 16, 5, 5).transpose(0, 2, 3, 1).reshape(fw1.shape[0], 400)
    return ((w1f, b1.reshape(1, -1)), (w2f, b2.reshape(1, -1)),
            (fw1p, fb1.reshape(1, -1)), (fw2, fb2.reshape(1, -1)),
            (fw3, fb3.reshape(1, -1)))


def lenet5_forward(x, kparams):
    """x: (B, 1, 28, 28) float32 (NCHW, like the PyTorch module). kparams from prepare_params."""
    (w1f, b1r), (w2f, b2r), (fw1p, fb1r), (fw2, fb2r), (fw3, fb3r) = kparams
    B = x.shape[0]
    num_classes = fw3.shape[0]

    # Stage 1: conv1 (pad=2) + tanh + avgpool 2x2 — one single-step fused kernel.
    x_nhwc = jnp.transpose(x, (0, 2, 3, 1))                       # (B, 28, 28, 1)
    x_pad = jnp.pad(x_nhwc, ((0, 0), (2, 2), (2, 2), (0, 0)))     # (B, 32, 32, 1)
    p1, mp1, mp1_pad = _pool_group_merge(_im2col_nhwc(x_pad, 5))  # (4*392, 25)
    h1 = _conv_tanh_pool(p1, w1f, b1r, mp1_pad)                   # (392, 6)
    h1 = h1[:mp1].reshape(B, 14, 14, 6)

    # Stage 2: conv2 (valid) + tanh + avgpool 2x2.
    p2, mp2, mp2_pad = _pool_group_merge(_im2col_nhwc(h1, 5))     # (4*56, 150)
    h2 = _conv_tanh_pool(p2, w2f, b2r, mp2_pad)                   # (56, 16)

    # NHWC flatten is a pure reshape (fc1 columns were pre-permuted to match).
    flat = h2[:mp2].reshape(B, 5 * 5 * 16)

    logits = pl.pallas_call(
        classifier_kernel,
        out_shape=jax.ShapeDtypeStruct((B, num_classes), jnp.float32),
        in_specs=[_VMEM_SPEC] * 7,
        out_specs=_VMEM_SPEC,
    )(flat, fw1p, fb1r, fw2, fb2r, fw3, fb3r)
    return logits


# --------------------------------------------------------------------------
# Pure-JAX reference (same semantics as the PyTorch forward)
# --------------------------------------------------------------------------
def lenet5_reference(x, params):
    (w1, b1), (w2, b2), (fw1, fb1), (fw2, fb2), (fw3, fb3) = params
    dn = ("NCHW", "OIHW", "NCHW")

    a = lax.conv_general_dilated(x, w1, (1, 1), ((2, 2), (2, 2)), dimension_numbers=dn)
    a = jnp.tanh(a + b1[None, :, None, None])
    B, C, H, W = a.shape
    a = a.reshape(B, C, H // 2, 2, W // 2, 2).mean(axis=(3, 5))

    a = lax.conv_general_dilated(a, w2, (1, 1), "VALID", dimension_numbers=dn)
    a = jnp.tanh(a + b2[None, :, None, None])
    B, C, H, W = a.shape
    a = a.reshape(B, C, H // 2, 2, W // 2, 2).mean(axis=(3, 5))

    flat = a.reshape(B, -1)
    h = jnp.tanh(flat @ fw1.T + fb1)
    h = jnp.tanh(h @ fw2.T + fb2)
    return h @ fw3.T + fb3


# --------------------------------------------------------------------------
if __name__ == "__main__":
    B, num_classes = 2, 10
    key = jax.random.PRNGKey(0)
    ks = jax.random.split(key, 11)

    def uinit(k, shape, fan_in):
        bound = 1.0 / (fan_in ** 0.5)
        return jax.random.uniform(k, shape, minval=-bound, maxval=bound, dtype=jnp.float32)

    x = jax.random.normal(ks[0], (B, 1, 28, 28), dtype=jnp.float32)
    w1 = uinit(ks[1], (6, 1, 5, 5), 25)
    b1 = uinit(ks[2], (6,), 25)
    w2 = uinit(ks[3], (16, 6, 5, 5), 150)
    b2 = uinit(ks[4], (16,), 150)
    fw1 = uinit(ks[5], (120, 400), 400)
    fb1 = uinit(ks[6], (120,), 400)
    fw2 = uinit(ks[7], (84, 120), 120)
    fb2 = uinit(ks[8], (84,), 120)
    fw3 = uinit(ks[9], (num_classes, 84), 84)
    fb3 = uinit(ks[10], (num_classes,), 84)

    params = ((w1, b1), (w2, b2), (fw1, fb1), (fw2, fb2), (fw3, fb3))
    kparams = prepare_params(params)          # one-time, outside the jitted forward

    logits = jax.jit(lenet5_forward)(x, kparams)
    jax.block_until_ready(logits)

    ref = lenet5_reference(x, params)
    assert logits.shape == (B, num_classes) and logits.dtype == jnp.float32
    assert jnp.allclose(logits, ref, atol=1e-2, rtol=1e-2), \
        float(jnp.max(jnp.abs(logits - ref)))

    print("KERNEL_OK")
</pallas_src>

<mosaic_0001>
module attributes {stable_mosaic.version = 11 : i64} {
  func.func @conv_tanh_pool_kernel(%arg0: memref<1568x25xf32, #tpu.memory_space<vmem>>, %arg1: memref<6x25xf32, #tpu.memory_space<vmem>>, %arg2: memref<1x6xf32, #tpu.memory_space<vmem>>, %arg3: memref<392x6xf32, #tpu.memory_space<vmem>>) attributes {dimension_semantics = [], scalar_prefetch = 0 : i64, scratch_operands = 0 : i64, tpu.core_type = #tpu.core_type<tc>} {
    %c0 = arith.constant 0 : index
    %c0_0 = arith.constant 0 : index
    %0 = vector.load %arg0[%c0, %c0_0] : memref<1568x25xf32, #tpu.memory_space<vmem>>, vector<1568x25xf32>
    %c0_1 = arith.constant 0 : index
    %c0_2 = arith.constant 0 : index
    %1 = vector.load %arg1[%c0_1, %c0_2] : memref<6x25xf32, #tpu.memory_space<vmem>>, vector<6x25xf32>
    %cst = arith.constant dense<0.000000e+00> : vector<1568x6xf32>
    %2 = tpu.matmul %0, %1, %cst {dimension_numbers = #tpu.dot_dimension_numbers<[1], [1], [0], [0], [0, 0, 1, 0], [], []>} : vector<1568x25xf32>, vector<6x25xf32>, vector<1568x6xf32> -> vector<1568x6xf32>
    %c0_3 = arith.constant 0 : index
    %c0_4 = arith.constant 0 : index
    %3 = vector.load %arg2[%c0_3, %c0_4] : memref<1x6xf32, #tpu.memory_space<vmem>>, vector<1x6xf32>
    %4 = vector.broadcast %3 : vector<1x6xf32> to vector<1568x6xf32>
    %5 = arith.addf %2, %4 : vector<1568x6xf32>
    %6 = math.tanh %5 : vector<1568x6xf32>
    %7 = vector.extract_strided_slice %6 {offsets = [0, 0], sizes = [392, 6], strides = [1, 1]} : vector<1568x6xf32> to vector<392x6xf32>
    %8 = vector.extract_strided_slice %6 {offsets = [392, 0], sizes = [392, 6], strides = [1, 1]} : vector<1568x6xf32> to vector<392x6xf32>
    %9 = arith.addf %7, %8 : vector<392x6xf32>
    %10 = vector.extract_strided_slice %6 {offsets = [784, 0], sizes = [392, 6], strides = [1, 1]} : vector<1568x6xf32> to vector<392x6xf32>
    %11 = arith.addf %9, %10 : vector<392x6xf32>
    %12 = vector.extract_strided_slice %6 {offsets = [1176, 0], sizes = [392, 6], strides = [1, 1]} : vector<1568x6xf32> to vector<392x6xf32>
    %13 = arith.addf %11, %12 : vector<392x6xf32>
    %cst_5 = arith.constant 2.500000e-01 : f32
    %14 = vector.broadcast %cst_5 : f32 to vector<392x6xf32>
    %15 = arith.mulf %13, %14 : vector<392x6xf32>
    %c0_6 = arith.constant 0 : index
    %c0_7 = arith.constant 0 : index
    %16 = vector.load %arg3[%c0_6, %c0_7] : memref<392x6xf32, #tpu.memory_space<vmem>>, vector<392x6xf32>
    tpu.vector_store %arg3[%c0_6, %c0_7], %15 {strides = array<i32>} : memref<392x6xf32, #tpu.memory_space<vmem>>, vector<392x6xf32>,
    return
  }
}

module attributes {stable_mosaic.version = 11 : i64} {
  func.func @conv_tanh_pool_kernel(%arg0: memref<224x150xf32, #tpu.memory_space<vmem>>, %arg1: memref<16x150xf32, #tpu.memory_space<vmem>>, %arg2: memref<1x16xf32, #tpu.memory_space<vmem>>, %arg3: memref<56x16xf32, #tpu.memory_space<vmem>>) attributes {dimension_semantics = [], scalar_prefetch = 0 : i64, scratch_operands = 0 : i64, tpu.core_type = #tpu.core_type<tc>} {
    %c0 = arith.constant 0 : index
    %c0_0 = arith.constant 0 : index
    %0 = vector.load %arg0[%c0, %c0_0] : memref<224x150xf32, #tpu.memory_space<vmem>>, vector<224x150xf32>
    %c0_1 = arith.constant 0 : index
    %c0_2 = arith.constant 0 : index
    %1 = vector.load %arg1[%c0_1, %c0_2] : memref<16x150xf32, #tpu.memory_space<vmem>>, vector<16x150xf32>
    %cst = arith.constant dense<0.000000e+00> : vector<224x16xf32>
    %2 = tpu.matmul %0, %1, %cst {dimension_numbers = #tpu.dot_dimension_numbers<[1], [1], [0], [0], [0, 0, 1, 0], [], []>} : vector<224x150xf32>, vector<16x150xf32>, vector<224x16xf32> -> vector<224x16xf32>
    %c0_3 = arith.constant 0 : index
    %c0_4 = arith.constant 0 : index
    %3 = vector.load %arg2[%c0_3, %c0_4] : memref<1x16xf32, #tpu.memory_space<vmem>>, vector<1x16xf32>
    %4 = vector.broadcast %3 : vector<1x16xf32> to vector<224x16xf32>
    %5 = arith.addf %2, %4 : vector<224x16xf32>
    %6 = math.tanh %5 : vector<224x16xf32>
    %7 = vector.extract_strided_slice %6 {offsets = [0, 0], sizes = [56, 16], strides = [1, 1]} : vector<224x16xf32> to vector<56x16xf32>
    %8 = vector.extract_strided_slice %6 {offsets = [56, 0], sizes = [56, 16], strides = [1, 1]} : vector<224x16xf32> to vector<56x16xf32>
    %9 = arith.addf %7, %8 : vector<56x16xf32>
    %10 = vector.extract_strided_slice %6 {offsets = [112, 0], sizes = [56, 16], strides = [1, 1]} : vector<224x16xf32> to vector<56x16xf32>
    %11 = arith.addf %9, %10 : vector<56x16xf32>
    %12 = vector.extract_strided_slice %6 {offsets = [168, 0], sizes = [56, 16], strides = [1, 1]} : vector<224x16xf32> to vector<56x16xf32>
    %13 = arith.addf %11, %12 : vector<56x16xf32>
    %cst_5 = arith.constant 2.500000e-01 : f32
    %14 = vector.broadcast %cst_5 : f32 to vector<56x16xf32>
    %15 = arith.mulf %13, %14 : vector<56x16xf32>
    %c0_6 = arith.constant 0 : index
    %c0_7 = arith.constant 0 : index
    %16 = vector.load %arg3[%c0_6, %c0_7] : memref<56x16xf32, #tpu.memory_space<vmem>>, vector<56x16xf32>
    tpu.vector_store %arg3[%c0_6, %c0_7], %15 {strides = array<i32>} : memref<56x16xf32, #tpu.memory_space<vmem>>, vector<56x16xf32>,
    return
  }
}

module attributes {stable_mosaic.version = 11 : i64} {
  func.func @classifier_kernel(%arg0: memref<2x400xf32, #tpu.memory_space<vmem>>, %arg1: memref<120x400xf32, #tpu.memory_space<vmem>>, %arg2: memref<1x120xf32, #tpu.memory_space<vmem>>, %arg3: memref<84x120xf32, #tpu.memory_space<vmem>>, %arg4: memref<1x84xf32, #tpu.memory_space<vmem>>, %arg5: memref<10x84xf32, #tpu.memory_space<vmem>>, %arg6: memref<1x10xf32, #tpu.memory_space<vmem>>, %arg7: memref<2x10xf32, #tpu.memory_space<vmem>>) attributes {dimension_semantics = [], scalar_prefetch = 0 : i64, scratch_operands = 0 : i64, tpu.core_type = #tpu.core_type<tc>} {
    %c0 = arith.constant 0 : index
    %c0_0 = arith.constant 0 : index
    %0 = vector.load %arg0[%c0, %c0_0] : memref<2x400xf32, #tpu.memory_space<vmem>>, vector<2x400xf32>
    %c0_1 = arith.constant 0 : index
    %c0_2 = arith.constant 0 : index
    %1 = vector.load %arg1[%c0_1, %c0_2] : memref<120x400xf32, #tpu.memory_space<vmem>>, vector<120x400xf32>
    %cst = arith.constant dense<0.000000e+00> : vector<2x120xf32>
    %2 = tpu.matmul %0, %1, %cst {dimension_numbers = #tpu.dot_dimension_numbers<[1], [1], [0], [0], [0, 0, 1, 0], [], []>} : vector<2x400xf32>, vector<120x400xf32>, vector<2x120xf32> -> vector<2x120xf32>
    %c0_3 = arith.constant 0 : index
    %c0_4 = arith.constant 0 : index
    %3 = vector.load %arg2[%c0_3, %c0_4] : memref<1x120xf32, #tpu.memory_space<vmem>>, vector<1x120xf32>
    %4 = vector.broadcast %3 : vector<1x120xf32> to vector<2x120xf32>
    %5 = arith.addf %2, %4 : vector<2x120xf32>
    %6 = math.tanh %5 : vector<2x120xf32>
    %c0_5 = arith.constant 0 : index
    %c0_6 = arith.constant 0 : index
    %7 = vector.load %arg3[%c0_5, %c0_6] : memref<84x120xf32, #tpu.memory_space<vmem>>, vector<84x120xf32>
    %cst_7 = arith.constant dense<0.000000e+00> : vector<2x84xf32>
    %8 = tpu.matmul %6, %7, %cst_7 {dimension_numbers = #tpu.dot_dimension_numbers<[1], [1], [0], [0], [0, 0, 1, 0], [], []>} : vector<2x120xf32>, vector<84x120xf32>, vector<2x84xf32> -> vector<2x84xf32>
    %c0_8 = arith.constant 0 : index
    %c0_9 = arith.constant 0 : index
    %9 = vector.load %arg4[%c0_8, %c0_9] : memref<1x84xf32, #tpu.memory_space<vmem>>, vector<1x84xf32>
    %10 = vector.broadcast %9 : vector<1x84xf32> to vector<2x84xf32>
    %11 = arith.addf %8, %10 : vector<2x84xf32>
    %12 = math.tanh %11 : vector<2x84xf32>
    %c0_10 = arith.constant 0 : index
    %c0_11 = arith.constant 0 : index
    %13 = vector.load %arg5[%c0_10, %c0_11] : memref<10x84xf32, #tpu.memory_space<vmem>>, vector<10x84xf32>
    %cst_12 = arith.constant dense<0.000000e+00> : vector<2x10xf32>
    %14 = tpu.matmul %12, %13, %cst_12 {dimension_numbers = #tpu.dot_dimension_numbers<[1], [1], [0], [0], [0, 0, 1, 0], [], []>} : vector<2x84xf32>, vector<10x84xf32>, vector<2x10xf32> -> vector<2x10xf32>
    %c0_13 = arith.constant 0 : index
    %c0_14 = arith.constant 0 : index
    %15 = vector.load %arg6[%c0_13, %c0_14] : memref<1x10xf32, #tpu.memory_space<vmem>>, vector<1x10xf32>
    %16 = vector.broadcast %15 : vector<1x10xf32> to vector<2x10xf32>
    %17 = arith.addf %14, %16 : vector<2x10xf32>
    %c0_15 = arith.constant 0 : index
    %c0_16 = arith.constant 0 : index
    %18 = vector.load %arg7[%c0_15, %c0_16] : memref<2x10xf32, #tpu.memory_space<vmem>>, vector<2x10xf32>
    tpu.vector_store %arg7[%c0_15, %c0_16], %17 {strides = array<i32>} : memref<2x10xf32, #tpu.memory_space<vmem>>, vector<2x10xf32>,
    return
  }
}

</mosaic_0001>

<bundles_post_ra>
// kernel: lenet5_forward.3
= control target key start
LH: loop header
LB: loop body
LE: loop exit
PB: predicated region body
PF: predicated region fallthrough
CT: control target
= control target key end

     0   :  { %vm218_vm0 = vcmask 203776   ;;  %vm2247_vm1 = vcmask 48128   ;;  %s4894_s1 = inlined_call_operand.vmem [shape: f32[6,25], index: 1, kind: input, shape index: {}]   ;;  %s4895_s0 = inlined_call_operand.vmem [shape: f32[1568,25], index: 0, kind: input, shape index: {}]   ;;  %s4896_s2 = inlined_call_operand.vmem [shape: f32[1,6], index: 2, kind: input, shape index: {}]   ;;  %s4897_s3 = inlined_call_operand.vmem [shape: f32[392,6], index: 3, kind: output, shape index: {}]  }
   0x1   :  { %v210_v0 = vld [vmem:[%s4894_s1] sm:$0x3f]  ;;  %v112_v2 = vld [vmem:[%s4895_s0 + $0x310] sm:$0xff]  ;;  %v15_v3 = vld [vmem:[%s4895_s0 + $0x8] sm:$0xff] }
   0x2   :  { %v14_v1 = vld [vmem:[%s4895_s0] sm:$0xff]  ;;  %2696 = vmatprep.subr.msk.mxu0 %vm218_vm0, %v210_v0  ;;  %2992 = vmatprep.subr.msk.mxu1 %vm218_vm0, %v210_v0  ;;  %v16_v4 = vld [vmem:[%s4895_s0 + $0x10] sm:$0xff]  ;;  %v113_v5 = vld [vmem:[%s4895_s0 + $0x318] sm:$0xff] }
   0x3   :  { %2697 = vmatpush3.xpose.msk.msra.mxu0 %vm218_vm0, %v210_v0  ;;  %2698 = vmatprep.mubr.msk.f32.mxu0 %vm218_vm0, %v14_v1  ;;  %v114_v6 = vld [vmem:[%s4895_s0 + $0x320] sm:$0xff]  ;;  %v17_v7 = vld [vmem:[%s4895_s0 + $0x18] sm:$0xff]  ;;  %v115_v9 = vld [vmem:[%s4895_s0 + $0x328] sm:$0xff] }
   0x4   :  { %2993 = vmatpush3.xpose.msk.msra.mxu1 %vm218_vm0, %v210_v0  ;;  %2845 = vmatprep.mubr.msk.f32.mxu1 %vm218_vm0, %v112_v2  ;;  %v18_v8 = vld [vmem:[%s4895_s0 + $0x20] sm:$0xff]  ;;  %v116_v10 = vld [vmem:[%s4895_s0 + $0x330] sm:$0xff]  ;;  %v19_v11 = vld [vmem:[%s4895_s0 + $0x28] sm:$0xff] }
   0x5   :  { %v20_v12 = vld [vmem:[%s4895_s0 + $0x30] sm:$0xff]  ;;  %v117_v13 = vld [vmem:[%s4895_s0 + $0x338] sm:$0xff]  ;;  %v118_v14 = vld [vmem:[%s4895_s0 + $0x340] sm:$0xff] }
   0x6   :  { %2699 = vmatmul.mubr.msk.f32.vlgmr.msra.gmra.mrb[0].mxu0 %vm218_vm0, %v15_v3  ;;  %v21_v15 = vld [vmem:[%s4895_s0 + $0x38] sm:$0xff]  ;;  %v22_v16 = vld [vmem:[%s4895_s0 + $0x40] sm:$0xff]  ;;  %v119_v17 = vld [vmem:[%s4895_s0 + $0x348] sm:$0xff] }
   0x7   :  { %2701 = vmatprep.mubr.msk.f32.mxu0 %vm218_vm0, %v16_v4  ;;  %2846 = vmatmul.mubr.msk.f32.vlgmr.msra.gmra.mrb[0].mxu1 %vm218_vm0, %v113_v5  ;;  %v120_v18 = vld [vmem:[%s4895_s0 + $0x350] sm:$0xff]  ;;  %v23_v19 = vld [vmem:[%s4895_s0 + $0x48] sm:$0xff]  ;;  %v121_v21 = vld [vmem:[%s4895_s0 + $0x358] sm:$0xff] }
   0x8   :  { %2848 = vmatprep.mubr.msk.f32.mxu1 %vm218_vm0, %v114_v6  ;;  %v24_v20 = vld [vmem:[%s4895_s0 + $0x50] sm:$0xff]  ;;  %v122_v22 = vld [vmem:[%s4895_s0 + $0x360] sm:$0xff]  ;;  %v25_v23 = vld [vmem:[%s4895_s0 + $0x58] sm:$0xff] }
   0x9   :  { %v26_v24 = vld [vmem:[%s4895_s0 + $0x60] sm:$0xff]  ;;  %v123_v25 = vld [vmem:[%s4895_s0 + $0x368] sm:$0xff]  ;;  %v124_v26 = vld [vmem:[%s4895_s0 + $0x370] sm:$0xff] }
   0xa   :  { %2702 = vmatmul.mubr.msk.f32.gmra.mrb[2].mxu0 %vm218_vm0, %v17_v7  ;;  %v27_v27 = vld [vmem:[%s4895_s0 + $0x68] sm:$0xff]  ;;  %v28_v28 = vld [vmem:[%s4895_s0 + $0x70] sm:$0xff]  ;;  %v125_v29 = vld [vmem:[%s4895_s0 + $0x378] sm:$0xff] }
   0xb   :  { %2704 = vmatprep.mubr.msk.f32.mxu0 %vm218_vm0, %v18_v8  ;;  %2849 = vmatmul.mubr.msk.f32.gmra.mrb[2].mxu1 %vm218_vm0, %v115_v9  ;;  %v126_v30 = vld [vmem:[%s4895_s0 + $0x380] sm:$0xff]  ;;  %v29_v31 = vld [vmem:[%s4895_s0 + $0x78] sm:$0xff]  ;;  %v127_v33 = vld [vmem:[%s4895_s0 + $0x388] sm:$0xff] }
   0xc   :  { %2851 = vmatprep.mubr.msk.f32.mxu1 %vm218_vm0, %v116_v10  ;;  %v30_v32 = vld [vmem:[%s4895_s0 + $0x80] sm:$0xff]  ;;  %v128_v34 = vld [vmem:[%s4895_s0 + $0x390] sm:$0xff]  ;;  %v31_v35 = vld [vmem:[%s4895_s0 + $0x88] sm:$0xff] }
   0xd   :  { %v32_v36 = vld [vmem:[%s4895_s0 + $0x90] sm:$0xff]  ;;  %v129_v37 = vld [vmem:[%s4895_s0 + $0x398] sm:$0xff]  ;;  %v130_v38 = vld [vmem:[%s4895_s0 + $0x3a0] sm:$0xff] }
   0xe   :  { %2705 = vmatmul.mubr.msk.f32.gmra.mrb[4].mxu0 %vm218_vm0, %v19_v11  ;;  %v33_v39 = vld [vmem:[%s4895_s0 + $0x98] sm:$0xff]  ;;  %v34_v40 = vld [vmem:[%s4895_s0 + $0xa0] sm:$0xff]  ;;  %v131_v41 = vld [vmem:[%s4895_s0 + $0x3a8] sm:$0xff] }
   0xf   :  { %2707 = vmatprep.mubr.msk.f32.mxu0 %vm218_vm0, %v20_v12  ;;  %2852 = vmatmul.mubr.msk.f32.gmra.mrb[4].mxu1 %vm218_vm0, %v117_v13  ;;  %v132_v42 = vld [vmem:[%s4895_s0 + $0x3b0] sm:$0xff]  ;;  %v35_v43 = vld [vmem:[%s4895_s0 + $0xa8] sm:$0xff]  ;;  %v133_v45 = vld [vmem:[%s4895_s0 + $0x3b8] sm:$0xff] }
  0x10   :  { %2854 = vmatprep.mubr.msk.f32.mxu1 %vm218_vm0, %v118_v14  ;;  %v36_v44 = vld [vmem:[%s4895_s0 + $0xb0] sm:$0xff]  ;;  %v134_v46 = vld [vmem:[%s4895_s0 + $0x3c0] sm:$0xff]  ;;  %v37_v47 = vld [vmem:[%s4895_s0 + $0xb8] sm:$0xff] }
  0x11   :  { %v38_v48 = vld [vmem:[%s4895_s0 + $0xc0] sm:$0xff]  ;;  %v135_v49 = vld [vmem:[%s4895_s0 + $0x3c8] sm:$0xff]  ;;  %v136_v50 = vld [vmem:[%s4895_s0 + $0x3d0] sm:$0xff] }
  0x12   :  { %2708 = vmatmul.mubr.msk.f32.gmra.mrb[6].mxu0 %vm218_vm0, %v21_v15  ;;  %v39_v51 = vld [vmem:[%s4895_s0 + $0xc8] sm:$0xff]  ;;  %v40_v52 = vld [vmem:[%s4895_s0 + $0xd0] sm:$0xff]  ;;  %v137_v53 = vld [vmem:[%s4895_s0 + $0x3d8] sm:$0xff] }
  0x13   :  { %2710 = vmatprep.mubr.msk.f32.mxu0 %vm218_vm0, %v22_v16  ;;  %2855 = vmatmul.mubr.msk.f32.gmra.mrb[6].mxu1 %vm218_vm0, %v119_v17  ;;  %v138_v54 = vld [vmem:[%s4895_s0 + $0x3e0] sm:$0xff]  ;;  %v41_v55 = vld [vmem:[%s4895_s0 + $0xd8] sm:$0xff]  ;;  %v139_v57 = vld [vmem:[%s4895_s0 + $0x3e8] sm:$0xff] }
  0x14   :  { %2857 = vmatprep.mubr.msk.f32.mxu1 %vm218_vm0, %v120_v18  ;;  %v42_v56 = vld [vmem:[%s4895_s0 + $0xe0] sm:$0xff]  ;;  %v140_v58 = vld [vmem:[%s4895_s0 + $0x3f0] sm:$0xff]  ;;  %v43_v59 = vld [vmem:[%s4895_s0 + $0xe8] sm:$0xff] }
  0x15   :  { %v44_v60 = vld [vmem:[%s4895_s0 + $0xf0] sm:$0xff]  ;;  %v141_v61 = vld [vmem:[%s4895_s0 + $0x3f8] sm:$0xff]  ;;  %v142_v62 = vld [vmem:[%s4895_s0 + $0x400] sm:$0xff] }
  0x16   :  { %2711 = vmatmul.mubr.msk.f32.gmra.mrb[8].mxu0 %vm218_vm0, %v23_v19  ;;  %v45_v63 = vld [vmem:[%s4895_s0 + $0xf8] sm:$0xff]  ;;  %v46_v0 = vld [vmem:[%s4895_s0 + $0x100] sm:$0xff]  ;;  %v143_v1 = vld [vmem:[%s4895_s0 + $0x408] sm:$0xff] }
  0x17   :  { %2713 = vmatprep.mubr.msk.f32.mxu0 %vm218_vm0, %v24_v20  ;;  %2858 = vmatmul.mubr.msk.f32.gmra.mrb[8].mxu1 %vm218_vm0, %v121_v21  ;;  %v144_v2 = vld [vmem:[%s4895_s0 + $0x410] sm:$0xff]  ;;  %v47_v3 = vld [vmem:[%s4895_s0 + $0x108] sm:$0xff]  ;;  %v145_v5 = vld [vmem:[%s4895_s0 + $0x418] sm:$0xff] }
  0x18   :  { %2860 = vmatprep.mubr.msk.f32.mxu1 %vm218_vm0, %v122_v22  ;;  %v48_v4 = vld [vmem:[%s4895_s0 + $0x110] sm:$0xff]  ;;  %v146_v6 = vld [vmem:[%s4895_s0 + $0x420] sm:$0xff]  ;;  %v49_v7 = vld [vmem:[%s4895_s0 + $0x118] sm:$0xff] }
  0x19   :  { %v50_v8 = vld [vmem:[%s4895_s0 + $0x120] sm:$0xff]  ;;  %v147_v9 = vld [vmem:[%s4895_s0 + $0x428] sm:$0xff]  ;;  %v148_v10 = vld [vmem:[%s4895_s0 + $0x430] sm:$0xff] }
  0x1a   :  { %2714 = vmatmul.mubr.msk.f32.gmra.mrb[10].mxu0 %vm218_vm0, %v25_v23  ;;  %v51_v11 = vld [vmem:[%s4895_s0 + $0x128] sm:$0xff]  ;;  %v52_v12 = vld [vmem:[%s4895_s0 + $0x130] sm:$0xff]  ;;  %v149_v13 = vld [vmem:[%s4895_s0 + $0x438] sm:$0xff] }
  0x1b   :  { %2716 = vmatprep.mubr.msk.f32.mxu0 %vm218_vm0, %v26_v24  ;;  %2861 = vmatmul.mubr.msk.f32.gmra.mrb[10].mxu1 %vm218_vm0, %v123_v25  ;;  %v150_v14 = vld [vmem:[%s4895_s0 + $0x440] sm:$0xff]  ;;  %v53_v15 = vld [vmem:[%s4895_s0 + $0x138] sm:$0xff]  ;;  %v151_v17 = vld [vmem:[%s4895_s0 + $0x448] sm:$0xff] }
  0x1c   :  { %2863 = vmatprep.mubr.msk.f32.mxu1 %vm218_vm0, %v124_v26  ;;  %v54_v16 = vld [vmem:[%s4895_s0 + $0x140] sm:$0xff]  ;;  %v152_v18 = vld [vmem:[%s4895_s0 + $0x450] sm:$0xff]  ;;  %v55_v19 = vld [vmem:[%s4895_s0 + $0x148] sm:$0xff] }
  0x1d   :  { %v56_v20 = vld [vmem:[%s4895_s0 + $0x150] sm:$0xff]  ;;  %v153_v21 = vld [vmem:[%s4895_s0 + $0x458] sm:$0xff]  ;;  %v154_v22 = vld [vmem:[%s4895_s0 + $0x460] sm:$0xff] }
  0x1e   :  { %2717 = vmatmul.mubr.msk.f32.gmra.mrb[12].mxu0 %vm218_vm0, %v27_v27  ;;  %v57_v23 = vld [vmem:[%s4895_s0 + $0x158] sm:$0xff]  ;;  %v58_v24 = vld [vmem:[%s4895_s0 + $0x160] sm:$0xff]  ;;  %v155_v25 = vld [vmem:[%s4895_s0 + $0x468] sm:$0xff] }
  0x1f   :  { %2719 = vmatprep.mubr.msk.f32.mxu0 %vm218_vm0, %v28_v28  ;;  %2864 = vmatmul.mubr.msk.f32.gmra.mrb[12].mxu1 %vm218_vm0, %v125_v29  ;;  %v156_v26 = vld [vmem:[%s4895_s0 + $0x470] sm:$0xff]  ;;  %v59_v27 = vld [vmem:[%s4895_s0 + $0x168] sm:$0xff]  ;;  %v157_v29 = vld [vmem:[%s4895_s0 + $0x478] sm:$0xff] }
  0x20   :  { %2866 = vmatprep.mubr.msk.f32.mxu1 %vm218_vm0, %v126_v30  ;;  %v60_v28 = vld [vmem:[%s4895_s0 + $0x170] sm:$0xff]  ;;  %v158_v30 = vld [vmem:[%s4895_s0 + $0x480] sm:$0xff] }
  0x22   :  { %2720 = vmatmul.mubr.msk.f32.gmra.mrb[14].mxu0 %vm218_vm0, %v29_v31  ;;  %v61_v31 = vld [vmem:[%s4895_s0 + $0x178] sm:$0xff] }
  0x23   :  { %2722 = vmatprep.mubr.msk.f32.mxu0 %vm218_vm0, %v30_v32  ;;  %2867 = vmatmul.mubr.msk.f32.gmra.mrb[14].mxu1 %vm218_vm0, %v127_v33  ;;  %v62_v32 = vld [vmem:[%s4895_s0 + $0x180] sm:$0xff]  ;;  %v159_v33 = vld [vmem:[%s4895_s0 + $0x488] sm:$0xff] }
  0x24   :  { %2869 = vmatprep.mubr.msk.f32.mxu1 %vm218_vm0, %v128_v34  ;;  %v160_v34 = vld [vmem:[%s4895_s0 + $0x490] sm:$0xff] }
  0x26   :  { %2723 = vmatmul.mubr.msk.f32.gmra.mrb[16].mxu0 %vm218_vm0, %v31_v35  ;;  %v63_v35 = vld [vmem:[%s4895_s0 + $0x188] sm:$0xff] }
  0x27   :  { %2725 = vmatprep.mubr.msk.f32.mxu0 %vm218_vm0, %v32_v36  ;;  %2870 = vmatmul.mubr.msk.f32.gmra.mrb[16].mxu1 %vm218_vm0, %v129_v37  ;;  %v64_v36 = vld [vmem:[%s4895_s0 + $0x190] sm:$0xff]  ;;  %v161_v37 = vld [vmem:[%s4895_s0 + $0x498] sm:$0xff] }
  0x28   :  { %2872 = vmatprep.mubr.msk.f32.mxu1 %vm218_vm0, %v130_v38  ;;  %v162_v38 = vld [vmem:[%s4895_s0 + $0x4a0] sm:$0xff] }
  0x2a   :  { %2726 = vmatmul.mubr.msk.f32.gmra.mrb[18].mxu0 %vm218_vm0, %v33_v39  ;;  %v65_v39 = vld [vmem:[%s4895_s0 + $0x198] sm:$0xff] }
  0x2b   :  { %2728 = vmatprep.mubr.msk.f32.mxu0 %vm218_vm0, %v34_v40  ;;  %2873 = vmatmul.mubr.msk.f32.gmra.mrb[18].mxu1 %vm218_vm0, %v131_v41  ;;  %v66_v40 = vld [vmem:[%s4895_s0 + $0x1a0] sm:$0xff]  ;;  %v163_v41 = vld [vmem:[%s4895_s0 + $0x4a8] sm:$0xff] }
  0x2c   :  { %2875 = vmatprep.mubr.msk.f32.mxu1 %vm218_vm0, %v132_v42  ;;  %v164_v42 = vld [vmem:[%s4895_s0 + $0x4b0] sm:$0xff] }
  0x2e   :  { %2729 = vmatmul.mubr.msk.f32.gmra.mrb[20].mxu0 %vm218_vm0, %v35_v43  ;;  %v67_v43 = vld [vmem:[%s4895_s0 + $0x1a8] sm:$0xff] }
  0x2f   :  { %2731 = vmatprep.mubr.msk.f32.mxu0 %vm218_vm0, %v36_v44  ;;  %2876 = vmatmul.mubr.msk.f32.gmra.mrb[20].mxu1 %vm218_vm0, %v133_v45  ;;  %v68_v44 = vld [vmem:[%s4895_s0 + $0x1b0] sm:$0xff]  ;;  %v165_v45 = vld [vmem:[%s4895_s0 + $0x4b8] sm:$0xff] }
  0x30   :  { %2878 = vmatprep.mubr.msk.f32.mxu1 %vm218_vm0, %v134_v46  ;;  %v166_v46 = vld [vmem:[%s4895_s0 + $0x4c0] sm:$0xff] }
  0x32   :  { %2732 = vmatmul.mubr.msk.f32.gmra.mrb[22].mxu0 %vm218_vm0, %v37_v47  ;;  %v69_v47 = vld [vmem:[%s4895_s0 + $0x1b8] sm:$0xff] }
  0x33   :  { %2734 = vmatprep.mubr.msk.f32.mxu0 %vm218_vm0, %v38_v48  ;;  %2879 = vmatmul.mubr.msk.f32.gmra.mrb[22].mxu1 %vm218_vm0, %v135_v49  ;;  %v70_v48 = vld [vmem:[%s4895_s0 + $0x1c0] sm:$0xff]  ;;  %v167_v49 = vld [vmem:[%s4895_s0 + $0x4c8] sm:$0xff] }
  0x34   :  { %2881 = vmatprep.mubr.msk.f32.mxu1 %vm218_vm0, %v136_v50  ;;  %v168_v50 = vld [vmem:[%s4895_s0 + $0x4d0] sm:$0xff] }
  0x36   :  { %2735 = vmatmul.mubr.msk.f32.gmra.mrb[24].mxu0 %vm218_vm0, %v39_v51  ;;  %v71_v51 = vld [vmem:[%s4895_s0 + $0x1c8] sm:$0xff] }
  0x37   :  { %2737 = vmatprep.mubr.msk.f32.mxu0 %vm218_vm0, %v40_v52  ;;  %2882 = vmatmul.mubr.msk.f32.gmra.mrb[24].mxu1 %vm218_vm0, %v137_v53  ;;  %v72_v52 = vld [vmem:[%s4895_s0 + $0x1d0] sm:$0xff]  ;;  %v169_v53 = vld [vmem:[%s4895_s0 + $0x4d8] sm:$0xff] }
  0x38   :  { %2884 = vmatprep.mubr.msk.f32.mxu1 %vm218_vm0, %v138_v54  ;;  %v170_v54 = vld [vmem:[%s4895_s0 + $0x4e0] sm:$0xff] }
  0x3a   :  { %2738 = vmatmul.mubr.msk.f32.gmra.mrb[26].mxu0 %vm218_vm0, %v41_v55  ;;  %v73_v55 = vld [vmem:[%s4895_s0 + $0x1d8] sm:$0xff] }
  0x3b   :  { %2740 = vmatprep.mubr.msk.f32.mxu0 %vm218_vm0, %v42_v56  ;;  %2885 = vmatmul.mubr.msk.f32.gmra.mrb[26].mxu1 %vm218_vm0, %v139_v57  ;;  %v74_v56 = vld [vmem:[%s4895_s0 + $0x1e0] sm:$0xff]  ;;  %v171_v57 = vld [vmem:[%s4895_s0 + $0x4e8] sm:$0xff] }
  0x3c   :  { %2887 = vmatprep.mubr.msk.f32.mxu1 %vm218_vm0, %v140_v58  ;;  %v172_v58 = vld [vmem:[%s4895_s0 + $0x4f0] sm:$0xff] }
  0x3e   :  { %2741 = vmatmul.mubr.msk.f32.gmra.mrb[28].mxu0 %vm218_vm0, %v43_v59  ;;  %v75_v59 = vld [vmem:[%s4895_s0 + $0x1e8] sm:$0xff] }
  0x3f   :  { %2743 = vmatprep.mubr.msk.f32.mxu0 %vm218_vm0, %v44_v60  ;;  %2888 = vmatmul.mubr.msk.f32.gmra.mrb[28].mxu1 %vm218_vm0, %v141_v61  ;;  %v76_v60 = vld [vmem:[%s4895_s0 + $0x1f0] sm:$0xff]  ;;  %v173_v61 = vld [vmem:[%s4895_s0 + $0x4f8] sm:$0xff] }
  0x40   :  { %2890 = vmatprep.mubr.msk.f32.mxu1 %vm218_vm0, %v142_v62  ;;  %v174_v62 = vld [vmem:[%s4895_s0 + $0x500] sm:$0xff] }
  0x42   :  { %2744 = vmatmul.mubr.msk.f32.gmra.mrb[30].mxu0 %vm218_vm0, %v45_v63  ;;  %v77_v63 = vld [vmem:[%s4895_s0 + $0x1f8] sm:$0xff] }
  0x43   :  { %2746 = vmatprep.mubr.msk.f32.mxu0 %vm218_vm0, %v46_v0  ;;  %2891 = vmatmul.mubr.msk.f32.gmra.mrb[30].mxu1 %vm218_vm0, %v143_v1  ;;  %v78_v0 = vld [vmem:[%s4895_s0 + $0x200] sm:$0xff]  ;;  %v175_v1 = vld [vmem:[%s4895_s0 + $0x508] sm:$0xff] }
  0x44   :  { %2893 = vmatprep.mubr.msk.f32.mxu1 %vm218_vm0, %v144_v2  ;;  %v176_v2 = vld [vmem:[%s4895_s0 + $0x510] sm:$0xff] }
  0x46   :  { %2747 = vmatmul.mubr.msk.f32.gmra.mrb[32].mxu0 %vm218_vm0, %v47_v3  ;;  %v79_v3 = vld [vmem:[%s4895_s0 + $0x208] sm:$0xff] }
  0x47   :  { %2749 = vmatprep.mubr.msk.f32.mxu0 %vm218_vm0, %v48_v4  ;;  %2894 = vmatmul.mubr.msk.f32.gmra.mrb[32].mxu1 %vm218_vm0, %v145_v5  ;;  %v80_v4 = vld [vmem:[%s4895_s0 + $0x210] sm:$0xff]  ;;  %v177_v5 = vld [vmem:[%s4895_s0 + $0x518] sm:$0xff] }
  0x48   :  { %2896 = vmatprep.mubr.msk.f32.mxu1 %vm218_vm0, %v146_v6  ;;  %v178_v6 = vld [vmem:[%s4895_s0 + $0x520] sm:$0xff] }
  0x4a   :  { %2750 = vmatmul.mubr.msk.f32.gmra.mrb[34].mxu0 %vm218_vm0, %v49_v7  ;;  %v81_v7 = vld [vmem:[%s4895_s0 + $0x218] sm:$0xff] }
  0x4b   :  { %2752 = vmatprep.mubr.msk.f32.mxu0 %vm218_vm0, %v50_v8  ;;  %2897 = vmatmul.mubr.msk.f32.gmra.mrb[34].mxu1 %vm218_vm0, %v147_v9  ;;  %v82_v8 = vld [vmem:[%s4895_s0 + $0x220] sm:$0xff]  ;;  %v179_v9 = vld [vmem:[%s4895_s0 + $0x528] sm:$0xff] }
  0x4c   :  { %2899 = vmatprep.mubr.msk.f32.mxu1 %vm218_vm0, %v148_v10  ;;  %v180_v10 = vld [vmem:[%s4895_s0 + $0x530] sm:$0xff] }
  0x4e   :  { %2753 = vmatmul.mubr.msk.f32.gmra.mrb[36].mxu0 %vm218_vm0, %v51_v11  ;;  %v83_v11 = vld [vmem:[%s4895_s0 + $0x228] sm:$0xff] }
  0x4f   :  { %2755 = vmatprep.mubr.msk.f32.mxu0 %vm218_vm0, %v52_v12  ;;  %2900 = vmatmul.mubr.msk.f32.gmra.mrb[36].mxu1 %vm218_vm0, %v149_v13  ;;  %v84_v12 = vld [vmem:[%s4895_s0 + $0x230] sm:$0xff]  ;;  %v181_v13 = vld [vmem:[%s4895_s0 + $0x538] sm:$0xff] }
  0x50   :  { %2902 = vmatprep.mubr.msk.f32.mxu1 %vm218_vm0, %v150_v14  ;;  %v182_v14 = vld [vmem:[%s4895_s0 + $0x540] sm:$0xff] }
  0x52   :  { %2756 = vmatmul.mubr.msk.f32.gmra.mrb[38].mxu0 %vm218_vm0, %v53_v15  ;;  %v85_v15 = vld [vmem:[%s4895_s0 + $0x238] sm:$0xff] }
  0x53   :  { %2758 = vmatprep.mubr.msk.f32.mxu0 %vm218_vm0, %v54_v16  ;;  %2903 = vmatmul.mubr.msk.f32.gmra.mrb[38].mxu1 %vm218_vm0, %v151_v17  ;;  %v86_v16 = vld [vmem:[%s4895_s0 + $0x240] sm:$0xff]  ;;  %v183_v17 = vld [vmem:[%s4895_s0 + $0x548] sm:$0xff] }
  0x54   :  { %2905 = vmatprep.mubr.msk.f32.mxu1 %vm218_vm0, %v152_v18  ;;  %v184_v18 = vld [vmem:[%s4895_s0 + $0x550] sm:$0xff] }
  0x56   :  { %2759 = vmatmul.mubr.msk.f32.gmra.mrb[40].mxu0 %vm218_vm0, %v55_v19  ;;  %v87_v19 = vld [vmem:[%s4895_s0 + $0x248] sm:$0xff] }
  0x57   :  { %2761 = vmatprep.mubr.msk.f32.mxu0 %vm218_vm0, %v56_v20  ;;  %2906 = vmatmul.mubr.msk.f32.gmra.mrb[40].mxu1 %vm218_vm0, %v153_v21  ;;  %v88_v20 = vld [vmem:[%s4895_s0 + $0x250] sm:$0xff]  ;;  %v185_v21 = vld [vmem:[%s4895_s0 + $0x558] sm:$0xff] }
  0x58   :  { %2908 = vmatprep.mubr.msk.f32.mxu1 %vm218_vm0, %v154_v22  ;;  %v186_v22 = vld [vmem:[%s4895_s0 + $0x560] sm:$0xff] }
  0x5a   :  { %2762 = vmatmul.mubr.msk.f32.gmra.mrb[42].mxu0 %vm218_vm0, %v57_v23  ;;  %v89_v23 = vld [vmem:[%s4895_s0 + $0x258] sm:$0xff] }
  0x5b   :  { %2764 = vmatprep.mubr.msk.f32.mxu0 %vm218_vm0, %v58_v24  ;;  %2909 = vmatmul.mubr.msk.f32.gmra.mrb[42].mxu1 %vm218_vm0, %v155_v25  ;;  %v90_v24 = vld [vmem:[%s4895_s0 + $0x260] sm:$0xff]  ;;  %v187_v25 = vld [vmem:[%s4895_s0 + $0x568] sm:$0xff] }
  0x5c   :  { %2911 = vmatprep.mubr.msk.f32.mxu1 %vm218_vm0, %v156_v26  ;;  %v188_v26 = vld [vmem:[%s4895_s0 + $0x570] sm:$0xff] }
  0x5e   :  { %2765 = vmatmul.mubr.msk.f32.gmra.mrb[44].mxu0 %vm218_vm0, %v59_v27  ;;  %v91_v27 = vld [vmem:[%s4895_s0 + $0x268] sm:$0xff] }
  0x5f   :  { %2767 = vmatprep.mubr.msk.f32.mxu0 %vm218_vm0, %v60_v28  ;;  %2912 = vmatmul.mubr.msk.f32.gmra.mrb[44].mxu1 %vm218_vm0, %v157_v29  ;;  %v92_v28 = vld [vmem:[%s4895_s0 + $0x270] sm:$0xff]  ;;  %v189_v29 = vld [vmem:[%s4895_s0 + $0x578] sm:$0xff] }
  0x60   :  { %2914 = vmatprep.mubr.msk.f32.mxu1 %vm218_vm0, %v158_v30  ;;  %v190_v30 = vld [vmem:[%s4895_s0 + $0x580] sm:$0xff] }
  0x62   :  { %2768 = vmatmul.mubr.msk.f32.gmra.mrb[46].mxu0 %vm218_vm0, %v61_v31  ;;  %v93_v31 = vld [vmem:[%s4895_s0 + $0x278] sm:$0xff] }
  0x63   :  { %2770 = vmatprep.mubr.msk.f32.mxu0 %vm218_vm0, %v62_v32  ;;  %2915 = vmatmul.mubr.msk.f32.gmra.mrb[46].mxu1 %vm218_vm0, %v159_v33  ;;  %v94_v32 = vld [vmem:[%s4895_s0 + $0x280] sm:$0xff]  ;;  %v191_v33 = vld [vmem:[%s4895_s0 + $0x588] sm:$0xff] }
  0x64   :  { %2917 = vmatprep.mubr.msk.f32.mxu1 %vm218_vm0, %v160_v34  ;;  %v192_v34 = vld [vmem:[%s4895_s0 + $0x590] sm:$0xff] }
  0x66   :  { %2771 = vmatmul.mubr.msk.f32.gmra.mrb[48].mxu0 %vm218_vm0, %v63_v35  ;;  %v95_v35 = vld [vmem:[%s4895_s0 + $0x288] sm:$0xff] }
  0x67   :  { %2773 = vmatprep.mubr.msk.f32.mxu0 %vm218_vm0, %v64_v36  ;;  %2918 = vmatmul.mubr.msk.f32.gmra.mrb[48].mxu1 %vm218_vm0, %v161_v37  ;;  %v96_v36 = vld [vmem:[%s4895_s0 + $0x290] sm:$0xff]  ;;  %v193_v37 = vld [vmem:[%s4895_s0 + $0x598] sm:$0xff] }
  0x68   :  { %2920 = vmatprep.mubr.msk.f32.mxu1 %vm218_vm0, %v162_v38  ;;  %v194_v38 = vld [vmem:[%s4895_s0 + $0x5a0] sm:$0xff] }
  0x6a   :  { %2774 = vmatmul.mubr.msk.f32.gmra.mrb[50].mxu0 %vm218_vm0, %v65_v39  ;;  %v97_v39 = vld [vmem:[%s4895_s0 + $0x298] sm:$0xff] }
  0x6b   :  { %2776 = vmatprep.mubr.msk.f32.mxu0 %vm218_vm0, %v66_v40  ;;  %2921 = vmatmul.mubr.msk.f32.gmra.mrb[50].mxu1 %vm218_vm0, %v163_v41  ;;  %v98_v40 = vld [vmem:[%s4895_s0 + $0x2a0] sm:$0xff]  ;;  %v195_v41 = vld [vmem:[%s4895_s0 + $0x5a8] sm:$0xff] }
  0x6c   :  { %2923 = vmatprep.mubr.msk.f32.mxu1 %vm218_vm0, %v164_v42  ;;  %v196_v42 = vld [vmem:[%s4895_s0 + $0x5b0] sm:$0xff] }
  0x6e   :  { %2777 = vmatmul.mubr.msk.f32.gmra.mrb[52].mxu0 %vm218_vm0, %v67_v43  ;;  %v99_v43 = vld [vmem:[%s4895_s0 + $0x2a8] sm:$0xff] }
  0x6f   :  { %2779 = vmatprep.mubr.msk.f32.mxu0 %vm218_vm0, %v68_v44  ;;  %2924 = vmatmul.mubr.msk.f32.gmra.mrb[52].mxu1 %vm218_vm0, %v165_v45  ;;  %v100_v44 = vld [vmem:[%s4895_s0 + $0x2b0] sm:$0xff]  ;;  %v197_v45 = vld [vmem:[%s4895_s0 + $0x5b8] sm:$0xff] }
  0x70   :  { %2926 = vmatprep.mubr.msk.f32.mxu1 %vm218_vm0, %v166_v46  ;;  %v198_v46 = vld [vmem:[%s4895_s0 + $0x5c0] sm:$0xff] }
  0x72   :  { %2780 = vmatmul.mubr.msk.f32.gmra.mrb[54].mxu0 %vm218_vm0, %v69_v47  ;;  %v101_v47 = vld [vmem:[%s4895_s0 + $0x2b8] sm:$0xff] }
  0x73   :  { %2782 = vmatprep.mubr.msk.f32.mxu0 %vm218_vm0, %v70_v48  ;;  %2927 = vmatmul.mubr.msk.f32.gmra.mrb[54].mxu1 %vm218_vm0, %v167_v49  ;;  %v102_v48 = vld [vmem:[%s4895_s0 + $0x2c0] sm:$0xff]  ;;  %v199_v49 = vld [vmem:[%s4895_s0 + $0x5c8] sm:$0xff] }
  0x74   :  { %2929 = vmatprep.mubr.msk.f32.mxu1 %vm218_vm0, %v168_v50  ;;  %v200_v50 = vld [vmem:[%s4895_s0 + $0x5d0] sm:$0xff] }
  0x76   :  { %2783 = vmatmul.mubr.msk.f32.gmra.mrb[56].mxu0 %vm218_vm0, %v71_v51  ;;  %v103_v51 = vld [vmem:[%s4895_s0 + $0x2c8] sm:$0xff] }
  0x77   :  { %2785 = vmatprep.mubr.msk.f32.mxu0 %vm218_vm0, %v72_v52  ;;  %2930 = vmatmul.mubr.msk.f32.gmra.mrb[56].mxu1 %vm218_vm0, %v169_v53  ;;  %v104_v52 = vld [vmem:[%s4895_s0 + $0x2d0] sm:$0xff]  ;;  %v201_v53 = vld [vmem:[%s4895_s0 + $0x5d8] sm:$0xff] }
  0x78   :  { %2932 = vmatprep.mubr.msk.f32.mxu1 %vm218_vm0, %v170_v54  ;;  %v202_v54 = vld [vmem:[%s4895_s0 + $0x5e0] sm:$0xff] }
  0x7a   :  { %2786 = vmatmul.mubr.msk.f32.gmra.mrb[58].mxu0 %vm218_vm0, %v73_v55  ;;  %v105_v55 = vld [vmem:[%s4895_s0 + $0x2d8] sm:$0xff] }
  0x7b   :  { %2788 = vmatprep.mubr.msk.f32.mxu0 %vm218_vm0, %v74_v56  ;;  %2933 = vmatmul.mubr.msk.f32.gmra.mrb[58].mxu1 %vm218_vm0, %v171_v57  ;;  %v106_v56 = vld [vmem:[%s4895_s0 + $0x2e0] sm:$0xff]  ;;  %v203_v57 = vld [vmem:[%s4895_s0 + $0x5e8] sm:$0xff] }
  0x7c   :  { %2935 = vmatprep.mubr.msk.f32.mxu1 %vm218_vm0, %v172_v58  ;;  %v204_v58 = vld [vmem:[%s4895_s0 + $0x5f0] sm:$0xff] }
  0x7e   :  { %2789 = vmatmul.mubr.msk.f32.gmra.mrb[60].mxu0 %vm218_vm0, %v75_v59  ;;  %v107_v59 = vld [vmem:[%s4895_s0 + $0x2e8] sm:$0xff] }
  0x7f   :  { %2791 = vmatprep.mubr.msk.f32.mxu0 %vm218_vm0, %v76_v60  ;;  %2936 = vmatmul.mubr.msk.f32.gmra.mrb[60].mxu1 %vm218_vm0, %v173_v61  ;;  %v108_v60 = vld [vmem:[%s4895_s0 + $0x2f0] sm:$0xff]  ;;  %v205_v61 = vld [vmem:[%s4895_s0 + $0x5f8] sm:$0xff] }
  0x80   :  { %2938 = vmatprep.mubr.msk.f32.mxu1 %vm218_vm0, %v174_v62  ;;  %v206_v62 = vld [vmem:[%s4895_s0 + $0x600] sm:$0xff] }
  0x82   :  { %2792 = vmatmul.mubr.msk.f32.gmra.mrb[62].mxu0 %vm218_vm0, %v77_v63  ;;  %v109_v63 = vld [vmem:[%s4895_s0 + $0x2f8] sm:$0xff] }
  0x83   :  { %2794 = vmatprep.mubr.msk.f32.mxu0 %vm218_vm0, %v78_v0  ;;  %2939 = vmatmul.mubr.msk.f32.gmra.mrb[62].mxu1 %vm218_vm0, %v175_v1  ;;  %v110_v0 = vld [vmem:[%s4895_s0 + $0x300] sm:$0xff]  ;;  %v207_v1 = vld [vmem:[%s4895_s0 + $0x608] sm:$0xff] }
  0x84   :  { %2941 = vmatprep.mubr.msk.f32.mxu1 %vm218_vm0, %v176_v2  ;;  %v208_v2 = vld [vmem:[%s4895_s0 + $0x610] sm:$0xff] }
  0x86   :  { %2795 = vmatmul.mubr.msk.f32.gmra.mrb[64].mxu0 %vm218_vm0, %v79_v3  ;;  %v111_v3 = vld [vmem:[%s4895_s0 + $0x308] sm:$0xff] }
  0x87   :  { %2797 = vmatprep.mubr.msk.f32.mxu0 %vm218_vm0, %v80_v4  ;;  %2942 = vmatmul.mubr.msk.f32.gmra.mrb[64].mxu1 %vm218_vm0, %v177_v5  ;;  %v209_v4 = vld [vmem:[%s4895_s0 + $0x618] sm:$0xff]  ;;  %v4201_v5 = vld [vmem:[%s4896_s2] ss:$0 sm:$0xff] }
  0x88   :  { %2944 = vmatprep.mubr.msk.f32.mxu1 %vm218_vm0, %v178_v6 }
  0x8a   :  { %2798 = vmatmul.mubr.msk.f32.gmra.mrb[66].mxu0 %vm218_vm0, %v81_v7 }
  0x8b   :  { %2800 = vmatprep.mubr.msk.f32.mxu0 %vm218_vm0, %v82_v8  ;;  %2945 = vmatmul.mubr.msk.f32.gmra.mrb[66].mxu1 %vm218_vm0, %v179_v9 }
  0x8c   :  { %2947 = vmatprep.mubr.msk.f32.mxu1 %vm218_vm0, %v180_v10 }
  0x8e   :  { %2801 = vmatmul.mubr.msk.f32.gmra.mrb[68].mxu0 %vm218_vm0, %v83_v11 }
  0x8f   :  { %2803 = vmatprep.mubr.msk.f32.mxu0 %vm218_vm0, %v84_v12  ;;  %2948 = vmatmul.mubr.msk.f32.gmra.mrb[68].mxu1 %vm218_vm0, %v181_v13 }
  0x90   :  { %2950 = vmatprep.mubr.msk.f32.mxu1 %vm218_vm0, %v182_v14 }
  0x92   :  { %2804 = vmatmul.mubr.msk.f32.gmra.mrb[70].mxu0 %vm218_vm0, %v85_v15 }
  0x93   :  { %2806 = vmatprep.mubr.msk.f32.mxu0 %vm218_vm0, %v86_v16  ;;  %2951 = vmatmul.mubr.msk.f32.gmra.mrb[70].mxu1 %vm218_vm0, %v183_v17 }
  0x94   :  { %2953 = vmatprep.mubr.msk.f32.mxu1 %vm218_vm0, %v184_v18 }
  0x96   :  { %2807 = vmatmul.mubr.msk.f32.gmra.mrb[72].mxu0 %vm218_vm0, %v87_v19 }
  0x97   :  { %2809 = vmatprep.mubr.msk.f32.mxu0 %vm218_vm0, %v88_v20  ;;  %2954 = vmatmul.mubr.msk.f32.gmra.mrb[72].mxu1 %vm218_vm0, %v185_v21 }
  0x98   :  { %2956 = vmatprep.mubr.msk.f32.mxu1 %vm218_vm0, %v186_v22 }
  0x9a   :  { %2810 = vmatmul.mubr.msk.f32.gmra.mrb[74].mxu0 %vm218_vm0, %v89_v23 }
  0x9b   :  { %2812 = vmatprep.mubr.msk.f32.mxu0 %vm218_vm0, %v90_v24  ;;  %2957 = vmatmul.mubr.msk.f32.gmra.mrb[74].mxu1 %vm218_vm0, %v187_v25 }
  0x9c   :  { %2959 = vmatprep.mubr.msk.f32.mxu1 %vm218_vm0, %v188_v26 }
  0x9e   :  { %2813 = vmatmul.mubr.msk.f32.gmra.mrb[76].mxu0 %vm218_vm0, %v91_v27 }
  0x9f   :  { %2815 = vmatprep.mubr.msk.f32.mxu0 %vm218_vm0, %v92_v28  ;;  %2960 = vmatmul.mubr.msk.f32.gmra.mrb[76].mxu1 %vm218_vm0, %v189_v29 }
  0xa0   :  { %2962 = vmatprep.mubr.msk.f32.mxu1 %vm218_vm0, %v190_v30 }
  0xa2   :  { %2816 = vmatmul.mubr.msk.f32.gmra.mrb[78].mxu0 %vm218_vm0, %v93_v31 }
  0xa3   :  { %2818 = vmatprep.mubr.msk.f32.mxu0 %vm218_vm0, %v94_v32  ;;  %2963 = vmatmul.mubr.msk.f32.gmra.mrb[78].mxu1 %vm218_vm0, %v191_v33 }
  0xa4   :  { %2965 = vmatprep.mubr.msk.f32.mxu1 %vm218_vm0, %v192_v34 }
  0xa6   :  { %2819 = vmatmul.mubr.msk.f32.gmra.mrb[80].mxu0 %vm218_vm0, %v95_v35 }
  0xa7   :  { %2821 = vmatprep.mubr.msk.f32.mxu0 %vm218_vm0, %v96_v36  ;;  %2966 = vmatmul.mubr.msk.f32.gmra.mrb[80].mxu1 %vm218_vm0, %v193_v37 }
  0xa8   :  { %2968 = vmatprep.mubr.msk.f32.mxu1 %vm218_vm0, %v194_v38 }
  0xaa   :  { %2822 = vmatmul.mubr.msk.f32.gmra.mrb[82].mxu0 %vm218_vm0, %v97_v39 }
  0xab   :  { %2824 = vmatprep.mubr.msk.f32.mxu0 %vm218_vm0, %v98_v40  ;;  %2969 = vmatmul.mubr.msk.f32.gmra.mrb[82].mxu1 %vm218_vm0, %v195_v41 }
  0xac   :  { %2971 = vmatprep.mubr.msk.f32.mxu1 %vm218_vm0, %v196_v42 }
  0xae   :  { %2825 = vmatmul.mubr.msk.f32.gmra.mrb[84].mxu0 %vm218_vm0, %v99_v43 }
  0xaf   :  { %2827 = vmatprep.mubr.msk.f32.mxu0 %vm218_vm0, %v100_v44  ;;  %2972 = vmatmul.mubr.msk.f32.gmra.mrb[84].mxu1 %vm218_vm0, %v197_v45 }
  0xb0   :  { %2974 = vmatprep.mubr.msk.f32.mxu1 %vm218_vm0, %v198_v46 }
  0xb2   :  { %2828 = vmatmul.mubr.msk.f32.gmra.mrb[86].mxu0 %vm218_vm0, %v101_v47 }
  0xb3   :  { %2830 = vmatprep.mubr.msk.f32.mxu0 %vm218_vm0, %v102_v48  ;;  %2975 = vmatmul.mubr.msk.f32.gmra.mrb[86].mxu1 %vm218_vm0, %v199_v49 }
  0xb4   :  { %2977 = vmatprep.mubr.msk.f32.mxu1 %vm218_vm0, %v200_v50 }
  0xb6   :  { %2831 = vmatmul.mubr.msk.f32.gmra.mrb[88].mxu0 %vm218_vm0, %v103_v51 }
  0xb7   :  { %2833 = vmatprep.mubr.msk.f32.mxu0 %vm218_vm0, %v104_v52  ;;  %2978 = vmatmul.mubr.msk.f32.gmra.mrb[88].mxu1 %vm218_vm0, %v201_v53 }
  0xb8   :  { %2980 = vmatprep.mubr.msk.f32.mxu1 %vm218_vm0, %v202_v54 }
  0xba   :  { %2834 = vmatmul.mubr.msk.f32.gmra.mrb[90].mxu0 %vm218_vm0, %v105_v55 }
  0xbb   :  { %2836 = vmatprep.mubr.msk.f32.mxu0 %vm218_vm0, %v106_v56  ;;  %2981 = vmatmul.mubr.msk.f32.gmra.mrb[90].mxu1 %vm218_vm0, %v203_v57 }
  0xbc   :  { %2983 = vmatprep.mubr.msk.f32.mxu1 %vm218_vm0, %v204_v58 }
  0xbe   :  { %2837 = vmatmul.mubr.msk.f32.gmra.mrb[92].mxu0 %vm218_vm0, %v107_v59 }
  0xbf   :  { %2839 = vmatprep.mubr.msk.f32.mxu0 %vm218_vm0, %v108_v60  ;;  %2984 = vmatmul.mubr.msk.f32.gmra.mrb[92].mxu1 %vm218_vm0, %v205_v61 }
  0xc0   :  { %2986 = vmatprep.mubr.msk.f32.mxu1 %vm218_vm0, %v206_v62 }
  0xc2   :  { %2840 = vmatmul.mubr.msk.f32.gmra.mrb[94].mxu0 %vm218_vm0, %v109_v63 }
  0xc3   :  { %2842 = vmatprep.mubr.msk.f32.mxu0 %vm218_vm0, %v110_v0  ;;  %2987 = vmatmul.mubr.msk.f32.gmra.mrb[94].mxu1 %vm218_vm0, %v207_v1 }
  0xc4   :  { %2989 = vmatprep.mubr.msk.f32.mxu1 %vm218_vm0, %v208_v2 }
  0xc6   :  { %2843 = vmatmul.mubr.msk.f32.gmra.mrb[96].mxu0 %vm218_vm0, %v111_v3 }
  0xc7   :  { %2990 = vmatmul.mubr.msk.f32.gmra.mrb[96].mxu1 %vm218_vm0, %v209_v4 }
  0xd9   :  { %v2700_v6 = vpop.f32.mrb[0].mxu0 }
  0xda   :  { %v882_v7 = vadd.f32 %v2700_v6, %v4201_v5  ;;  %v876_v8 = vpop.f32.mrb[1].mxu0  ;;  %v2847_v9 = vpop.f32.mrb[0].mxu1 }
  0xdb   :  { %v877_v10 = vadd.f32 %v4201_v5, %v876_v8  ;;  %v1372_v11 = vadd.f32 %v2847_v9, %v4201_v5  ;;  %v1366_v12 = vpop.f32.mrb[1].mxu1 }
  0xdc   :  { %2994 = vtanh.f32 %v882_v7  ;;  %v1367_v13 = vadd.f32 %v4201_v5, %v1366_v12 }
  0xdd   :  { %2996 = vtanh.f32 %v877_v10  ;;  %v2703_v14 = vpop.f32.mrb[2].mxu0 }
  0xde   :  { %2998 = vtanh.f32 %v1372_v11  ;;  %v892_v15 = vadd.f32 %v2703_v14, %v4201_v5  ;;  %v886_v16 = vpop.f32.mrb[3].mxu0  ;;  %v2850_v17 = vpop.f32.mrb[2].mxu1 }
  0xdf   :  { %3000 = vtanh.f32 %v1367_v13  ;;  %v887_v18 = vadd.f32 %v4201_v5, %v886_v16  ;;  %v1382_v19 = vadd.f32 %v2850_v17, %v4201_v5  ;;  %v1376_v20 = vpop.f32.mrb[3].mxu1 }
  0xe0   :  { %3002 = vtanh.f32 %v892_v15  ;;  %v1377_v21 = vadd.f32 %v4201_v5, %v1376_v20 }
  0xe1   :  { %3004 = vtanh.f32 %v887_v18  ;;  %v2706_v22 = vpop.f32.mrb[4].mxu0 }
  0xe2   :  { %3006 = vtanh.f32 %v1382_v19  ;;  %v902_v23 = vadd.f32 %v2706_v22, %v4201_v5  ;;  %v896_v24 = vpop.f32.mrb[5].mxu0  ;;  %v2853_v25 = vpop.f32.mrb[4].mxu1 }
  0xe3   :  { %3008 = vtanh.f32 %v1377_v21  ;;  %v897_v26 = vadd.f32 %v4201_v5, %v896_v24  ;;  %v1392_v27 = vadd.f32 %v2853_v25, %v4201_v5  ;;  %v1386_v28 = vpop.f32.mrb[5].mxu1 }
  0xe4   :  { %3010 = vtanh.f32 %v902_v23  ;;  %v1387_v29 = vadd.f32 %v4201_v5, %v1386_v28 }
  0xe5   :  { %3012 = vtanh.f32 %v897_v26  ;;  %v2709_v30 = vpop.f32.mrb[6].mxu0 }
  0xe6   :  { %v4215_v31 = vpop.eup %2994  ;;  %3014 = vtanh.f32 %v1392_v27  ;;  %v912_v32 = vadd.f32 %v2709_v30, %v4201_v5  ;;  %v906_v33 = vpop.f32.mrb[7].mxu0 }
  0xe7   :  { %v2856_v34 = vpop.f32.mrb[6].mxu1  ;;  %v4218_v35 = vpop.eup %2996  ;;  %3016 = vtanh.f32 %v1387_v29  ;;  %v907_v36 = vadd.f32 %v4201_v5, %v906_v33 }
  0xe8   :  { %v1402_v37 = vadd.f32 %v2856_v34, %v4201_v5  ;;  %v1396_v38 = vpop.f32.mrb[7].mxu1  ;;  %v4222_v39 = vpop.eup %2998  ;;  %3018 = vtanh.f32 %v912_v32 }
  0xe9   :  { %v1397_v40 = vadd.f32 %v4201_v5, %v1396_v38  ;;  %v4225_v41 = vpop.eup %3000  ;;  %3020 = vtanh.f32 %v907_v36  ;;  %v2712_v42 = vpop.f32.mrb[8].mxu0 }
  0xea   :  { %v4227_v43 = vpop.eup %3002  ;;  %3022 = vtanh.f32 %v1402_v37  ;;  %v922_v44 = vadd.f32 %v2712_v42, %v4201_v5  ;;  %v916_v45 = vpop.f32.mrb[9].mxu0 }
  0xeb   :  { %v2859_v46 = vpop.f32.mrb[8].mxu1  ;;  %v4230_v47 = vpop.eup %3004  ;;  %3024 = vtanh.f32 %v1397_v40  ;;  %v917_v48 = vadd.f32 %v4201_v5, %v916_v45 }
  0xec   :  { %v1412_v49 = vadd.f32 %v2859_v46, %v4201_v5  ;;  %v1406_v50 = vpop.f32.mrb[9].mxu1  ;;  %v4234_v51 = vpop.eup %3006  ;;  %3026 = vtanh.f32 %v922_v44 }
  0xed   :  { %v1407_v52 = vadd.f32 %v4201_v5, %v1406_v50  ;;  %v4237_v53 = vpop.eup %3008  ;;  %3028 = vtanh.f32 %v917_v48  ;;  %v2715_v54 = vpop.f32.mrb[10].mxu0 }
  0xee   :  { %v4239_v55 = vpop.eup %3010  ;;  %3030 = vtanh.f32 %v1412_v49  ;;  %v932_v56 = vadd.f32 %v2715_v54, %v4201_v5  ;;  %v926_v57 = vpop.f32.mrb[11].mxu0 }
  0xef   :  { %v2862_v58 = vpop.f32.mrb[10].mxu1  ;;  %v4242_v59 = vpop.eup %3012  ;;  %3032 = vtanh.f32 %v1407_v52  ;;  %v927_v60 = vadd.f32 %v4201_v5, %v926_v57 }
  0xf0   :  { %v1422_v61 = vadd.f32 %v2862_v58, %v4201_v5  ;;  %v1416_v62 = vpop.f32.mrb[11].mxu1  ;;  %v4246_v63 = vpop.eup %3014  ;;  %3034 = vtanh.f32 %v932_v56 }
  0xf1   :  { %v1417_v0 = vadd.f32 %v4201_v5, %v1416_v62  ;;  %v4249_v1 = vpop.eup %3016  ;;  %3036 = vtanh.f32 %v927_v60  ;;  %v2718_v2 = vpop.f32.mrb[12].mxu0 }
  0xf2   :  { %v4251_v3 = vpop.eup %3018  ;;  %3038 = vtanh.f32 %v1422_v61  ;;  %v942_v4 = vadd.f32 %v2718_v2, %v4201_v5  ;;  %v936_v6 = vpop.f32.mrb[13].mxu0 }
  0xf3   :  { %v2865_v7 = vpop.f32.mrb[12].mxu1  ;;  %v4254_v8 = vpop.eup %3020  ;;  %3040 = vtanh.f32 %v1417_v0  ;;  %v937_v9 = vadd.f32 %v4201_v5, %v936_v6 }
  0xf4   :  { %v1432_v10 = vadd.f32 %v2865_v7, %v4201_v5  ;;  %v1426_v11 = vpop.f32.mrb[13].mxu1  ;;  %v4258_v12 = vpop.eup %3022  ;;  %3042 = vtanh.f32 %v942_v4 }
  0xf5   :  { %v1427_v13 = vadd.f32 %v4201_v5, %v1426_v11  ;;  %v4261_v14 = vpop.eup %3024  ;;  %3044 = vtanh.f32 %v937_v9  ;;  %v2721_v15 = vpop.f32.mrb[14].mxu0 }
  0xf6   :  { %v4263_v16 = vpop.eup %3026  ;;  %3046 = vtanh.f32 %v1432_v10  ;;  %v952_v17 = vadd.f32 %v2721_v15, %v4201_v5  ;;  %v946_v18 = vpop.f32.mrb[15].mxu0 }
  0xf7   :  { %v2868_v19 = vpop.f32.mrb[14].mxu1  ;;  %v4266_v20 = vpop.eup %3028  ;;  %3048 = vtanh.f32 %v1427_v13  ;;  %v947_v21 = vadd.f32 %v4201_v5, %v946_v18 }
  0xf8   :  { %v1442_v22 = vadd.f32 %v2868_v19, %v4201_v5  ;;  %v1436_v23 = vpop.f32.mrb[15].mxu1  ;;  %v4270_v24 = vpop.eup %3030  ;;  %3050 = vtanh.f32 %v952_v17 }
  0xf9   :  { %v1437_v25 = vadd.f32 %v4201_v5, %v1436_v23  ;;  %v4273_v26 = vpop.eup %3032  ;;  %3052 = vtanh.f32 %v947_v21  ;;  %v2724_v27 = vpop.f32.mrb[16].mxu0 }
  0xfa   :  { %v4275_v28 = vpop.eup %3034  ;;  %3054 = vtanh.f32 %v1442_v22  ;;  %v962_v29 = vadd.f32 %v2724_v27, %v4201_v5  ;;  %v956_v30 = vpop.f32.mrb[17].mxu0 }
  0xfb   :  { %v2871_v32 = vpop.f32.mrb[16].mxu1  ;;  %v4278_v33 = vpop.eup %3036  ;;  %3056 = vtanh.f32 %v1437_v25  ;;  %v957_v34 = vadd.f32 %v4201_v5, %v956_v30 }
  0xfc   :  { %v1452_v36 = vadd.f32 %v2871_v32, %v4201_v5  ;;  %v1446_v37 = vpop.f32.mrb[17].mxu1  ;;  %v4282_v38 = vpop.eup %3038  ;;  %3058 = vtanh.f32 %v962_v29 }
  0xfd   :  { %v1447_v40 = vadd.f32 %v4201_v5, %v1446_v37  ;;  %v4285_v42 = vpop.eup %3040  ;;  %3060 = vtanh.f32 %v957_v34  ;;  %v2727_v44 = vpop.f32.mrb[18].mxu0 }
  0xfe   :  { %v4287_v45 = vpop.eup %3042  ;;  %3062 = vtanh.f32 %v1452_v36  ;;  %v972_v46 = vadd.f32 %v2727_v44, %v4201_v5  ;;  %v966_v48 = vpop.f32.mrb[19].mxu0 }
  0xff   :  { %v2874_v49 = vpop.f32.mrb[18].mxu1  ;;  %v4290_v50 = vpop.eup %3044  ;;  %3064 = vtanh.f32 %v1447_v40  ;;  %v967_v52 = vadd.f32 %v4201_v5, %v966_v48 }
 0x100   :  { %v1462_v54 = vadd.f32 %v2874_v49, %v4201_v5  ;;  %v1456_v56 = vpop.f32.mrb[19].mxu1  ;;  %v4294_v57 = vpop.eup %3046  ;;  %3066 = vtanh.f32 %v972_v46 }
 0x101   :  { %v1457_v58 = vadd.f32 %v4201_v5, %v1456_v56  ;;  %v4297_v60 = vpop.eup %3048  ;;  %3068 = vtanh.f32 %v967_v52  ;;  %v2730_v61 = vpop.f32.mrb[20].mxu0 }
 0x102   :  { %v4299_v62 = vpop.eup %3050  ;;  %3070 = vtanh.f32 %v1462_v54  ;;  %v982_v0 = vadd.f32 %v2730_v61, %v4201_v5  ;;  %v976_v2 = vpop.f32.mrb[21].mxu0 }
 0x103   :  { %v2877_v4 = vpop.f32.mrb[20].mxu1  ;;  %v4302_v6 = vpop.eup %3052  ;;  %3072 = vtanh.f32 %v1457_v58  ;;  %v977_v7 = vadd.f32 %v4201_v5, %v976_v2 }
 0x104   :  { %v1472_v9 = vadd.f32 %v2877_v4, %v4201_v5  ;;  %v1466_v10 = vpop.f32.mrb[21].mxu1  ;;  %v4306_v11 = vpop.eup %3054  ;;  %3074 = vtanh.f32 %v982_v0 }
 0x105   :  { %v1467_v13 = vadd.f32 %v4201_v5, %v1466_v10  ;;  %v4309_v15 = vpop.eup %3056  ;;  %3076 = vtanh.f32 %v977_v7  ;;  %v2733_v17 = vpop.f32.mrb[22].mxu0 }
 0x106   :  { %v4311_v18 = vpop.eup %3058  ;;  %3078 = vtanh.f32 %v1472_v9  ;;  %v992_v19 = vadd.f32 %v2733_v17, %v4201_v5  ;;  %v986_v21 = vpop.f32.mrb[23].mxu0 }
 0x107   :  { %v2880_v22 = vpop.f32.mrb[22].mxu1  ;;  %v4314_v23 = vpop.eup %3060  ;;  %3080 = vtanh.f32 %v1467_v13  ;;  %v987_v25 = vadd.f32 %v4201_v5, %v986_v21 }
 0x108   :  { %v1482_v27 = vadd.f32 %v2880_v22, %v4201_v5  ;;  %v1476_v29 = vpop.f32.mrb[23].mxu1  ;;  %v4318_v30 = vpop.eup %3062  ;;  %3082 = vtanh.f32 %v992_v19 }
 0x109   :  { %v1477_v32 = vadd.f32 %v4201_v5, %v1476_v29  ;;  %v4321_v34 = vpop.eup %3064  ;;  %3084 = vtanh.f32 %v987_v25  ;;  %v2736_v36 = vpop.f32.mrb[24].mxu0 }
 0x10a   :  { %v4323_v37 = vpop.eup %3066  ;;  %3086 = vtanh.f32 %v1482_v27  ;;  %v1002_v40 = vadd.f32 %v2736_v36, %v4201_v5  ;;  %v996_v44 = vpop.f32.mrb[25].mxu0 }
 0x10b   :  { %v2883_v46 = vpop.f32.mrb[24].mxu1  ;;  %v4326_v48 = vpop.eup %3068  ;;  %3088 = vtanh.f32 %v1477_v32  ;;  %v997_v49 = vadd.f32 %v4201_v5, %v996_v44 }
 0x10c   :  { %v1492_v52 = vadd.f32 %v2883_v46, %v4201_v5  ;;  %v1486_v54 = vpop.f32.mrb[25].mxu1  ;;  %v4330_v56 = vpop.eup %3070  ;;  %3090 = vtanh.f32 %v1002_v40 }
 0x10d   :  { %v1487_v58 = vadd.f32 %v4201_v5, %v1486_v54  ;;  %v4333_v61 = vpop.eup %3072  ;;  %3092 = vtanh.f32 %v997_v49  ;;  %v2739_v0 = vpop.f32.mrb[26].mxu0 }
 0x10e   :  { %v4335_v2 = vpop.eup %3074  ;;  %3094 = vtanh.f32 %v1492_v52  ;;  %v1012_v4 = vadd.f32 %v2739_v0, %v4201_v5  ;;  %v1006_v7 = vpop.f32.mrb[27].mxu0 }
 0x10f   :  { %v2886_v9 = vpop.f32.mrb[26].mxu1  ;;  %v4338_v10 = vpop.eup %3076  ;;  %3096 = vtanh.f32 %v1487_v58  ;;  %v1007_v13 = vadd.f32 %v4201_v5, %v1006_v7 }
 0x110   :  { %v1502_v17 = vadd.f32 %v2886_v9, %v4201_v5  ;;  %v1496_v19 = vpop.f32.mrb[27].mxu1  ;;  %v4342_v21 = vpop.eup %3078  ;;  %3098 = vtanh.f32 %v1012_v4 }
 0x111   :  { %v1497_v22 = vadd.f32 %v4201_v5, %v1496_v19  ;;  %v4345_v25 = vpop.eup %3080  ;;  %3100 = vtanh.f32 %v1007_v13  ;;  %v2742_v27 = vpop.f32.mrb[28].mxu0 }
 0x112   :  { %v4347_v29 = vpop.eup %3082  ;;  %3102 = vtanh.f32 %v1502_v17  ;;  %v1022_v32 = vadd.f32 %v2742_v27, %v4201_v5  ;;  %v1016_v36 = vpop.f32.mrb[29].mxu0 }
 0x113   :  { %4898 = vst [vmem:[#allocation2_spill] sm:$0xff] %v4347_v29  ;;  %v2889_v40 = vpop.f32.mrb[28].mxu1  ;;  %v4350_v44 = vpop.eup %3084  ;;  %3104 = vtanh.f32 %v1497_v22  ;;  %v1017_v46 = vadd.f32 %v4201_v5, %v1016_v36 }
 0x114   :  { %v1512_v49 = vadd.f32 %v2889_v40, %v4201_v5  ;;  %v1506_v52 = vpop.f32.mrb[29].mxu1  ;;  %v4354_v54 = vpop.eup %3086  ;;  %3106 = vtanh.f32 %v1022_v32 }
 0x115   :  { %4899 = vst [vmem:[#allocation3_spill] sm:$0xff] %v4354_v54  ;;  %v1507_v58 = vadd.f32 %v4201_v5, %v1506_v52  ;;  %v4357_v0 = vpop.eup %3088  ;;  %3108 = vtanh.f32 %v1017_v46  ;;  %v2745_v4 = vpop.f32.mrb[30].mxu0 }
 0x116   :  { %v4359_v7 = vpop.eup %3090  ;;  %3110 = vtanh.f32 %v1512_v49  ;;  %v1032_v9 = vadd.f32 %v2745_v4, %v4201_v5  ;;  %v1026_v13 = vpop.f32.mrb[31].mxu0 }
 0x117   :  { %4900 = vst [vmem:[#allocation4_spill] sm:$0xff] %v4359_v7  ;;  %v2892_v17 = vpop.f32.mrb[30].mxu1  ;;  %v4362_v19 = vpop.eup %3092  ;;  %3112 = vtanh.f32 %v1507_v58  ;;  %v1027_v22 = vadd.f32 %v4201_v5, %v1026_v13 }
 0x118   :  { %4901 = vst [vmem:[#allocation5_spill] sm:$0xff] %v4362_v19  ;;  %v1522_v27 = vadd.f32 %v2892_v17, %v4201_v5  ;;  %v1516_v32 = vpop.f32.mrb[31].mxu1  ;;  %v4366_v36 = vpop.eup %3094  ;;  %3114 = vtanh.f32 %v1032_v9 }
 0x119   :  { %4902 = vst [vmem:[#allocation6_spill] sm:$0xff] %v4366_v36  ;;  %v1517_v40 = vadd.f32 %v4201_v5, %v1516_v32  ;;  %v4369_v46 = vpop.eup %3096  ;;  %3116 = vtanh.f32 %v1027_v22  ;;  %v2748_v49 = vpop.f32.mrb[32].mxu0 }
 0x11a   :  { %4903 = vst [vmem:[#allocation7_spill] sm:$0xff] %v4369_v46  ;;  %v4371_v52 = vpop.eup %3098  ;;  %3118 = vtanh.f32 %v1522_v27  ;;  %v1042_v4 = vadd.f32 %v2748_v49, %v4201_v5  ;;  %v1036_v58 = vpop.f32.mrb[33].mxu0 }
 0x11b   :  { %4904 = vst [vmem:[#allocation8_spill] sm:$0xff] %v4371_v52  ;;  %v2895_v7 = vpop.f32.mrb[32].mxu1  ;;  %v4374_v13 = vpop.eup %3100  ;;  %3120 = vtanh.f32 %v1517_v40  ;;  %v1037_v17 = vadd.f32 %v4201_v5, %v1036_v58 }
 0x11c   :  { %4905 = vst [vmem:[#allocation9_spill] sm:$0xff] %v4374_v13  ;;  %v1532_v9 = vadd.f32 %v2895_v7, %v4201_v5  ;;  %v1526_v36 = vpop.f32.mrb[33].mxu1  ;;  %v4378_v32 = vpop.eup %3102  ;;  %3122 = vtanh.f32 %v1042_v4 }
 0x11d   :  { %4906 = vst [vmem:[#allocation10_spill] sm:$0xff] %v4378_v32  ;;  %v1527_v22 = vadd.f32 %v4201_v5, %v1526_v36  ;;  %v4381_v54 = vpop.eup %3104  ;;  %3124 = vtanh.f32 %v1037_v17  ;;  %v2751_v27 = vpop.f32.mrb[34].mxu0 }
 0x11e   :  { %4907 = vst [vmem:[#allocation11_spill] sm:$0xff] %v4381_v54  ;;  %v4383_v49 = vpop.eup %3106  ;;  %3126 = vtanh.f32 %v1532_v9  ;;  %v1052_v52 = vadd.f32 %v2751_v27, %v4201_v5  ;;  %v1046_v40 = vpop.f32.mrb[35].mxu0 }
 0x11f   :  { %4908 = vst [vmem:[#allocation12_spill] sm:$0xff] %v4383_v49  ;;  %v2898_v13 = vpop.f32.mrb[34].mxu1  ;;  %v4386_v58 = vpop.eup %3108  ;;  %3128 = vtanh.f32 %v1527_v22  ;;  %v1047_v7 = vadd.f32 %v4201_v5, %v1046_v40 }
 0x120   :  { %4909 = vst [vmem:[#allocation13_spill] sm:$0xff] %v4386_v58  ;;  %v1542_v4 = vadd.f32 %v2898_v13, %v4201_v5  ;;  %v1536_v32 = vpop.f32.mrb[35].mxu1  ;;  %v4390_v36 = vpop.eup %3110  ;;  %3130 = vtanh.f32 %v1052_v52 }
 0x121   :  { %4910 = vst [vmem:[#allocation14_spill] sm:$0xff] %v4390_v36  ;;  %v1537_v17 = vadd.f32 %v4201_v5, %v1536_v32  ;;  %v4393_v54 = vpop.eup %3112  ;;  %3132 = vtanh.f32 %v1047_v7  ;;  %v2754_v9 = vpop.f32.mrb[36].mxu0 }
 0x122   :  { %4911 = vst [vmem:[#allocation15_spill] sm:$0xff] %v4393_v54  ;;  %v4395_v27 = vpop.eup %3114  ;;  %3134 = vtanh.f32 %v1542_v4  ;;  %v1062_v49 = vadd.f32 %v2754_v9, %v4201_v5  ;;  %v1056_v22 = vpop.f32.mrb[37].mxu0 }
 0x123   :  { %4912 = vst [vmem:[#allocation16_spill] sm:$0xff] %v4395_v27  ;;  %v2901_v58 = vpop.f32.mrb[36].mxu1  ;;  %v4398_v40 = vpop.eup %3116  ;;  %3136 = vtanh.f32 %v1537_v17  ;;  %v1057_v13 = vadd.f32 %v4201_v5, %v1056_v22 }
 0x124   :  { %4913 = vst [vmem:[#allocation17_spill] sm:$0xff] %v4398_v40  ;;  %v1552_v52 = vadd.f32 %v2901_v58, %v4201_v5  ;;  %v1546_v36 = vpop.f32.mrb[37].mxu1  ;;  %v4402_v32 = vpop.eup %3118  ;;  %3138 = vtanh.f32 %v1062_v49 }
 0x125   :  { %4914 = vst [vmem:[#allocation18_spill] sm:$0xff] %v4402_v32  ;;  %v1547_v7 = vadd.f32 %v4201_v5, %v1546_v36  ;;  %v4405_v54 = vpop.eup %3120  ;;  %3140 = vtanh.f32 %v1057_v13  ;;  %v2757_v4 = vpop.f32.mrb[38].mxu0 }
 0x126   :  { %4915 = vst [vmem:[#allocation19_spill] sm:$0xff] %v4405_v54  ;;  %v4407_v9 = vpop.eup %3122  ;;  %3142 = vtanh.f32 %v1552_v52  ;;  %v1072_v27 = vadd.f32 %v2757_v4, %v4201_v5  ;;  %v1066_v17 = vpop.f32.mrb[39].mxu0 }
 0x127   :  { %4916 = vst [vmem:[#allocation20_spill] sm:$0xff] %v4407_v9  ;;  %v2904_v40 = vpop.f32.mrb[38].mxu1  ;;  %v4410_v22 = vpop.eup %3124  ;;  %3144 = vtanh.f32 %v1547_v7  ;;  %v1067_v58 = vadd.f32 %v4201_v5, %v1066_v17 }
 0x128   :  { %4917 = vst [vmem:[#allocation21_spill] sm:$0xff] %v4410_v22  ;;  %v1562_v49 = vadd.f32 %v2904_v40, %v4201_v5  ;;  %v1556_v32 = vpop.f32.mrb[39].mxu1  ;;  %v4414_v36 = vpop.eup %3126  ;;  %3146 = vtanh.f32 %v1072_v27 }
 0x129   :  { %4918 = vst [vmem:[#allocation22_spill] sm:$0xff] %v4414_v36  ;;  %v1557_v13 = vadd.f32 %v4201_v5, %v1556_v32  ;;  %v4417_v54 = vpop.eup %3128  ;;  %3148 = vtanh.f32 %v1067_v58  ;;  %v2760_v52 = vpop.f32.mrb[40].mxu0 }
 0x12a   :  { %4919 = vst [vmem:[#allocation23_spill] sm:$0xff] %v4417_v54  ;;  %v4419_v4 = vpop.eup %3130  ;;  %3150 = vtanh.f32 %v1562_v49  ;;  %v1082_v9 = vadd.f32 %v2760_v52, %v4201_v5  ;;  %v1076_v7 = vpop.f32.mrb[41].mxu0 }
 0x12b   :  { %4920 = vst [vmem:[#allocation24_spill] sm:$0xff] %v4419_v4  ;;  %v2907_v22 = vpop.f32.mrb[40].mxu1  ;;  %v4422_v17 = vpop.eup %3132  ;;  %3152 = vtanh.f32 %v1557_v13  ;;  %v1077_v40 = vadd.f32 %v4201_v5, %v1076_v7 }
 0x12c   :  { %4921 = vst [vmem:[#allocation25_spill] sm:$0xff] %v4422_v17  ;;  %v1572_v27 = vadd.f32 %v2907_v22, %v4201_v5  ;;  %v1566_v36 = vpop.f32.mrb[41].mxu1  ;;  %v4426_v32 = vpop.eup %3134  ;;  %3154 = vtanh.f32 %v1082_v9 }
 0x12d   :  { %4922 = vst [vmem:[#allocation26_spill] sm:$0xff] %v4426_v32  ;;  %v1567_v58 = vadd.f32 %v4201_v5, %v1566_v36  ;;  %v4429_v54 = vpop.eup %3136  ;;  %3156 = vtanh.f32 %v1077_v40  ;;  %v2763_v49 = vpop.f32.mrb[42].mxu0 }
 0x12e   :  { %4923 = vst [vmem:[#allocation27_spill] sm:$0xff] %v4429_v54  ;;  %v4431_v52 = vpop.eup %3138  ;;  %3158 = vtanh.f32 %v1572_v27  ;;  %v1092_v4 = vadd.f32 %v2763_v49, %v4201_v5  ;;  %v1086_v13 = vpop.f32.mrb[43].mxu0 }
 0x12f   :  { %4924 = vst [vmem:[#allocation28_spill] sm:$0xff] %v4431_v52  ;;  %v2910_v17 = vpop.f32.mrb[42].mxu1  ;;  %v4434_v7 = vpop.eup %3140  ;;  %3160 = vtanh.f32 %v1567_v58  ;;  %v1087_v22 = vadd.f32 %v4201_v5, %v1086_v13 }
 0x130   :  { %4925 = vst [vmem:[#allocation29_spill] sm:$0xff] %v4434_v7  ;;  %v1582_v9 = vadd.f32 %v2910_v17, %v4201_v5  ;;  %v1576_v32 = vpop.f32.mrb[43].mxu1  ;;  %v4438_v36 = vpop.eup %3142  ;;  %3162 = vtanh.f32 %v1092_v4 }
 0x131   :  { %4926 = vst [vmem:[#allocation30_spill] sm:$0xff] %v4438_v36  ;;  %v1577_v40 = vadd.f32 %v4201_v5, %v1576_v32  ;;  %v4441_v54 = vpop.eup %3144  ;;  %3164 = vtanh.f32 %v1087_v22  ;;  %v2766_v27 = vpop.f32.mrb[44].mxu0 }
 0x132   :  { %4927 = vst [vmem:[#allocation31_spill] sm:$0xff] %v4441_v54  ;;  %v4443_v49 = vpop.eup %3146  ;;  %3166 = vtanh.f32 %v1582_v9  ;;  %v1102_v52 = vadd.f32 %v2766_v27, %v4201_v5  ;;  %v1096_v58 = vpop.f32.mrb[45].mxu0 }
 0x133   :  { %4928 = vst [vmem:[#allocation32_spill] sm:$0xff] %v4443_v49  ;;  %v2913_v7 = vpop.f32.mrb[44].mxu1  ;;  %v4446_v13 = vpop.eup %3148  ;;  %3168 = vtanh.f32 %v1577_v40  ;;  %v1097_v17 = vadd.f32 %v4201_v5, %v1096_v58 }
 0x134   :  { %4929 = vst [vmem:[#allocation33_spill] sm:$0xff] %v4446_v13  ;;  %v1592_v4 = vadd.f32 %v2913_v7, %v4201_v5  ;;  %v1586_v36 = vpop.f32.mrb[45].mxu1  ;;  %v4450_v32 = vpop.eup %3150  ;;  %3170 = vtanh.f32 %v1102_v52 }
 0x135   :  { %4930 = vst [vmem:[#allocation34_spill] sm:$0xff] %v4450_v32  ;;  %v1587_v22 = vadd.f32 %v4201_v5, %v1586_v36  ;;  %v4453_v54 = vpop.eup %3152  ;;  %3172 = vtanh.f32 %v1097_v17  ;;  %v2769_v9 = vpop.f32.mrb[46].mxu0 }
 0x136   :  { %4931 = vst [vmem:[#allocation35_spill] sm:$0xff] %v4453_v54  ;;  %v4455_v27 = vpop.eup %3154  ;;  %3174 = vtanh.f32 %v1592_v4  ;;  %v1112_v49 = vadd.f32 %v2769_v9, %v4201_v5  ;;  %v1106_v40 = vpop.f32.mrb[47].mxu0 }
 0x137   :  { %4932 = vst [vmem:[#allocation36_spill] sm:$0xff] %v4455_v27  ;;  %v2916_v13 = vpop.f32.mrb[46].mxu1  ;;  %v4458_v58 = vpop.eup %3156  ;;  %3176 = vtanh.f32 %v1587_v22  ;;  %v1107_v7 = vadd.f32 %v4201_v5, %v1106_v40 }
 0x138   :  { %4933 = vst [vmem:[#allocation37_spill] sm:$0xff] %v4458_v58  ;;  %v1602_v52 = vadd.f32 %v2916_v13, %v4201_v5  ;;  %v1596_v32 = vpop.f32.mrb[47].mxu1  ;;  %v4462_v36 = vpop.eup %3158  ;;  %3178 = vtanh.f32 %v1112_v49 }
 0x139   :  { %4934 = vst [vmem:[#allocation38_spill] sm:$0xff] %v4462_v36  ;;  %v1597_v17 = vadd.f32 %v4201_v5, %v1596_v32  ;;  %v4465_v54 = vpop.eup %3160  ;;  %3180 = vtanh.f32 %v1107_v7  ;;  %v2772_v4 = vpop.f32.mrb[48].mxu0 }
 0x13a   :  { %4935 = vst [vmem:[#allocation39_spill] sm:$0xff] %v4465_v54  ;;  %v4467_v9 = vpop.eup %3162  ;;  %3182 = vtanh.f32 %v1602_v52  ;;  %v1122_v27 = vadd.f32 %v2772_v4, %v4201_v5  ;;  %v1116_v22 = vpop.f32.mrb[49].mxu0 }
 0x13b   :  { %4936 = vst [vmem:[#allocation40_spill] sm:$0xff] %v4467_v9  ;;  %v2919_v58 = vpop.f32.mrb[48].mxu1  ;;  %v4470_v40 = vpop.eup %3164  ;;  %3184 = vtanh.f32 %v1597_v17  ;;  %v1117_v13 = vadd.f32 %v4201_v5, %v1116_v22 }
 0x13c   :  { %4937 = vst [vmem:[#allocation41_spill] sm:$0xff] %v4470_v40  ;;  %v1612_v49 = vadd.f32 %v2919_v58, %v4201_v5  ;;  %v1606_v36 = vpop.f32.mrb[49].mxu1  ;;  %v4474_v32 = vpop.eup %3166  ;;  %3186 = vtanh.f32 %v1122_v27 }
 0x13d   :  { %4938 = vst [vmem:[#allocation42_spill] sm:$0xff] %v4474_v32  ;;  %v1607_v7 = vadd.f32 %v4201_v5, %v1606_v36  ;;  %v4477_v54 = vpop.eup %3168  ;;  %3188 = vtanh.f32 %v1117_v13  ;;  %v2775_v52 = vpop.f32.mrb[50].mxu0 }
 0x13e   :  { %4939 = vst [vmem:[#allocation43_spill] sm:$0xff] %v4477_v54  ;;  %v4479_v4 = vpop.eup %3170  ;;  %3190 = vtanh.f32 %v1612_v49  ;;  %v1132_v9 = vadd.f32 %v2775_v52, %v4201_v5  ;;  %v1126_v17 = vpop.f32.mrb[51].mxu0 }
 0x13f   :  { %4940 = vst [vmem:[#allocation44_spill] sm:$0xff] %v4479_v4  ;;  %v2922_v40 = vpop.f32.mrb[50].mxu1  ;;  %v4482_v22 = vpop.eup %3172  ;;  %3192 = vtanh.f32 %v1607_v7  ;;  %v1127_v58 = vadd.f32 %v4201_v5, %v1126_v17 }
 0x140   :  { %4941 = vst [vmem:[#allocation45_spill] sm:$0xff] %v4482_v22  ;;  %v1622_v27 = vadd.f32 %v2922_v40, %v4201_v5  ;;  %v1616_v32 = vpop.f32.mrb[51].mxu1  ;;  %v4486_v36 = vpop.eup %3174  ;;  %3194 = vtanh.f32 %v1132_v9 }
 0x141   :  { %4942 = vst [vmem:[#allocation46_spill] sm:$0xff] %v4486_v36  ;;  %v1617_v13 = vadd.f32 %v4201_v5, %v1616_v32  ;;  %v4489_v54 = vpop.eup %3176  ;;  %3196 = vtanh.f32 %v1127_v58  ;;  %v2778_v49 = vpop.f32.mrb[52].mxu0 }
 0x142   :  { %4943 = vst [vmem:[#allocation47_spill] sm:$0xff] %v4489_v54  ;;  %v4491_v52 = vpop.eup %3178  ;;  %3198 = vtanh.f32 %v1622_v27  ;;  %v1142_v4 = vadd.f32 %v2778_v49, %v4201_v5  ;;  %v1136_v7 = vpop.f32.mrb[53].mxu0 }
 0x143   :  { %4944 = vst [vmem:[#allocation48_spill] sm:$0xff] %v4491_v52  ;;  %v2925_v22 = vpop.f32.mrb[52].mxu1  ;;  %v4494_v17 = vpop.eup %3180  ;;  %3200 = vtanh.f32 %v1617_v13  ;;  %v1137_v40 = vadd.f32 %v4201_v5, %v1136_v7 }
 0x144   :  { %4945 = vst [vmem:[#allocation49_spill] sm:$0xff] %v4494_v17  ;;  %v1632_v9 = vadd.f32 %v2925_v22, %v4201_v5  ;;  %v1626_v36 = vpop.f32.mrb[53].mxu1  ;;  %v4498_v32 = vpop.eup %3182  ;;  %3202 = vtanh.f32 %v1142_v4 }
 0x145   :  { %4946 = vst [vmem:[#allocation50_spill] sm:$0xff] %v4498_v32  ;;  %v1627_v58 = vadd.f32 %v4201_v5, %v1626_v36  ;;  %v4501_v54 = vpop.eup %3184  ;;  %3204 = vtanh.f32 %v1137_v40  ;;  %v2781_v27 = vpop.f32.mrb[54].mxu0 }
 0x146   :  { %4947 = vst [vmem:[#allocation51_spill] sm:$0xff] %v4501_v54  ;;  %v3187_v49 = vpop.eup %3186  ;;  %3206 = vtanh.f32 %v1632_v9  ;;  %v1152_v52 = vadd.f32 %v2781_v27, %v4201_v5  ;;  %v1146_v17 = vpop.f32.mrb[55].mxu0 }
 0x147   :  { %v2928_v13 = vpop.f32.mrb[54].mxu1  ;;  %v4504_v46 = vpop.eup %3188  ;;  %v2051_v22 = vadd.f32 %v3187_v49, %v4218_v35  ;;  %3208 = vtanh.f32 %v1627_v58  ;;  %v1147_v7 = vadd.f32 %v4201_v5, %v1146_v17 }
 0x148   :  { %4948 = vst [vmem:[#allocation52_spill] sm:$0xff] %v4504_v46  ;;  %v1642_v4 = vadd.f32 %v2928_v13, %v4201_v5  ;;  %v1636_v36 = vpop.f32.mrb[55].mxu1  ;;  %v3191_v32 = vpop.eup %3190  ;;  %3210 = vtanh.f32 %v1152_v52 }
 0x149   :  { %v1637_v40 = vadd.f32 %v4201_v5, %v1636_v36  ;;  %v4510_v54 = vpop.eup %3192  ;;  %v2100_v9 = vadd.f32 %v4225_v41, %v2051_v22  ;;  %3212 = vtanh.f32 %v1147_v7  ;;  %v2784_v27 = vpop.f32.mrb[56].mxu0 }
 0x14a   :  { %4949 = vst [vmem:[#allocation53_spill] sm:$0xff] %v4510_v54  ;;  %v3195_v29 = vpop.eup %3194  ;;  %3214 = vtanh.f32 %v1642_v4  ;;  %v1162_v35 = vadd.f32 %v2784_v27, %v4201_v5  ;;  %v1156_v58 = vpop.f32.mrb[57].mxu0 }
 0x14b   :  { %v2931_v17 = vpop.f32.mrb[56].mxu1  ;;  %v3197_v49 = vpop.eup %3196  ;;  %v2149_v13 = vadd.f32 %v3191_v32, %v2100_v9  ;;  %v2053_v46 = vadd.f32 %v3195_v29, %v4230_v47  ;;  %3216 = vtanh.f32 %v1637_v40  ;;  %v1157_v52 = vadd.f32 %v4201_v5, %v1156_v58 }
 0x14c   :  { %v1646_v36 = vpop.f32.mrb[57].mxu1  ;;  %v3199_v54 = vpop.eup %3198  ;;  %v2052_v41 = vadd.f32 %v3197_v49, %v4215_v31  ;;  %3218 = vtanh.f32 %v1162_v35  ;;  %v1652_v22 = vadd.f32 %v2931_v17, %v4201_v5 }
 0x14d   :  { %v1647_v7 = vadd.f32 %v4201_v5, %v1646_v36  ;;  %v3201_v4 = vpop.eup %3200  ;;  %v2198_v27 = vmul.f32 0.25, %v2149_v13  ;;  %v2102_v19 = vadd.f32 %v4237_v53, %v2053_v46  ;;  %3220 = vtanh.f32 %v1157_v52  ;;  %v2787_v32 = vpop.f32.mrb[58].mxu0 }
 0x14e   :  { %v3203_v9 = vpop.eup %3202  ;;  %v2101_v47 = vadd.f32 %v4222_v39, %v2052_v41  ;;  %3222 = vtanh.f32 %v1652_v22  ;;  %v1172_v29 = vadd.f32 %v2787_v32, %v4201_v5  ;;  %v1166_v40 = vpop.f32.mrb[59].mxu0 }
 0x14f   :  { %v2934_v58 = vpop.f32.mrb[58].mxu1  ;;  %v3205_v31 = vpop.eup %3204  ;;  %2248 = vst.msk [vmem:[%s4897_s3] sm:$0xff] %vm2247_vm1, %v2198_v27  ;;  %v2151_v35 = vadd.f32 %v3199_v54, %v2102_v19  ;;  %v2055_v17 = vadd.f32 %v3203_v9, %v4242_v59  ;;  %3224 = vtanh.f32 %v1647_v7  ;;  %v1167_v53 = vadd.f32 %v4201_v5, %v1166_v40 }
 0x150   :  { %v1656_v46 = vpop.f32.mrb[59].mxu1  ;;  %v3207_v49 = vpop.eup %3206  ;;  %v2150_v39 = vadd.f32 %v3201_v4, %v2101_v47  ;;  %v2054_v13 = vadd.f32 %v3205_v31, %v4227_v43  ;;  %3226 = vtanh.f32 %v1172_v29  ;;  %v1662_v52 = vadd.f32 %v2934_v58, %v4201_v5 }
 0x151   :  { %v3209_v36 = vpop.eup %3208  ;;  %v2200_v41 = vmul.f32 0.25, %v2151_v35  ;;  %v2104_v22 = vadd.f32 %v4249_v1, %v2055_v17  ;;  %3228 = vtanh.f32 %v1167_v53  ;;  %v2790_v27 = vpop.f32.mrb[60].mxu0  ;;  %v1657_v54 = vadd.f32 %v4201_v5, %v1656_v46 }
 0x152   :  { %v3211_v59 = vpop.eup %3210  ;;  %v2199_v19 = vmul.f32 0.25, %v2150_v39  ;;  %v2103_v7 = vadd.f32 %v4234_v51, %v2054_v13  ;;  %3230 = vtanh.f32 %v1662_v52  ;;  %v1182_v4 = vadd.f32 %v2790_v27, %v4201_v5  ;;  %v1176_v32 = vpop.f32.mrb[61].mxu0 }
 0x153   :  { %v2937_v43 = vpop.f32.mrb[60].mxu1  ;;  %v3213_v9 = vpop.eup %3212  ;;  %2250 = vst.msk [vmem:[%s4897_s3 + $0x10] sm:$0xff] %vm2247_vm1, %v2200_v41  ;;  %v2153_v1 = vadd.f32 %v3207_v49, %v2104_v22  ;;  %v2057_v47 = vadd.f32 %v3211_v59, %v4254_v8  ;;  %3232 = vtanh.f32 %v1657_v54  ;;  %v1177_v29 = vadd.f32 %v4201_v5, %v1176_v32 }
 0x154   :  { %v1666_v40 = vpop.f32.mrb[61].mxu1  ;;  %v3215_v58 = vpop.eup %3214  ;;  %2249 = vst.msk [vmem:[%s4897_s3 + $0x8] sm:$0xff] %vm2247_vm1, %v2199_v19  ;;  %v2152_v51 = vadd.f32 %v3209_v36, %v2103_v7  ;;  %v2056_v31 = vadd.f32 %v3213_v9, %v4239_v55  ;;  %3234 = vtanh.f32 %v1182_v4  ;;  %v1672_v35 = vadd.f32 %v2937_v43, %v4201_v5  ;;  %v4552_v55 = vld [vmem:[%s4896_s2] ss:$0 sm:$0xff] }
 0x155   :  { %v3217_v17 = vpop.eup %3216  ;;  %v2202_v53 = vmul.f32 0.25, %v2153_v1  ;;  %v2106_v8 = vadd.f32 %v4261_v14, %v2057_v47  ;;  %3236 = vtanh.f32 %v1177_v29  ;;  %v2793_v46 = vpop.f32.mrb[62].mxu0  ;;  %v1667_v49 = vadd.f32 %v4201_v5, %v1666_v40 }
 0x156   :  { %v3219_v39 = vpop.eup %3218  ;;  %v2201_v13 = vmul.f32 0.25, %v2152_v51  ;;  %v2105_v52 = vadd.f32 %v4246_v63, %v2056_v31  ;;  %3238 = vtanh.f32 %v1672_v35  ;;  %v1192_v36 = vadd.f32 %v4552_v55, %v2793_v46  ;;  %v1186_v41 = vpop.f32.mrb[63].mxu0 }
 0x157   :  { %v2940_v22 = vpop.f32.mrb[62].mxu1  ;;  %v3221_v27 = vpop.eup %3220  ;;  %2252 = vst.msk [vmem:[%s4897_s3 + $0x20] sm:$0xff] %vm2247_vm1, %v2202_v53  ;;  %v2155_v5 = vadd.f32 %v3215_v58, %v2106_v8  ;;  %v2059_v14 = vadd.f32 %v3219_v39, %v4266_v20  ;;  %3240 = vtanh.f32 %v1667_v49  ;;  %v1187_v63 = vadd.f32 %v4552_v55, %v1186_v41 }
 0x158   :  { %v1676_v54 = vpop.f32.mrb[63].mxu1  ;;  %v3223_v59 = vpop.eup %3222  ;;  %2251 = vst.msk [vmem:[%s4897_s3 + $0x18] sm:$0xff] %vm2247_vm1, %v2201_v13  ;;  %v2154_v19 = vadd.f32 %v3217_v17, %v2105_v52  ;;  %v2058_v7 = vadd.f32 %v3221_v27, %v4251_v3  ;;  %3242 = vtanh.f32 %v1192_v36  ;;  %v1682_v4 = vadd.f32 %v4552_v55, %v2940_v22 }
 0x159   :  { %v3225_v32 = vpop.eup %3224  ;;  %v2204_v43 = vmul.f32 0.25, %v2155_v5  ;;  %v2108_v20 = vadd.f32 %v4273_v26, %v2059_v14  ;;  %3244 = vtanh.f32 %v1187_v63  ;;  %v2796_v9 = vpop.f32.mrb[64].mxu0  ;;  %v1677_v1 = vadd.f32 %v4552_v55, %v1676_v54 }
 0x15a   :  { %v3227_v47 = vpop.eup %3226  ;;  %v2203_v29 = vmul.f32 0.25, %v2154_v19  ;;  %v2107_v40 = vadd.f32 %v4258_v12, %v2058_v7  ;;  %3246 = vtanh.f32 %v1682_v4  ;;  %v1202_v58 = vadd.f32 %v4552_v55, %v2796_v9  ;;  %v1196_v51 = vpop.f32.mrb[65].mxu0 }
 0x15b   :  { %v2943_v3 = vpop.f32.mrb[64].mxu1  ;;  %v3229_v31 = vpop.eup %3228  ;;  %2254 = vst.msk [vmem:[%s4897_s3 + $0x30] sm:$0xff] %vm2247_vm1, %v2204_v43  ;;  %v2157_v26 = vadd.f32 %v3223_v59, %v2108_v20  ;;  %v2061_v35 = vadd.f32 %v3227_v47, %v4278_v33  ;;  %3248 = vtanh.f32 %v1677_v1  ;;  %v1197_v17 = vadd.f32 %v4552_v55, %v1196_v51 }
 0x15c   :  { %v1686_v53 = vpop.f32.mrb[65].mxu1  ;;  %v3231_v8 = vpop.eup %3230  ;;  %2253 = vst.msk [vmem:[%s4897_s3 + $0x28] sm:$0xff] %vm2247_vm1, %v2203_v29  ;;  %v2156_v12 = vadd.f32 %v3225_v32, %v2107_v40  ;;  %v2060_v46 = vadd.f32 %v3229_v31, %v4263_v16  ;;  %3250 = vtanh.f32 %v1202_v58  ;;  %v1692_v49 = vadd.f32 %v4552_v55, %v2943_v3 }
 0x15d   :  { %v3233_v39 = vpop.eup %3232  ;;  %v2206_v13 = vmul.f32 0.25, %v2157_v26  ;;  %v2110_v33 = vadd.f32 %v4285_v42, %v2061_v35  ;;  %3252 = vtanh.f32 %v1197_v17  ;;  %v2799_v52 = vpop.f32.mrb[66].mxu0  ;;  %v1687_v36 = vadd.f32 %v4552_v55, %v1686_v53 }
 0x15e   :  { %v3235_v41 = vpop.eup %3234  ;;  %v2205_v22 = vmul.f32 0.25, %v2156_v12  ;;  %v2109_v27 = vadd.f32 %v4270_v24, %v2060_v46  ;;  %3254 = vtanh.f32 %v1692_v49  ;;  %v1212_v5 = vadd.f32 %v4552_v55, %v2799_v52  ;;  %v1206_v14 = vpop.f32.mrb[67].mxu0 }
 0x15f   :  { %v2946_v16 = vpop.f32.mrb[66].mxu1  ;;  %v3237_v63 = vpop.eup %3236  ;;  %2256 = vst.msk [vmem:[%s4897_s3 + $0x40] sm:$0xff] %vm2247_vm1, %v2206_v13  ;;  %v2159_v42 = vadd.f32 %v3231_v8, %v2110_v33  ;;  %v2063_v54 = vadd.f32 %v3235_v41, %v4290_v50  ;;  %3256 = vtanh.f32 %v1687_v36  ;;  %v1207_v59 = vadd.f32 %v4552_v55, %v1206_v14 }
 0x160   :  { %v1696_v19 = vpop.f32.mrb[67].mxu1  ;;  %v3239_v7 = vpop.eup %3238  ;;  %2255 = vst.msk [vmem:[%s4897_s3 + $0x38] sm:$0xff] %vm2247_vm1, %v2205_v22  ;;  %v2158_v24 = vadd.f32 %v3233_v39, %v2109_v27  ;;  %v2062_v4 = vadd.f32 %v3237_v63, %v4275_v28  ;;  %3258 = vtanh.f32 %v1212_v5  ;;  %v1702_v32 = vadd.f32 %v4552_v55, %v2946_v16 }
 0x161   :  { %v3241_v43 = vpop.eup %3240  ;;  %v2208_v20 = vmul.f32 0.25, %v2159_v42  ;;  %v2112_v50 = vadd.f32 %v4297_v60, %v2063_v54  ;;  %3260 = vtanh.f32 %v1207_v59  ;;  %v2802_v9 = vpop.f32.mrb[68].mxu0  ;;  %v1697_v1 = vadd.f32 %v4552_v55, %v1696_v19 }
 0x162   :  { %v3243_v47 = vpop.eup %3242  ;;  %v2207_v29 = vmul.f32 0.25, %v2158_v24  ;;  %v2111_v40 = vadd.f32 %v4282_v38, %v2062_v4  ;;  %3262 = vtanh.f32 %v1702_v32  ;;  %v1222_v58 = vadd.f32 %v4552_v55, %v2802_v9  ;;  %v1216_v51 = vpop.f32.mrb[69].mxu0 }
 0x163   :  { %v2949_v28 = vpop.f32.mrb[68].mxu1  ;;  %v3245_v3 = vpop.eup %3244  ;;  %2258 = vst.msk [vmem:[%s4897_s3 + $0x50] sm:$0xff] %vm2247_vm1, %v2208_v20  ;;  %v2161_v60 = vadd.f32 %v3239_v7, %v2112_v50  ;;  %v2065_v31 = vadd.f32 %v3243_v47, %v4302_v6  ;;  %3264 = vtanh.f32 %v1697_v1  ;;  %v1217_v26 = vadd.f32 %v4552_v55, %v1216_v51 }
 0x164   :  { %v1706_v35 = vpop.f32.mrb[69].mxu1  ;;  %v3247_v17 = vpop.eup %3246  ;;  %2257 = vst.msk [vmem:[%s4897_s3 + $0x48] sm:$0xff] %vm2247_vm1, %v2207_v29  ;;  %v2160_v38 = vadd.f32 %v3241_v43, %v2111_v40  ;;  %v2064_v53 = vadd.f32 %v3245_v3, %v4287_v45  ;;  %3266 = vtanh.f32 %v1222_v58  ;;  %v1712_v8 = vadd.f32 %v4552_v55, %v2949_v28 }
 0x165   :  { %v3249_v12 = vpop.eup %3248  ;;  %v2210_v46 = vmul.f32 0.25, %v2161_v60  ;;  %v2114_v6 = vadd.f32 %v4309_v15, %v2065_v31  ;;  %3268 = vtanh.f32 %v1217_v26  ;;  %v2805_v49 = vpop.f32.mrb[70].mxu0  ;;  %v1707_v39 = vadd.f32 %v4552_v55, %v1706_v35 }
 0x166   :  { %v3251_v13 = vpop.eup %3250  ;;  %v2209_v33 = vmul.f32 0.25, %v2160_v38  ;;  %v2113_v52 = vadd.f32 %v4294_v57, %v2064_v53  ;;  %3270 = vtanh.f32 %v1712_v8  ;;  %v1232_v36 = vadd.f32 %v4552_v55, %v2805_v49  ;;  %v1226_v41 = vpop.f32.mrb[71].mxu0 }
 0x167   :  { %v2952_v45 = vpop.f32.mrb[70].mxu1  ;;  %v3253_v22 = vpop.eup %3252  ;;  %2260 = vst.msk [vmem:[%s4897_s3 + $0x60] sm:$0xff] %vm2247_vm1, %v2210_v46  ;;  %v2163_v15 = vadd.f32 %v3247_v17, %v2114_v6  ;;  %v2067_v27 = vadd.f32 %v3251_v13, %v4314_v23  ;;  %3272 = vtanh.f32 %v1707_v39  ;;  %v1227_v5 = vadd.f32 %v4552_v55, %v1226_v41 }
 0x168   :  { %v1716_v14 = vpop.f32.mrb[71].mxu1  ;;  %v3255_v16 = vpop.eup %3254  ;;  %2259 = vst.msk [vmem:[%s4897_s3 + $0x58] sm:$0xff] %vm2247_vm1, %v2209_v33  ;;  %v2162_v57 = vadd.f32 %v3249_v12, %v2113_v52  ;;  %v2066_v63 = vadd.f32 %v3253_v22, %v4299_v62  ;;  %3274 = vtanh.f32 %v1232_v36  ;;  %v1722_v42 = vadd.f32 %v4552_v55, %v2952_v45 }
 0x169   :  { %v3257_v54 = vpop.eup %3256  ;;  %v2212_v59 = vmul.f32 0.25, %v2163_v15  ;;  %v2116_v23 = vadd.f32 %v4321_v34, %v2067_v27  ;;  %3276 = vtanh.f32 %v1227_v5  ;;  %v2808_v19 = vpop.f32.mrb[72].mxu0  ;;  %v1717_v7 = vadd.f32 %v4552_v55, %v1716_v14 }
 0x16a   :  { %v3259_v24 = vpop.eup %3258  ;;  %v2211_v4 = vmul.f32 0.25, %v2162_v57  ;;  %v2115_v32 = vadd.f32 %v4306_v11, %v2066_v63  ;;  %3278 = vtanh.f32 %v1722_v42  ;;  %v1242_v43 = vadd.f32 %v4552_v55, %v2808_v19  ;;  %v1236_v20 = vpop.f32.mrb[73].mxu0 }
 0x16b   :  { %v2955_v62 = vpop.f32.mrb[72].mxu1  ;;  %v3261_v50 = vpop.eup %3260  ;;  %2262 = vst.msk [vmem:[%s4897_s3 + $0x70] sm:$0xff] %vm2247_vm1, %v2212_v59  ;;  %v2165_v34 = vadd.f32 %v3255_v16, %v2116_v23  ;;  %v2069_v9 = vadd.f32 %v3259_v24, %v4326_v48  ;;  %3280 = vtanh.f32 %v1717_v7  ;;  %v1237_v1 = vadd.f32 %v4552_v55, %v1236_v20 }
 0x16c   :  { %v1726_v47 = vpop.f32.mrb[73].mxu1  ;;  %v3263_v29 = vpop.eup %3262  ;;  %2261 = vst.msk [vmem:[%s4897_s3 + $0x68] sm:$0xff] %vm2247_vm1, %v2211_v4  ;;  %v2164_v11 = vadd.f32 %v3257_v54, %v2115_v32  ;;  %v2068_v40 = vadd.f32 %v3261_v50, %v4311_v18  ;;  %3282 = vtanh.f32 %v1242_v43  ;;  %v1732_v58 = vadd.f32 %v4552_v55, %v2955_v62  ;;  %v4950_v50 = vld [vmem:[#allocation5_spill] sm:$0xff] }
 0x16d   :  { %v3265_v51 = vpop.eup %3264  ;;  %v2214_v28 = vmul.f32 0.25, %v2165_v34  ;;  %v2118_v48 = vadd.f32 %v4333_v61, %v2069_v9  ;;  %3284 = vtanh.f32 %v1237_v1  ;;  %v2811_v3 = vpop.f32.mrb[74].mxu0  ;;  %v1727_v60 = vadd.f32 %v4552_v55, %v1726_v47 }
 0x16e   :  { %v3267_v31 = vpop.eup %3266  ;;  %v2213_v26 = vmul.f32 0.25, %v2164_v11  ;;  %v2117_v35 = vadd.f32 %v4318_v30, %v2068_v40  ;;  %3286 = vtanh.f32 %v1732_v58  ;;  %v1252_v17 = vadd.f32 %v4552_v55, %v2811_v3  ;;  %v1246_v38 = vpop.f32.mrb[75].mxu0 }
 0x16f   :  { %v2958_v18 = vpop.f32.mrb[74].mxu1  ;;  %v3269_v53 = vpop.eup %3268  ;;  %2264 = vst.msk [vmem:[%s4897_s3 + $0x80] sm:$0xff] %vm2247_vm1, %v2214_v28  ;;  %v2167_v61 = vadd.f32 %v3263_v29, %v2118_v48  ;;  %v2071_v8 = vadd.f32 %v3267_v31, %v4338_v10  ;;  %3288 = vtanh.f32 %v1727_v60  ;;  %v1247_v12 = vadd.f32 %v4552_v55, %v1246_v38  ;;  %v4951_v29 = vld [vmem:[#allocation2_spill] sm:$0xff]  ;;  %v4952_v28 = vld [vmem:[#allocation7_spill] sm:$0xff] }
 0x170   :  { %v1736_v46 = vpop.f32.mrb[75].mxu1  ;;  %v3271_v6 = vpop.eup %3270  ;;  %2263 = vst.msk [vmem:[%s4897_s3 + $0x78] sm:$0xff] %vm2247_vm1, %v2213_v26  ;;  %v2166_v30 = vadd.f32 %v3265_v51, %v2117_v35  ;;  %v2070_v49 = vadd.f32 %v3269_v53, %v4323_v37  ;;  %3290 = vtanh.f32 %v1252_v17  ;;  %v1742_v39 = vadd.f32 %v4552_v55, %v2958_v18  ;;  %v4953_v35 = vld [vmem:[#allocation3_spill] sm:$0xff] }
 0x171   :  { %v3273_v13 = vpop.eup %3272  ;;  %v2216_v33 = vmul.f32 0.25, %v2167_v61  ;;  %v2120_v10 = vadd.f32 %v4345_v25, %v2071_v8  ;;  %3292 = vtanh.f32 %v1247_v12  ;;  %v2814_v52 = vpop.f32.mrb[76].mxu0  ;;  %v1737_v36 = vadd.f32 %v4552_v55, %v1736_v46  ;;  %v4954_v12 = vld [vmem:[#allocation9_spill] sm:$0xff] }
 0x172   :  { %v3275_v41 = vpop.eup %3274  ;;  %v2215_v45 = vmul.f32 0.25, %v2166_v30  ;;  %v2119_v22 = vadd.f32 %v4330_v56, %v2070_v49  ;;  %3294 = vtanh.f32 %v1742_v39  ;;  %v1262_v15 = vadd.f32 %v4552_v55, %v2814_v52  ;;  %v1256_v27 = vpop.f32.mrb[77].mxu0 }
 0x173   :  { %v2961_v37 = vpop.f32.mrb[76].mxu1  ;;  %v3277_v5 = vpop.eup %3276  ;;  %2266 = vst.msk [vmem:[%s4897_s3 + $0x90] sm:$0xff] %vm2247_vm1, %v2216_v33  ;;  %v2169_v25 = vadd.f32 %v3271_v6, %v2120_v10  ;;  %v2073_v14 = vadd.f32 %v3275_v41, %v4350_v44  ;;  %3296 = vtanh.f32 %v1737_v36  ;;  %v1257_v16 = vadd.f32 %v4552_v55, %v1256_v27  ;;  %v4956_v41 = vld [vmem:[#allocation11_spill] sm:$0xff] }
 0x174   :  { %v1746_v57 = vpop.f32.mrb[77].mxu1  ;;  %v3279_v63 = vpop.eup %3278  ;;  %2265 = vst.msk [vmem:[%s4897_s3 + $0x88] sm:$0xff] %vm2247_vm1, %v2215_v45  ;;  %v2168_v56 = vadd.f32 %v3273_v13, %v2119_v22  ;;  %v2072_v42 = vadd.f32 %v3277_v5, %v4335_v2  ;;  %3298 = vtanh.f32 %v1262_v15  ;;  %v1752_v54 = vadd.f32 %v4552_v55, %v2961_v37  ;;  %v4955_v13 = vld [vmem:[#allocation4_spill] sm:$0xff]  ;;  %v4957_v5 = vld [vmem:[#allocation6_spill] sm:$0xff] }
 0x175   :  { %v3281_v59 = vpop.eup %3280  ;;  %v2218_v23 = vmul.f32 0.25, %v2169_v25  ;;  %v2122_v44 = vadd.f32 %v4357_v0, %v2073_v14  ;;  %3300 = vtanh.f32 %v1257_v16  ;;  %v2817_v19 = vpop.f32.mrb[78].mxu0  ;;  %v1747_v7 = vadd.f32 %v4552_v55, %v1746_v57 }
 0x176   :  { %v3283_v24 = vpop.eup %3282  ;;  %v2217_v4 = vmul.f32 0.25, %v2168_v56  ;;  %v2121_v32 = vadd.f32 %v4342_v21, %v2072_v42  ;;  %3302 = vtanh.f32 %v1752_v54  ;;  %v1272_v43 = vadd.f32 %v4552_v55, %v2817_v19  ;;  %v1266_v20 = vpop.f32.mrb[79].mxu0  ;;  %v4958_v42 = vld [vmem:[#allocation13_spill] sm:$0xff] }
 0x177   :  { %v2964_v2 = vpop.f32.mrb[78].mxu1  ;;  %v3285_v62 = vpop.eup %3284  ;;  %2268 = vst.msk [vmem:[%s4897_s3 + $0xa0] sm:$0xff] %vm2247_vm1, %v2218_v23  ;;  %v2171_v0 = vadd.f32 %v3279_v63, %v2122_v44  ;;  %v2075_v34 = vadd.f32 %v3283_v24, %v4950_v50  ;;  %3304 = vtanh.f32 %v1747_v7  ;;  %v1267_v9 = vadd.f32 %v4552_v55, %v1266_v20  ;;  %v4959_v7 = vld [vmem:[#allocation8_spill] sm:$0xff]  ;;  %v4960_v20 = vld [vmem:[#allocation15_spill] sm:$0xff] }
 0x178   :  { %v1756_v1 = vpop.f32.mrb[79].mxu1  ;;  %v3287_v47 = vpop.eup %3286  ;;  %2267 = vst.msk [vmem:[%s4897_s3 + $0x98] sm:$0xff] %vm2247_vm1, %v2217_v4  ;;  %v2170_v21 = vadd.f32 %v3281_v59, %v2121_v32  ;;  %v2074_v11 = vadd.f32 %v3285_v62, %v4951_v29  ;;  %3306 = vtanh.f32 %v1272_v43  ;;  %v1762_v40 = vadd.f32 %v4552_v55, %v2964_v2 }
 0x179   :  { %v3289_v58 = vpop.eup %3288  ;;  %v2220_v51 = vmul.f32 0.25, %v2171_v0  ;;  %v2124_v48 = vadd.f32 %v4952_v28, %v2075_v34  ;;  %3308 = vtanh.f32 %v1267_v9  ;;  %v2820_v3 = vpop.f32.mrb[80].mxu0  ;;  %v1757_v60 = vadd.f32 %v4552_v55, %v1756_v1  ;;  %v4961_v9 = vld [vmem:[#allocation10_spill] sm:$0xff] }
 0x17a   :  { %v3291_v31 = vpop.eup %3290  ;;  %v2219_v26 = vmul.f32 0.25, %v2170_v21  ;;  %v2123_v17 = vadd.f32 %v4953_v35, %v2074_v11  ;;  %3310 = vtanh.f32 %v1762_v40  ;;  %v1282_v38 = vadd.f32 %v4552_v55, %v2820_v3  ;;  %v1276_v18 = vpop.f32.mrb[81].mxu0 }
 0x17b   :  { %v2967_v53 = vpop.f32.mrb[80].mxu1  ;;  %v3293_v61 = vpop.eup %3292  ;;  %2270 = vst.msk [vmem:[%s4897_s3 + $0xb0] sm:$0xff] %vm2247_vm1, %v2220_v51  ;;  %v2173_v8 = vadd.f32 %v3287_v47, %v2124_v48  ;;  %v2077_v46 = vadd.f32 %v3291_v31, %v4954_v12  ;;  %3312 = vtanh.f32 %v1757_v60  ;;  %v1277_v6 = vadd.f32 %v4552_v55, %v1276_v18  ;;  %v4963_v31 = vld [vmem:[#allocation12_spill] sm:$0xff]  ;;  %v4964_v18 = vld [vmem:[#allocation19_spill] sm:$0xff] }
 0x17c   :  { %v1766_v30 = vpop.f32.mrb[81].mxu1  ;;  %v3295_v49 = vpop.eup %3294  ;;  %2269 = vst.msk [vmem:[%s4897_s3 + $0xa8] sm:$0xff] %vm2247_vm1, %v2219_v26  ;;  %v2172_v39 = vadd.f32 %v3289_v58, %v2123_v17  ;;  %v2076_v33 = vadd.f32 %v3293_v61, %v4955_v13  ;;  %3314 = vtanh.f32 %v1282_v38  ;;  %v1772_v10 = vadd.f32 %v4552_v55, %v2967_v53  ;;  %v4962_v58 = vld [vmem:[#allocation17_spill] sm:$0xff] }
 0x17d   :  { %v3297_v52 = vpop.eup %3296  ;;  %v2222_v36 = vmul.f32 0.25, %v2173_v8  ;;  %v2126_v45 = vadd.f32 %v4956_v41, %v2077_v46  ;;  %3316 = vtanh.f32 %v1277_v6  ;;  %v2823_v22 = vpop.f32.mrb[82].mxu0  ;;  %v1767_v15 = vadd.f32 %v4552_v55, %v1766_v30  ;;  %v4965_v6 = vld [vmem:[#allocation14_spill] sm:$0xff] }
 0x17e   :  { %v3299_v27 = vpop.eup %3298  ;;  %v2221_v37 = vmul.f32 0.25, %v2172_v39  ;;  %v2125_v25 = vadd.f32 %v4957_v5, %v2076_v33  ;;  %3318 = vtanh.f32 %v1772_v10  ;;  %v1292_v14 = vadd.f32 %v4552_v55, %v2823_v22  ;;  %v1286_v16 = vpop.f32.mrb[83].mxu0 }
 0x17f   :  { %v2970_v57 = vpop.f32.mrb[82].mxu1  ;;  %v3301_v63 = vpop.eup %3300  ;;  %2272 = vst.msk [vmem:[%s4897_s3 + $0xc0] sm:$0xff] %vm2247_vm1, %v2222_v36  ;;  %v2175_v56 = vadd.f32 %v3295_v49, %v2126_v45  ;;  %v2079_v54 = vadd.f32 %v3299_v27, %v4958_v42  ;;  %3320 = vtanh.f32 %v1767_v15  ;;  %v1287_v59 = vadd.f32 %v4552_v55, %v1286_v16  ;;  %v4967_v27 = vld [vmem:[#allocation16_spill] sm:$0xff]  ;;  %v4968_v16 = vld [vmem:[#allocation23_spill] sm:$0xff] }
 0x180   :  { %v1776_v23 = vpop.f32.mrb[83].mxu1  ;;  %v3303_v44 = vpop.eup %3302  ;;  %2271 = vst.msk [vmem:[%s4897_s3 + $0xb8] sm:$0xff] %vm2247_vm1, %v2221_v37  ;;  %v2174_v19 = vadd.f32 %v3297_v52, %v2125_v25  ;;  %v2078_v24 = vadd.f32 %v3301_v63, %v4959_v7  ;;  %3322 = vtanh.f32 %v1292_v14  ;;  %v1782_v4 = vadd.f32 %v4552_v55, %v2970_v57  ;;  %v4966_v52 = vld [vmem:[#allocation21_spill] sm:$0xff] }
 0x181   :  { %v3305_v32 = vpop.eup %3304  ;;  %v2224_v43 = vmul.f32 0.25, %v2175_v56  ;;  %v2128_v2 = vadd.f32 %v4960_v20, %v2079_v54  ;;  %3324 = vtanh.f32 %v1287_v59  ;;  %v2826_v62 = vpop.f32.mrb[84].mxu0  ;;  %v1777_v0 = vadd.f32 %v4552_v55, %v1776_v23  ;;  %v4969_v59 = vld [vmem:[#allocation18_spill] sm:$0xff] }
 0x182   :  { %v3307_v50 = vpop.eup %3306  ;;  %v2223_v34 = vmul.f32 0.25, %v2174_v19  ;;  %v2127_v1 = vadd.f32 %v4961_v9, %v2078_v24  ;;  %3326 = vtanh.f32 %v1782_v4  ;;  %v1302_v47 = vadd.f32 %v4552_v55, %v2826_v62  ;;  %v1296_v21 = vpop.f32.mrb[85].mxu0 }
 0x183   :  { %v2973_v29 = vpop.f32.mrb[84].mxu1  ;;  %v3309_v11 = vpop.eup %3308  ;;  %2274 = vst.msk [vmem:[%s4897_s3 + $0xd0] sm:$0xff] %vm2247_vm1, %v2224_v43  ;;  %v2177_v40 = vadd.f32 %v3303_v44, %v2128_v2  ;;  %v2081_v51 = vadd.f32 %v3307_v50, %v4962_v58  ;;  %3328 = vtanh.f32 %v1777_v0  ;;  %v1297_v28 = vadd.f32 %v4552_v55, %v1296_v21  ;;  %v4971_v50 = vld [vmem:[#allocation20_spill] sm:$0xff]  ;;  %v4972_v21 = vld [vmem:[#allocation27_spill] sm:$0xff] }
 0x184   :  { %v1786_v48 = vpop.f32.mrb[85].mxu1  ;;  %v3311_v3 = vpop.eup %3310  ;;  %2273 = vst.msk [vmem:[%s4897_s3 + $0xc8] sm:$0xff] %vm2247_vm1, %v2223_v34  ;;  %v2176_v60 = vadd.f32 %v3305_v32, %v2127_v1  ;;  %v2080_v26 = vadd.f32 %v3309_v11, %v4963_v31  ;;  %3330 = vtanh.f32 %v1302_v47  ;;  %v1792_v35 = vadd.f32 %v4552_v55, %v2973_v29  ;;  %v4970_v32 = vld [vmem:[#allocation25_spill] sm:$0xff] }
 0x185   :  { %v3313_v17 = vpop.eup %3312  ;;  %v2226_v38 = vmul.f32 0.25, %v2177_v40  ;;  %v2130_v53 = vadd.f32 %v4964_v18, %v2081_v51  ;;  %3332 = vtanh.f32 %v1297_v28  ;;  %v2829_v61 = vpop.f32.mrb[86].mxu0  ;;  %v1787_v8 = vadd.f32 %v4552_v55, %v1786_v48  ;;  %v4973_v28 = vld [vmem:[#allocation22_spill] sm:$0xff] }
 0x186   :  { %v3315_v12 = vpop.eup %3314  ;;  %v2225_v46 = vmul.f32 0.25, %v2176_v60  ;;  %v2129_v30 = vadd.f32 %v4965_v6, %v2080_v26  ;;  %3334 = vtanh.f32 %v1792_v35  ;;  %v1312_v49 = vadd.f32 %v4552_v55, %v2829_v61  ;;  %v1306_v39 = vpop.f32.mrb[87].mxu0 }
 0x187   :  { %v2976_v13 = vpop.f32.mrb[86].mxu1  ;;  %v3317_v33 = vpop.eup %3316  ;;  %2276 = vst.msk [vmem:[%s4897_s3 + $0xe0] sm:$0xff] %vm2247_vm1, %v2226_v38  ;;  %v2179_v10 = vadd.f32 %v3311_v3, %v2130_v53  ;;  %v2083_v36 = vadd.f32 %v3315_v12, %v4966_v52  ;;  %3336 = vtanh.f32 %v1787_v8  ;;  %v1307_v41 = vadd.f32 %v4552_v55, %v1306_v39  ;;  %v4975_v12 = vld [vmem:[#allocation24_spill] sm:$0xff]  ;;  %v4976_v39 = vld [vmem:[#allocation31_spill] sm:$0xff] }
 0x188   :  { %v1796_v45 = vpop.f32.mrb[87].mxu1  ;;  %v3319_v22 = vpop.eup %3318  ;;  %2275 = vst.msk [vmem:[%s4897_s3 + $0xd8] sm:$0xff] %vm2247_vm1, %v2225_v46  ;;  %v2178_v15 = vadd.f32 %v3313_v17, %v2129_v30  ;;  %v2082_v37 = vadd.f32 %v3317_v33, %v4967_v27  ;;  %3338 = vtanh.f32 %v1312_v49  ;;  %v1802_v5 = vadd.f32 %v4552_v55, %v2976_v13  ;;  %v4974_v17 = vld [vmem:[#allocation29_spill] sm:$0xff] }
 0x189   :  { %v3321_v25 = vpop.eup %3320  ;;  %v2228_v14 = vmul.f32 0.25, %v2179_v10  ;;  %v2132_v57 = vadd.f32 %v4968_v16, %v2083_v36  ;;  %3340 = vtanh.f32 %v1307_v41  ;;  %v2832_v63 = vpop.f32.mrb[88].mxu0  ;;  %v1797_v56 = vadd.f32 %v4552_v55, %v1796_v45  ;;  %v4977_v41 = vld [vmem:[#allocation26_spill] sm:$0xff] }
 0x18a   :  { %v3323_v42 = vpop.eup %3322  ;;  %v2227_v54 = vmul.f32 0.25, %v2178_v15  ;;  %v2131_v23 = vadd.f32 %v4969_v59, %v2082_v37  ;;  %3342 = vtanh.f32 %v1802_v5  ;;  %v1322_v44 = vadd.f32 %v4552_v55, %v2832_v63  ;;  %v1316_v19 = vpop.f32.mrb[89].mxu0 }
 0x18b   :  { %v2979_v7 = vpop.f32.mrb[88].mxu1  ;;  %v3325_v24 = vpop.eup %3324  ;;  %2278 = vst.msk [vmem:[%s4897_s3 + $0xf0] sm:$0xff] %vm2247_vm1, %v2228_v14  ;;  %v2181_v4 = vadd.f32 %v3319_v22, %v2132_v57  ;;  %v2085_v43 = vadd.f32 %v3323_v42, %v4970_v32  ;;  %3344 = vtanh.f32 %v1797_v56  ;;  %v1317_v20 = vadd.f32 %v4552_v55, %v1316_v19  ;;  %v4979_v42 = vld [vmem:[#allocation28_spill] sm:$0xff]  ;;  %v4980_v19 = vld [vmem:[#allocation35_spill] sm:$0xff] }
 0x18c   :  { %v1806_v2 = vpop.f32.mrb[89].mxu1  ;;  %v3327_v62 = vpop.eup %3326  ;;  %2277 = vst.msk [vmem:[%s4897_s3 + $0xe8] sm:$0xff] %vm2247_vm1, %v2227_v54  ;;  %v2180_v0 = vadd.f32 %v3321_v25, %v2131_v23  ;;  %v2084_v34 = vadd.f32 %v3325_v24, %v4971_v50  ;;  %3346 = vtanh.f32 %v1322_v44  ;;  %v1812_v9 = vadd.f32 %v4552_v55, %v2979_v7  ;;  %v4978_v25 = vld [vmem:[#allocation33_spill] sm:$0xff] }
 0x18d   :  { %v3329_v1 = vpop.eup %3328  ;;  %v2230_v47 = vmul.f32 0.25, %v2181_v4  ;;  %v2134_v29 = vadd.f32 %v4972_v21, %v2085_v43  ;;  %3348 = vtanh.f32 %v1317_v20  ;;  %v2835_v11 = vpop.f32.mrb[90].mxu0  ;;  %v1807_v40 = vadd.f32 %v4552_v55, %v1806_v2  ;;  %v4981_v20 = vld [vmem:[#allocation30_spill] sm:$0xff] }
 0x18e   :  { %v3331_v58 = vpop.eup %3330  ;;  %v2229_v51 = vmul.f32 0.25, %v2180_v0  ;;  %v2133_v48 = vadd.f32 %v4973_v28, %v2084_v34  ;;  %3350 = vtanh.f32 %v1812_v9  ;;  %v1332_v3 = vadd.f32 %v4552_v55, %v2835_v11  ;;  %v1326_v60 = vpop.f32.mrb[91].mxu0 }
 0x18f   :  { %v2982_v31 = vpop.f32.mrb[90].mxu1  ;;  %v3333_v26 = vpop.eup %3332  ;;  %2280 = vst.msk [vmem:[%s4897_s3 + $0x100] sm:$0xff] %vm2247_vm1, %v2230_v47  ;;  %v2183_v35 = vadd.f32 %v3327_v62, %v2134_v29  ;;  %v2087_v38 = vadd.f32 %v3331_v58, %v4974_v17  ;;  %3352 = vtanh.f32 %v1807_v40  ;;  %v1327_v18 = vadd.f32 %v4552_v55, %v1326_v60  ;;  %v4983_v58 = vld [vmem:[#allocation32_spill] sm:$0xff]  ;;  %v4984_v60 = vld [vmem:[#allocation39_spill] sm:$0xff] }
 0x190   :  { %v1816_v53 = vpop.f32.mrb[91].mxu1  ;;  %v3335_v61 = vpop.eup %3334  ;;  %2279 = vst.msk [vmem:[%s4897_s3 + $0xf8] sm:$0xff] %vm2247_vm1, %v2229_v51  ;;  %v2182_v8 = vadd.f32 %v3329_v1, %v2133_v48  ;;  %v2086_v46 = vadd.f32 %v3333_v26, %v4975_v12  ;;  %3354 = vtanh.f32 %v1332_v3  ;;  %v1822_v6 = vadd.f32 %v4552_v55, %v2982_v31  ;;  %v4982_v1 = vld [vmem:[#allocation37_spill] sm:$0xff] }
 0x191   :  { %v3337_v30 = vpop.eup %3336  ;;  %v2232_v49 = vmul.f32 0.25, %v2183_v35  ;;  %v2136_v13 = vadd.f32 %v4976_v39, %v2087_v38  ;;  %3356 = vtanh.f32 %v1327_v18  ;;  %v2838_v33 = vpop.f32.mrb[92].mxu0  ;;  %v1817_v10 = vadd.f32 %v4552_v55, %v1816_v53  ;;  %v4985_v18 = vld [vmem:[#allocation34_spill] sm:$0xff] }
 0x192   :  { %v3339_v52 = vpop.eup %3338  ;;  %v2231_v36 = vmul.f32 0.25, %v2182_v8  ;;  %v2135_v45 = vadd.f32 %v4977_v41, %v2086_v46  ;;  %3358 = vtanh.f32 %v1822_v6  ;;  %v1342_v22 = vadd.f32 %v4552_v55, %v2838_v33  ;;  %v1336_v15 = vpop.f32.mrb[93].mxu0 }
 0x193   :  { %v2985_v27 = vpop.f32.mrb[92].mxu1  ;;  %v3341_v37 = vpop.eup %3340  ;;  %2282 = vst.msk [vmem:[%s4897_s3 + $0x110] sm:$0xff] %vm2247_vm1, %v2232_v49  ;;  %v2185_v5 = vadd.f32 %v3335_v61, %v2136_v13  ;;  %v2089_v14 = vadd.f32 %v3339_v52, %v4978_v25  ;;  %3360 = vtanh.f32 %v1817_v10  ;;  %v1337_v16 = vadd.f32 %v4552_v55, %v1336_v15  ;;  %v4987_v52 = vld [vmem:[#allocation36_spill] sm:$0xff]  ;;  %v4988_v15 = vld [vmem:[#allocation43_spill] sm:$0xff] }
 0x194   :  { %v1826_v57 = vpop.f32.mrb[93].mxu1  ;;  %v3343_v63 = vpop.eup %3342  ;;  %2281 = vst.msk [vmem:[%s4897_s3 + $0x108] sm:$0xff] %vm2247_vm1, %v2231_v36  ;;  %v2184_v56 = vadd.f32 %v3337_v30, %v2135_v45  ;;  %v2088_v54 = vadd.f32 %v3341_v37, %v4979_v42  ;;  %3362 = vtanh.f32 %v1342_v22  ;;  %v1832_v59 = vadd.f32 %v4552_v55, %v2985_v27  ;;  %v4986_v30 = vld [vmem:[#allocation41_spill] sm:$0xff] }
 0x195   :  { %v3345_v23 = vpop.eup %3344  ;;  %v2234_v44 = vmul.f32 0.25, %v2185_v5  ;;  %v2138_v7 = vadd.f32 %v4980_v19, %v2089_v14  ;;  %3364 = vtanh.f32 %v1337_v16  ;;  %v2841_v24 = vpop.f32.mrb[94].mxu0  ;;  %v1827_v4 = vadd.f32 %v4552_v55, %v1826_v57  ;;  %v4989_v14 = vld [vmem:[#allocation38_spill] sm:$0xff] }
 0x196   :  { %v3347_v32 = vpop.eup %3346  ;;  %v2233_v43 = vmul.f32 0.25, %v2184_v56  ;;  %v2137_v2 = vadd.f32 %v4981_v20, %v2088_v54  ;;  %3366 = vtanh.f32 %v1832_v59  ;;  %v1352_v62 = vadd.f32 %v4552_v55, %v2841_v24  ;;  %v1346_v0 = vpop.f32.mrb[95].mxu0  ;;  %v4990_v56 = vld [vmem:[#allocation45_spill] sm:$0xff]  ;;  %v4991_v59 = vld [vmem:[#allocation40_spill] sm:$0xff] }
 0x197   :  { %v2988_v50 = vpop.f32.mrb[94].mxu1  ;;  %v3349_v34 = vpop.eup %3348  ;;  %2284 = vst.msk [vmem:[%s4897_s3 + $0x120] sm:$0xff] %vm2247_vm1, %v2234_v44  ;;  %v2187_v9 = vadd.f32 %v3343_v63, %v2138_v7  ;;  %v2091_v47 = vadd.f32 %v3347_v32, %v4982_v1  ;;  %3368 = vtanh.f32 %v1827_v4  ;;  %v1347_v21 = vadd.f32 %v4552_v55, %v1346_v0  ;;  %v4992_v7 = vld [vmem:[#allocation47_spill] sm:$0xff]  ;;  %v4994_v0 = vld [vmem:[#allocation49_spill] sm:$0xff]  ;;  %v4995_v1 = vld [vmem:[#allocation44_spill] sm:$0xff] }
 0x198   :  { %v1836_v29 = vpop.f32.mrb[95].mxu1  ;;  %v3351_v11 = vpop.eup %3350  ;;  %2283 = vst.msk [vmem:[%s4897_s3 + $0x118] sm:$0xff] %vm2247_vm1, %v2233_v43  ;;  %v2186_v40 = vadd.f32 %v3345_v23, %v2137_v2  ;;  %v2090_v51 = vadd.f32 %v3349_v34, %v4983_v58  ;;  %3370 = vtanh.f32 %v1352_v62  ;;  %v1842_v28 = vadd.f32 %v4552_v55, %v2988_v50  ;;  %v4993_v43 = vld [vmem:[#allocation42_spill] sm:$0xff] }
 0x199   :  { %v3353_v48 = vpop.eup %3352  ;;  %v2236_v3 = vmul.f32 0.25, %v2187_v9  ;;  %v2140_v31 = vadd.f32 %v4984_v60, %v2091_v47  ;;  %3372 = vtanh.f32 %v1347_v21  ;;  %v2844_v26 = vpop.f32.mrb[96].mxu0  ;;  %v1837_v35 = vadd.f32 %v4552_v55, %v1836_v29 }
 0x19a   :  { %v3355_v17 = vpop.eup %3354  ;;  %v2235_v38 = vmul.f32 0.25, %v2186_v40  ;;  %v2139_v53 = vadd.f32 %v4985_v18, %v2090_v51  ;;  %3374 = vtanh.f32 %v1842_v28  ;;  %v1362_v61 = vadd.f32 %v4552_v55, %v2844_v26  ;;  %v1356_v8 = vpop.f32.mrb[97].mxu0  ;;  %v4997_v28 = vld [vmem:[#allocation46_spill] sm:$0xff] }
 0x19b   :  { %v2991_v12 = vpop.f32.mrb[96].mxu1  ;;  %v3357_v46 = vpop.eup %3356  ;;  %2286 = vst.msk [vmem:[%s4897_s3 + $0x130] sm:$0xff] %vm2247_vm1, %v2236_v3  ;;  %v2189_v6 = vadd.f32 %v3351_v11, %v2140_v31  ;;  %v2093_v49 = vadd.f32 %v3355_v17, %v4986_v30  ;;  %3376 = vtanh.f32 %v1837_v35  ;;  %v1357_v39 = vadd.f32 %v4552_v55, %v1356_v8  ;;  %v4996_v11 = vld [vmem:[#allocation51_spill] sm:$0xff]  ;;  %v4998_v31 = vld [vmem:[#allocation52_spill] sm:$0xff]  ;;  %v5000_v8 = vld [vmem:[#allocation53_spill] sm:$0xff] }
 0x19c   :  { %v1846_v13 = vpop.f32.mrb[97].mxu1  ;;  %v3359_v33 = vpop.eup %3358  ;;  %2285 = vst.msk [vmem:[%s4897_s3 + $0x128] sm:$0xff] %vm2247_vm1, %v2235_v38  ;;  %v2188_v10 = vadd.f32 %v3353_v48, %v2139_v53  ;;  %v2092_v36 = vadd.f32 %v3357_v46, %v4987_v52  ;;  %3378 = vtanh.f32 %v1362_v61  ;;  %v1852_v41 = vadd.f32 %v4552_v55, %v2991_v12  ;;  %v4999_v38 = vld [vmem:[#allocation48_spill] sm:$0xff] }
 0x19d   :  { %v3361_v45 = vpop.eup %3360  ;;  %v2238_v22 = vmul.f32 0.25, %v2189_v6  ;;  %v2142_v27 = vadd.f32 %v4988_v15, %v2093_v49  ;;  %3380 = vtanh.f32 %v1357_v39  ;;  %v1847_v37 = vadd.f32 %v4552_v55, %v1846_v13  ;;  %v5001_v6 = vld [vmem:[#allocation50_spill] sm:$0xff] }
 0x19e   :  { %v3363_v5 = vpop.eup %3362  ;;  %v2237_v25 = vmul.f32 0.25, %v2188_v10  ;;  %v2141_v16 = vadd.f32 %v4989_v14, %v2092_v36  ;;  %3382 = vtanh.f32 %v1852_v41 }
 0x19f   :  { %v3365_v57 = vpop.eup %3364  ;;  %2288 = vst.msk [vmem:[%s4897_s3 + $0x140] sm:$0xff] %vm2247_vm1, %v2238_v22  ;;  %v2191_v63 = vadd.f32 %v3359_v33, %v2142_v27  ;;  %v2095_v42 = vadd.f32 %v3363_v5, %v4990_v56  ;;  %3384 = vtanh.f32 %v1847_v37 }
 0x1a0   :  { %v3367_v54 = vpop.eup %3366  ;;  %2287 = vst.msk [vmem:[%s4897_s3 + $0x138] sm:$0xff] %vm2247_vm1, %v2237_v25  ;;  %v2190_v55 = vadd.f32 %v3361_v45, %v2141_v16  ;;  %v2094_v23 = vadd.f32 %v3365_v57, %v4991_v59 }
 0x1a1   :  { %v3369_v44 = vpop.eup %3368  ;;  %v2240_v19 = vmul.f32 0.25, %v2191_v63  ;;  %v2144_v24 = vadd.f32 %v4992_v7, %v2095_v42 }
 0x1a2   :  { %v3371_v4 = vpop.eup %3370  ;;  %v2239_v32 = vmul.f32 0.25, %v2190_v55  ;;  %v2143_v20 = vadd.f32 %v4993_v43, %v2094_v23 }
 0x1a3   :  { %v3373_v2 = vpop.eup %3372  ;;  %2290 = vst.msk [vmem:[%s4897_s3 + $0x150] sm:$0xff] %vm2247_vm1, %v2240_v19  ;;  %v2193_v62 = vadd.f32 %v3367_v54, %v2144_v24  ;;  %v2097_v50 = vadd.f32 %v3371_v4, %v4994_v0 }
 0x1a4   :  { %v3375_v34 = vpop.eup %3374  ;;  %2289 = vst.msk [vmem:[%s4897_s3 + $0x148] sm:$0xff] %vm2247_vm1, %v2239_v32  ;;  %v2192_v9 = vadd.f32 %v3369_v44, %v2143_v20  ;;  %v2096_v47 = vadd.f32 %v3373_v2, %v4995_v1 }
 0x1a5   :  { %v3377_v21 = vpop.eup %3376  ;;  %v2242_v29 = vmul.f32 0.25, %v2193_v62  ;;  %v2146_v40 = vadd.f32 %v4996_v11, %v2097_v50 }
 0x1a6   :  { %v3379_v58 = vpop.eup %3378  ;;  %v2241_v51 = vmul.f32 0.25, %v2192_v9  ;;  %v2145_v48 = vadd.f32 %v4997_v28, %v2096_v47 }
 0x1a7   :  { %v3381_v3 = vpop.eup %3380  ;;  %2292 = vst.msk [vmem:[%s4897_s3 + $0x160] sm:$0xff] %vm2247_vm1, %v2242_v29  ;;  %v2195_v60 = vadd.f32 %v3375_v34, %v2146_v40  ;;  %v2099_v26 = vadd.f32 %v3379_v58, %v4998_v31 }
 0x1a8   :  { %v3383_v35 = vpop.eup %3382  ;;  %2291 = vst.msk [vmem:[%s4897_s3 + $0x158] sm:$0xff] %vm2247_vm1, %v2241_v51  ;;  %v2194_v17 = vadd.f32 %v3377_v21, %v2145_v48  ;;  %v2098_v18 = vadd.f32 %v3381_v3, %v4999_v38 }
 0x1a9   :  { %v3385_v53 = vpop.eup %3384  ;;  %v2244_v61 = vmul.f32 0.25, %v2195_v60  ;;  %v2148_v12 = vadd.f32 %v5000_v8, %v2099_v26 }
 0x1aa   :  { %v2243_v46 = vmul.f32 0.25, %v2194_v17  ;;  %v2147_v30 = vadd.f32 %v5001_v6, %v2098_v18 }
 0x1ab   :  { %2294 = vst.msk [vmem:[%s4897_s3 + $0x170] sm:$0xff] %vm2247_vm1, %v2244_v61  ;;  %v2197_v49 = vadd.f32 %v3383_v35, %v2148_v12 }
 0x1ac   :  { %2293 = vst.msk [vmem:[%s4897_s3 + $0x168] sm:$0xff] %vm2247_vm1, %v2243_v46  ;;  %v2196_v39 = vadd.f32 %v3385_v53, %v2147_v30 }
 0x1ad   :  { %v2246_v13 = vmul.f32 0.25, %v2197_v49 }
 0x1ae   :  { %v2245_v33 = vmul.f32 0.25, %v2196_v39 }
 0x1af   :  { %2296 = vst.msk [vmem:[%s4897_s3 + $0x180] sm:$0xff] %vm2247_vm1, %v2246_v13 }
 0x1b0   :  { %2295 = vst.msk [vmem:[%s4897_s3 + $0x178] sm:$0xff] %vm2247_vm1, %v2245_v33 }

// kernel: lenet5_forward.4
= control target key start
LH: loop header
LB: loop body
LE: loop exit
PB: predicated region body
PF: predicated region fallthrough
CT: control target
= control target key end

     0   :  { %vm81_vm0 = vcmask 179200   ;;  %vm433_vm2 = vcmask 130048   ;;  %s845_s1 = inlined_call_operand.vmem [shape: f32[16,150], index: 1, kind: input, shape index: {}]   ;;  %s846_s0 = inlined_call_operand.vmem [shape: f32[224,150], index: 0, kind: input, shape index: {}]   ;;  %s847_s2 = inlined_call_operand.vmem [shape: f32[1,16], index: 2, kind: input, shape index: {}]   ;;  %s848_s3 = inlined_call_operand.vmem [shape: f32[56,16], index: 3, kind: output, shape index: {}]  }
   0x1   :  { %v71_v0 = vld [vmem:[%s845_s1 + $0x8] sm:$0xff]  ;;  %v73_v1 = vld [vmem:[%s845_s1 + $0x18] sm:$0xff]  ;;  %vm477_vm1 = vmpackc.low %vm81_vm0, %vm81_vm0 }
   0x2   :  { %v476_v2 = vpack.c.bf16 %v73_v1, %v71_v0  ;;  %v70_v3 = vld [vmem:[%s845_s1] sm:$0xff]  ;;  %v72_v4 = vld [vmem:[%s845_s1 + $0x10] sm:$0xff]  ;;  %v15_v5 = vld [vmem:[%s846_s0 + $0x8] sm:$0xff] }
   0x3   :  { %v479_v6 = vpack.c.bf16 %v72_v4, %v70_v3  ;;  %448 = vmatprep.mubr.msk.f32.mxu0 %vm81_vm0, %v15_v5  ;;  %v43_v7 = vld [vmem:[%s846_s0 + $0xe8] sm:$0xff]  ;;  %v14_v8 = vld [vmem:[%s846_s0] sm:$0xff]  ;;  %v17_v10 = vld [vmem:[%s846_s0 + $0x18] sm:$0xff] }
   0x4   :  { %478 = vmatprep.subr.msk.bf16.mxu0 %vm477_vm1, %v476_v2  ;;  %481 = vmatprep.subr.msk.bf16.mxu1 %vm477_vm1, %v476_v2  ;;  %v42_v9 = vld [vmem:[%s846_s0 + $0xe0] sm:$0xff]  ;;  %v45_v11 = vld [vmem:[%s846_s0 + $0xf8] sm:$0xff]  ;;  %v16_v12 = vld [vmem:[%s846_s0 + $0x10] sm:$0xff] }
   0x5   :  { %480 = vmatpush1.bf16.xpose.msra.mxu0 %v479_v6  ;;  %482 = vmatpush1.bf16.xpose.msra.mxu1 %v479_v6  ;;  %v44_v13 = vld [vmem:[%s846_s0 + $0xf0] sm:$0xff]  ;;  %v19_v14 = vld [vmem:[%s846_s0 + $0x28] sm:$0xff]  ;;  %v18_v16 = vld [vmem:[%s846_s0 + $0x20] sm:$0xff] }
   0x6   :  { %462 = vmatprep.mubr.msk.f32.mxu1 %vm81_vm0, %v43_v7  ;;  %v47_v15 = vld [vmem:[%s846_s0 + $0x108] sm:$0xff]  ;;  %v46_v17 = vld [vmem:[%s846_s0 + $0x100] sm:$0xff]  ;;  %v21_v18 = vld [vmem:[%s846_s0 + $0x38] sm:$0xff] }
   0x7   :  { %v49_v19 = vld [vmem:[%s846_s0 + $0x118] sm:$0xff]  ;;  %v20_v20 = vld [vmem:[%s846_s0 + $0x30] sm:$0xff]  ;;  %v23_v22 = vld [vmem:[%s846_s0 + $0x48] sm:$0xff] }
   0x8   :  { %v48_v21 = vld [vmem:[%s846_s0 + $0x110] sm:$0xff]  ;;  %v51_v23 = vld [vmem:[%s846_s0 + $0x128] sm:$0xff]  ;;  %v22_v24 = vld [vmem:[%s846_s0 + $0x40] sm:$0xff] }
   0x9   :  { %v50_v25 = vld [vmem:[%s846_s0 + $0x120] sm:$0xff]  ;;  %v25_v26 = vld [vmem:[%s846_s0 + $0x58] sm:$0xff]  ;;  %v24_v28 = vld [vmem:[%s846_s0 + $0x50] sm:$0xff] }
   0xa   :  { %v53_v27 = vld [vmem:[%s846_s0 + $0x138] sm:$0xff]  ;;  %v52_v29 = vld [vmem:[%s846_s0 + $0x130] sm:$0xff]  ;;  %v27_v30 = vld [vmem:[%s846_s0 + $0x68] sm:$0xff] }
   0xb   :  { %v55_v31 = vld [vmem:[%s846_s0 + $0x148] sm:$0xff]  ;;  %v26_v32 = vld [vmem:[%s846_s0 + $0x60] sm:$0xff]  ;;  %v29_v34 = vld [vmem:[%s846_s0 + $0x78] sm:$0xff] }
   0xc   :  { %237 = vmatmul.mubr.f32.vlgmr.msra.gmra.mrb[0].mxu0 %v14_v8  ;;  %307 = vmatmul.mubr.f32.vlgmr.msra.gmra.mrb[0].mxu1 %v42_v9  ;;  %v54_v33 = vld [vmem:[%s846_s0 + $0x140] sm:$0xff]  ;;  %v57_v35 = vld [vmem:[%s846_s0 + $0x158] sm:$0xff]  ;;  %v28_v36 = vld [vmem:[%s846_s0 + $0x70] sm:$0xff] }
   0xd   :  { %449 = vmatprep.mubr.msk.f32.mxu0 %vm81_vm0, %v17_v10  ;;  %463 = vmatprep.mubr.msk.f32.mxu1 %vm81_vm0, %v45_v11  ;;  %v56_v37 = vld [vmem:[%s846_s0 + $0x150] sm:$0xff]  ;;  %v31_v38 = vld [vmem:[%s846_s0 + $0x88] sm:$0xff]  ;;  %v30_v40 = vld [vmem:[%s846_s0 + $0x80] sm:$0xff] }
   0xe   :  { %v59_v39 = vld [vmem:[%s846_s0 + $0x168] sm:$0xff]  ;;  %v58_v41 = vld [vmem:[%s846_s0 + $0x160] sm:$0xff]  ;;  %v33_v42 = vld [vmem:[%s846_s0 + $0x98] sm:$0xff] }
   0xf   :  { %v61_v43 = vld [vmem:[%s846_s0 + $0x178] sm:$0xff]  ;;  %v32_v44 = vld [vmem:[%s846_s0 + $0x90] sm:$0xff]  ;;  %v35_v46 = vld [vmem:[%s846_s0 + $0xa8] sm:$0xff] }
  0x10   :  { %242 = vmatmul.mubr.f32.gmra.mrb[2].mxu0 %v16_v12  ;;  %312 = vmatmul.mubr.f32.gmra.mrb[2].mxu1 %v44_v13  ;;  %v60_v45 = vld [vmem:[%s846_s0 + $0x170] sm:$0xff]  ;;  %v63_v47 = vld [vmem:[%s846_s0 + $0x188] sm:$0xff]  ;;  %v34_v48 = vld [vmem:[%s846_s0 + $0xa0] sm:$0xff] }
  0x11   :  { %450 = vmatprep.mubr.msk.f32.mxu0 %vm81_vm0, %v19_v14  ;;  %464 = vmatprep.mubr.msk.f32.mxu1 %vm81_vm0, %v47_v15  ;;  %v62_v49 = vld [vmem:[%s846_s0 + $0x180] sm:$0xff]  ;;  %v37_v50 = vld [vmem:[%s846_s0 + $0xb8] sm:$0xff]  ;;  %v36_v52 = vld [vmem:[%s846_s0 + $0xb0] sm:$0xff] }
  0x12   :  { %v65_v51 = vld [vmem:[%s846_s0 + $0x198] sm:$0xff]  ;;  %v64_v53 = vld [vmem:[%s846_s0 + $0x190] sm:$0xff]  ;;  %v39_v54 = vld [vmem:[%s846_s0 + $0xc8] sm:$0xff] }
  0x13   :  { %v67_v55 = vld [vmem:[%s846_s0 + $0x1a8] sm:$0xff]  ;;  %v38_v56 = vld [vmem:[%s846_s0 + $0xc0] sm:$0xff]  ;;  %v41_v58 = vld [vmem:[%s846_s0 + $0xd8] sm:$0xff] }
  0x14   :  { %247 = vmatmul.mubr.f32.gmra.mrb[4].mxu0 %v18_v16  ;;  %317 = vmatmul.mubr.f32.gmra.mrb[4].mxu1 %v46_v17  ;;  %v66_v57 = vld [vmem:[%s846_s0 + $0x1a0] sm:$0xff]  ;;  %v69_v59 = vld [vmem:[%s846_s0 + $0x1b8] sm:$0xff]  ;;  %v40_v60 = vld [vmem:[%s846_s0 + $0xd0] sm:$0xff] }
  0x15   :  { %451 = vmatprep.mubr.msk.f32.mxu0 %vm81_vm0, %v21_v18  ;;  %465 = vmatprep.mubr.msk.f32.mxu1 %vm81_vm0, %v49_v19  ;;  %v68_v61 = vld [vmem:[%s846_s0 + $0x1b0] sm:$0xff] }
  0x18   :  { %252 = vmatmul.mubr.f32.gmra.mrb[6].mxu0 %v20_v20  ;;  %322 = vmatmul.mubr.f32.gmra.mrb[6].mxu1 %v48_v21 }
  0x19   :  { %452 = vmatprep.mubr.msk.f32.mxu0 %vm81_vm0, %v23_v22  ;;  %466 = vmatprep.mubr.msk.f32.mxu1 %vm81_vm0, %v51_v23  ;;  %v778_v22 = vld [vmem:[%s847_s2] ss:$0 sm:$0xff] }
  0x1c   :  { %257 = vmatmul.mubr.f32.gmra.mrb[8].mxu0 %v22_v24  ;;  %327 = vmatmul.mubr.f32.gmra.mrb[8].mxu1 %v50_v25 }
  0x1d   :  { %453 = vmatprep.mubr.msk.f32.mxu0 %vm81_vm0, %v25_v26  ;;  %467 = vmatprep.mubr.msk.f32.mxu1 %vm81_vm0, %v53_v27 }
  0x20   :  { %262 = vmatmul.mubr.f32.gmra.mrb[10].mxu0 %v24_v28  ;;  %332 = vmatmul.mubr.f32.gmra.mrb[10].mxu1 %v52_v29 }
  0x21   :  { %454 = vmatprep.mubr.msk.f32.mxu0 %vm81_vm0, %v27_v30  ;;  %468 = vmatprep.mubr.msk.f32.mxu1 %vm81_vm0, %v55_v31 }
  0x24   :  { %267 = vmatmul.mubr.f32.gmra.mrb[12].mxu0 %v26_v32  ;;  %337 = vmatmul.mubr.f32.gmra.mrb[12].mxu1 %v54_v33 }
  0x25   :  { %455 = vmatprep.mubr.msk.f32.mxu0 %vm81_vm0, %v29_v34  ;;  %469 = vmatprep.mubr.msk.f32.mxu1 %vm81_vm0, %v57_v35 }
  0x28   :  { %272 = vmatmul.mubr.f32.gmra.mrb[14].mxu0 %v28_v36  ;;  %342 = vmatmul.mubr.f32.gmra.mrb[14].mxu1 %v56_v37 }
  0x29   :  { %456 = vmatprep.mubr.msk.f32.mxu0 %vm81_vm0, %v31_v38  ;;  %470 = vmatprep.mubr.msk.f32.mxu1 %vm81_vm0, %v59_v39 }
  0x2c   :  { %277 = vmatmul.mubr.f32.gmra.mrb[16].mxu0 %v30_v40  ;;  %347 = vmatmul.mubr.f32.gmra.mrb[16].mxu1 %v58_v41 }
  0x2d   :  { %457 = vmatprep.mubr.msk.f32.mxu0 %vm81_vm0, %v33_v42  ;;  %471 = vmatprep.mubr.msk.f32.mxu1 %vm81_vm0, %v61_v43 }
  0x30   :  { %282 = vmatmul.mubr.f32.gmra.mrb[18].mxu0 %v32_v44  ;;  %352 = vmatmul.mubr.f32.gmra.mrb[18].mxu1 %v60_v45 }
  0x31   :  { %458 = vmatprep.mubr.msk.f32.mxu0 %vm81_vm0, %v35_v46  ;;  %472 = vmatprep.mubr.msk.f32.mxu1 %vm81_vm0, %v63_v47 }
  0x34   :  { %287 = vmatmul.mubr.f32.gmra.mrb[20].mxu0 %v34_v48  ;;  %357 = vmatmul.mubr.f32.gmra.mrb[20].mxu1 %v62_v49 }
  0x35   :  { %459 = vmatprep.mubr.msk.f32.mxu0 %vm81_vm0, %v37_v50  ;;  %473 = vmatprep.mubr.msk.f32.mxu1 %vm81_vm0, %v65_v51 }
  0x38   :  { %292 = vmatmul.mubr.f32.gmra.mrb[22].mxu0 %v36_v52  ;;  %362 = vmatmul.mubr.f32.gmra.mrb[22].mxu1 %v64_v53 }
  0x39   :  { %460 = vmatprep.mubr.msk.f32.mxu0 %vm81_vm0, %v39_v54  ;;  %474 = vmatprep.mubr.msk.f32.mxu1 %vm81_vm0, %v67_v55 }
  0x3c   :  { %297 = vmatmul.mubr.f32.gmra.mrb[24].mxu0 %v38_v56  ;;  %367 = vmatmul.mubr.f32.gmra.mrb[24].mxu1 %v66_v57 }
  0x3d   :  { %461 = vmatprep.mubr.msk.f32.mxu0 %vm81_vm0, %v41_v58  ;;  %475 = vmatprep.mubr.msk.f32.mxu1 %vm81_vm0, %v69_v59 }
  0x40   :  { %302 = vmatmul.mubr.f32.gmra.mrb[26].mxu0 %v40_v60  ;;  %372 = vmatmul.mubr.f32.gmra.mrb[26].mxu1 %v68_v61 }
  0xdf   :  { %v238_v62 = vpop.f32.mrb[0].mxu0  ;;  %v308_v63 = vpop.f32.mrb[0].mxu1 }
  0xe0   :  { %v240_v0 = vpop.f32.mrb[1].mxu0  ;;  %v310_v1 = vpop.f32.mrb[1].mxu1  ;;  %v239_v27 = vadd.f32 %v778_v22, %v238_v62  ;;  %v309_v28 = vadd.f32 %v778_v22, %v308_v63 }
  0xe2   :  { %483 = vtanh.f32 %v239_v27 }
  0xe3   :  { %v243_v2 = vpop.f32.mrb[2].mxu0  ;;  %v313_v3 = vpop.f32.mrb[2].mxu1 }
  0xe4   :  { %v245_v4 = vpop.f32.mrb[3].mxu0  ;;  %v315_v5 = vpop.f32.mrb[3].mxu1  ;;  %v244_v35 = vadd.f32 %v778_v22, %v243_v2  ;;  %v314_v36 = vadd.f32 %v778_v22, %v313_v3 }
  0xe7   :  { %v248_v6 = vpop.f32.mrb[4].mxu0  ;;  %v318_v7 = vpop.f32.mrb[4].mxu1 }
  0xe8   :  { %v250_v8 = vpop.f32.mrb[5].mxu0  ;;  %v320_v9 = vpop.f32.mrb[5].mxu1  ;;  %v249_v43 = vadd.f32 %v778_v22, %v248_v6  ;;  %v319_v44 = vadd.f32 %v778_v22, %v318_v7 }
  0xeb   :  { %v253_v10 = vpop.f32.mrb[6].mxu0  ;;  %v323_v11 = vpop.f32.mrb[6].mxu1 }
  0xec   :  { %v255_v12 = vpop.f32.mrb[7].mxu0  ;;  %v325_v13 = vpop.f32.mrb[7].mxu1  ;;  %v254_v51 = vadd.f32 %v778_v22, %v253_v10  ;;  %v324_v53 = vadd.f32 %v778_v22, %v323_v11 }
  0xed   :  { %v484_v52 = vpop.eup %483 }
  0xef   :  { %v258_v14 = vpop.f32.mrb[8].mxu0  ;;  %v769_v15 = vpop.f32.mrb[8].mxu1 }
  0xf0   :  { %v260_v16 = vpop.f32.mrb[9].mxu0  ;;  %v330_v17 = vpop.f32.mrb[9].mxu1  ;;  %v259_v62 = vadd.f32 %v778_v22, %v258_v14  ;;  %v329_v2 = vadd.f32 %v778_v22, %v769_v15 }
  0xf3   :  { %v771_v18 = vpop.f32.mrb[10].mxu0  ;;  %v773_v19 = vpop.f32.mrb[10].mxu1 }
  0xf4   :  { %v265_v20 = vpop.f32.mrb[11].mxu0  ;;  %v335_v21 = vpop.f32.mrb[11].mxu1  ;;  %v264_v12 = vadd.f32 %v778_v22, %v771_v18  ;;  %v334_v17 = vadd.f32 %v778_v22, %v773_v19 }
  0xf7   :  { %v780_v23 = vpop.f32.mrb[12].mxu0  ;;  %v782_v24 = vpop.f32.mrb[12].mxu1 }
  0xf8   :  { %v270_v25 = vpop.f32.mrb[13].mxu0  ;;  %v340_v26 = vpop.f32.mrb[13].mxu1 }
  0xfb   :  { %v273_v29 = vpop.f32.mrb[14].mxu0  ;;  %v343_v30 = vpop.f32.mrb[14].mxu1 }
  0xfc   :  { %v274_v31 = vadd.f32 %v778_v22, %v273_v29  ;;  %v275_v32 = vpop.f32.mrb[15].mxu0  ;;  %v344_v33 = vadd.f32 %v778_v22, %v343_v30  ;;  %v345_v34 = vpop.f32.mrb[15].mxu1 }
  0xfd   :  { %v269_v32 = vadd.f32 %v778_v22, %v780_v23 }
  0xfe   :  { %485 = vtanh.f32 %v274_v31 }
  0xff   :  { %487 = vtanh.f32 %v309_v28  ;;  %v278_v37 = vpop.f32.mrb[16].mxu0  ;;  %v348_v38 = vpop.f32.mrb[16].mxu1 }
 0x100   :  { %489 = vtanh.f32 %v344_v33  ;;  %v279_v39 = vadd.f32 %v778_v22, %v278_v37  ;;  %v280_v40 = vpop.f32.mrb[17].mxu0  ;;  %v349_v41 = vadd.f32 %v778_v22, %v348_v38  ;;  %v350_v42 = vpop.f32.mrb[17].mxu1 }
 0x101   :  { %491 = vtanh.f32 %v244_v35 }
 0x102   :  { %493 = vtanh.f32 %v279_v39 }
 0x103   :  { %495 = vtanh.f32 %v314_v36  ;;  %v283_v45 = vpop.f32.mrb[18].mxu0  ;;  %v353_v46 = vpop.f32.mrb[18].mxu1  ;;  %v339_v36 = vadd.f32 %v778_v22, %v782_v24 }
 0x104   :  { %497 = vtanh.f32 %v349_v41  ;;  %v284_v47 = vadd.f32 %v778_v22, %v283_v45  ;;  %v285_v48 = vpop.f32.mrb[19].mxu0  ;;  %v354_v49 = vadd.f32 %v778_v22, %v353_v46  ;;  %v355_v50 = vpop.f32.mrb[19].mxu1 }
 0x105   :  { %499 = vtanh.f32 %v249_v43 }
 0x106   :  { %501 = vtanh.f32 %v284_v47 }
 0x107   :  { %503 = vtanh.f32 %v319_v44  ;;  %v288_v54 = vpop.f32.mrb[20].mxu0  ;;  %v358_v55 = vpop.f32.mrb[20].mxu1 }
 0x108   :  { %v486_v56 = vpop.eup %485  ;;  %505 = vtanh.f32 %v354_v49  ;;  %v289_v57 = vadd.f32 %v778_v22, %v288_v54  ;;  %v290_v58 = vpop.f32.mrb[21].mxu0  ;;  %v359_v59 = vadd.f32 %v778_v22, %v358_v55 }
 0x109   :  { %v360_v60 = vpop.f32.mrb[21].mxu1  ;;  %v488_v61 = vpop.eup %487  ;;  %507 = vtanh.f32 %v254_v51  ;;  %v405_v63 = vadd.f32 %v486_v56, %v484_v52 }
 0x10a   :  { %v490_v0 = vpop.eup %489  ;;  %509 = vtanh.f32 %v289_v57 }
 0x10b   :  { %v492_v1 = vpop.eup %491  ;;  %511 = vtanh.f32 %v324_v53  ;;  %v412_v3 = vadd.f32 %v488_v61, %v405_v63  ;;  %v293_v4 = vpop.f32.mrb[22].mxu0 }
 0x10c   :  { %v363_v5 = vpop.f32.mrb[22].mxu1  ;;  %v494_v6 = vpop.eup %493  ;;  %513 = vtanh.f32 %v359_v59  ;;  %v294_v7 = vadd.f32 %v778_v22, %v293_v4 }
 0x10d   :  { %v295_v8 = vpop.f32.mrb[23].mxu0  ;;  %v364_v9 = vadd.f32 %v778_v22, %v363_v5  ;;  %v365_v10 = vpop.f32.mrb[23].mxu1  ;;  %515 = vtanh.f32 %v259_v62  ;;  %v419_v13 = vadd.f32 %v490_v0, %v412_v3  ;;  %v406_v14 = vadd.f32 %v494_v6, %v492_v1 }
 0x10e   :  { %v496_v11 = vpop.eup %495  ;;  %517 = vtanh.f32 %v294_v7 }
 0x10f   :  { %v498_v16 = vpop.eup %497  ;;  %519 = vtanh.f32 %v329_v2  ;;  %v426_v20 = vmul.f32 0.25, %v419_v13  ;;  %v413_v21 = vadd.f32 %v496_v11, %v406_v14  ;;  %v298_v25 = vpop.f32.mrb[24].mxu0 }
 0x110   :  { %v500_v15 = vpop.eup %499  ;;  %v368_v26 = vpop.f32.mrb[24].mxu1  ;;  %521 = vtanh.f32 %v364_v9  ;;  %v299_v28 = vadd.f32 %v778_v22, %v298_v25 }
 0x111   :  { %v502_v27 = vpop.eup %501  ;;  %v300_v29 = vpop.f32.mrb[25].mxu0  ;;  %v369_v18 = vadd.f32 %v778_v22, %v368_v26  ;;  %523 = vtanh.f32 %v264_v12  ;;  %434 = vst.msk [vmem:[%s848_s3] sm:$0xff] %vm433_vm2, %v426_v20  ;;  %v420_v19 = vadd.f32 %v498_v16, %v413_v21 }
 0x112   :  { %v370_v30 = vpop.f32.mrb[25].mxu1  ;;  %v504_v31 = vpop.eup %503  ;;  %v407_v33 = vadd.f32 %v502_v27, %v500_v15  ;;  %525 = vtanh.f32 %v299_v28 }
 0x113   :  { %v506_v34 = vpop.eup %505  ;;  %527 = vtanh.f32 %v334_v17  ;;  %v427_v37 = vmul.f32 0.25, %v420_v19  ;;  %v303_v39 = vpop.f32.mrb[26].mxu0 }
 0x114   :  { %v508_v35 = vpop.eup %507  ;;  %v414_v38 = vadd.f32 %v504_v31, %v407_v33  ;;  %v373_v40 = vpop.f32.mrb[26].mxu1  ;;  %529 = vtanh.f32 %v369_v18  ;;  %v304_v23 = vadd.f32 %v778_v22, %v303_v39 }
 0x115   :  { %v510_v41 = vpop.eup %509  ;;  %v305_v42 = vpop.f32.mrb[27].mxu0  ;;  %v374_v43 = vadd.f32 %v778_v22, %v373_v40  ;;  %531 = vtanh.f32 %v269_v32  ;;  %435 = vst.msk [vmem:[%s848_s3 + $0x8] sm:$0xff] %vm433_vm2, %v427_v37 }
 0x116   :  { %v375_v44 = vpop.f32.mrb[27].mxu1  ;;  %v512_v45 = vpop.eup %511  ;;  %v421_v24 = vadd.f32 %v506_v34, %v414_v38  ;;  %v408_v46 = vadd.f32 %v510_v41, %v508_v35  ;;  %533 = vtanh.f32 %v304_v23 }
 0x117   :  { %v514_v47 = vpop.eup %513  ;;  %535 = vtanh.f32 %v339_v36 }
 0x118   :  { %v516_v48 = vpop.eup %515  ;;  %v428_v49 = vmul.f32 0.25, %v421_v24  ;;  %v415_v50 = vadd.f32 %v512_v45, %v408_v46  ;;  %537 = vtanh.f32 %v374_v43 }
 0x119   :  { %v518_v51 = vpop.eup %517 }
 0x11a   :  { %v520_v52 = vpop.eup %519  ;;  %436 = vst.msk [vmem:[%s848_s3 + $0x10] sm:$0xff] %vm433_vm2, %v428_v49  ;;  %v422_v22 = vadd.f32 %v514_v47, %v415_v50  ;;  %v409_v53 = vadd.f32 %v518_v51, %v516_v48 }
 0x11b   :  { %v522_v54 = vpop.eup %521 }
 0x11c   :  { %v524_v55 = vpop.eup %523  ;;  %v429_v56 = vmul.f32 0.25, %v422_v22  ;;  %v416_v57 = vadd.f32 %v520_v52, %v409_v53 }
 0x11d   :  { %v526_v58 = vpop.eup %525 }
 0x11e   :  { %v528_v59 = vpop.eup %527  ;;  %437 = vst.msk [vmem:[%s848_s3 + $0x18] sm:$0xff] %vm433_vm2, %v429_v56  ;;  %v423_v60 = vadd.f32 %v522_v54, %v416_v57  ;;  %v410_v61 = vadd.f32 %v526_v58, %v524_v55 }
 0x11f   :  { %v530_v62 = vpop.eup %529 }
 0x120   :  { %v532_v63 = vpop.eup %531  ;;  %v430_v0 = vmul.f32 0.25, %v423_v60  ;;  %v417_v1 = vadd.f32 %v528_v59, %v410_v61 }
 0x121   :  { %v534_v2 = vpop.eup %533 }
 0x122   :  { %v536_v3 = vpop.eup %535  ;;  %438 = vst.msk [vmem:[%s848_s3 + $0x20] sm:$0xff] %vm433_vm2, %v430_v0  ;;  %v424_v4 = vadd.f32 %v530_v62, %v417_v1  ;;  %v411_v5 = vadd.f32 %v534_v2, %v532_v63 }
 0x123   :  { %v538_v6 = vpop.eup %537 }
 0x124   :  { %v431_v7 = vmul.f32 0.25, %v424_v4  ;;  %v418_v8 = vadd.f32 %v536_v3, %v411_v5 }
 0x126   :  { %439 = vst.msk [vmem:[%s848_s3 + $0x28] sm:$0xff] %vm433_vm2, %v431_v7  ;;  %v425_v9 = vadd.f32 %v538_v6, %v418_v8 }
 0x128   :  { %v432_v10 = vmul.f32 0.25, %v425_v9 }
 0x12a   :  { %440 = vst.msk [vmem:[%s848_s3 + $0x30] sm:$0xff] %vm433_vm2, %v432_v10 }

// kernel: lenet5_forward.5
= control target key start
LH: loop header
LB: loop body
LE: loop exit
PB: predicated region body
PF: predicated region fallthrough
CT: control target
= control target key end

     0   :  { %vm116_vm0 = vcmask 130048   ;;  %v740_v30 = vmov 1983009808   ;;  %v100_v32 = vlaneseq  ;;  %s1078_s0 = inlined_call_operand.vmem [shape: f32[2,400], index: 0, kind: input, shape index: {}]   ;;  %s1079_s1 = inlined_call_operand.vmem [shape: f32[120,400], index: 1, kind: input, shape index: {}]   ;;  %s1080_s2 = inlined_call_operand.vmem [shape: f32[1,120], index: 2, kind: input, shape index: {}]   ;;  %s1081_s3 = inlined_call_operand.vmem [shape: f32[84,120], index: 3, kind: input, shape index: {}]   ;;  %s1082_s4 = inlined_call_operand.vmem [shape: f32[1,84], index: 4, kind: input, shape index: {}]   ;;  %s1083_s5 = inlined_call_operand.vmem [shape: f32[10,84], index: 5, kind: input, shape index: {}]   ;;  %s1084_s6 = inlined_call_operand.vmem [shape: f32[1,10], index: 6, kind: input, shape index: {}]   ;;  %s1085_s7 = inlined_call_operand.hbm [shape: f32[2,10], index: 7, kind: output, shape index: {}]  }
   0x1   :  { %v29_v0 = vld [vmem:[%s1079_s1 + $0x8] sm:$0xff]  ;;  %v28_v2 = vld [vmem:[%s1079_s1] sm:$0xff]  ;;  %v31_v5 = vld [vmem:[%s1079_s1 + $0x18] sm:$0xff]  ;;  %v98_v31 = vunpack.c.l.s4 %v740_v30 }
   0x2   :  { %v33_v1 = vld [vmem:[%s1079_s1 + $0x28] sm:$0xff]  ;;  %v32_v4 = vld [vmem:[%s1079_s1 + $0x20] sm:$0xff]  ;;  %v35_v6 = vld [vmem:[%s1079_s1 + $0x38] sm:$0xff]  ;;  %v101_v38 = vshrl.u32 %v100_v32, 7 }
   0x3   :  { %v617_v3 = vpack.c.bf16 %v33_v1, %v29_v0  ;;  %v619_v7 = vpack.c.bf16 %v32_v4, %v28_v2  ;;  %v645_v8 = vpack.c.bf16 %v35_v6, %v31_v5  ;;  %vm805_vm1 = vmpackc.low %vm116_vm0, %vm116_vm0  ;;  %v30_v10 = vld [vmem:[%s1079_s1 + $0x10] sm:$0xff]  ;;  %v37_v13 = vld [vmem:[%s1079_s1 + $0x48] sm:$0xff]  ;;  %v99_v37 = vunpack.c.0.s8 %v98_v31 }
   0x4   :  { %v34_v11 = vld [vmem:[%s1079_s1 + $0x30] sm:$0xff]  ;;  %v41_v14 = vld [vmem:[%s1079_s1 + $0x68] sm:$0xff]  ;;  %v39_v16 = vld [vmem:[%s1079_s1 + $0x58] sm:$0xff] }
   0x5   :  { %618 = vmatprep.subr.bf16.mxu1 %v617_v3  ;;  %v648_v12 = vpack.c.bf16 %v34_v11, %v30_v10  ;;  %647 = vmatprep.subr.msk.bf16.mxu0 %vm805_vm1, %v645_v8  ;;  %v621_v15 = vpack.c.bf16 %v41_v14, %v37_v13  ;;  %v43_v17 = vld [vmem:[%s1079_s1 + $0x78] sm:$0xff]  ;;  %v36_v18 = vld [vmem:[%s1079_s1 + $0x40] sm:$0xff]  ;;  %v38_v21 = vld [vmem:[%s1079_s1 + $0x50] sm:$0xff]  ;;  %v102_v47 = vsub.s32 %v99_v37, %v101_v38 }
   0x6   :  { %620 = vmatpush1.bf16.xpose.msra.mxu1 %v619_v7  ;;  %v40_v19 = vld [vmem:[%s1079_s1 + $0x60] sm:$0xff]  ;;  %v650_v20 = vpack.c.bf16 %v43_v17, %v39_v16  ;;  %v42_v22 = vld [vmem:[%s1079_s1 + $0x70] sm:$0xff]  ;;  %v45_v23 = vld [vmem:[%s1079_s1 + $0x88] sm:$0xff] }
   0x7   :  { %649 = vmatpush1.bf16.xpose.msra.mxu0 %v648_v12  ;;  %622 = vmatprep.subr.bf16.mxu1 %v621_v15  ;;  %v49_v24 = vld [vmem:[%s1079_s1 + $0xa8] sm:$0xff]  ;;  %v47_v25 = vld [vmem:[%s1079_s1 + $0x98] sm:$0xff]  ;;  %v623_v27 = vpack.c.bf16 %v40_v19, %v36_v18  ;;  %v653_v28 = vpack.c.bf16 %v42_v22, %v38_v21  ;;  %v44_v34 = vld [vmem:[%s1079_s1 + $0x80] sm:$0xff] }
   0x8   :  { %652 = vmatprep.subr.msk.bf16.mxu0 %vm805_vm1, %v650_v20  ;;  %v51_v26 = vld [vmem:[%s1079_s1 + $0xb8] sm:$0xff]  ;;  %v625_v29 = vpack.c.bf16 %v49_v24, %v45_v23  ;;  %v48_v35 = vld [vmem:[%s1079_s1 + $0xa0] sm:$0xff]  ;;  %v46_v36 = vld [vmem:[%s1079_s1 + $0x90] sm:$0xff] }
   0x9   :  { %v655_v33 = vpack.c.bf16 %v51_v26, %v47_v25  ;;  %v50_v39 = vld [vmem:[%s1079_s1 + $0xb0] sm:$0xff]  ;;  %v53_v40 = vld [vmem:[%s1079_s1 + $0xc8] sm:$0xff]  ;;  %v55_v42 = vld [vmem:[%s1079_s1 + $0xd8] sm:$0xff]  ;;  %v627_v44 = vpack.c.bf16 %v48_v35, %v44_v34 }
   0xa   :  { %v57_v41 = vld [vmem:[%s1079_s1 + $0xe8] sm:$0xff]  ;;  %v59_v43 = vld [vmem:[%s1079_s1 + $0xf8] sm:$0xff]  ;;  %v658_v45 = vpack.c.bf16 %v50_v39, %v46_v36  ;;  %v27_v49 = vld [vmem:[%s1078_s0] sm:$0xff] }
   0xb   :  { %v629_v46 = vpack.c.bf16 %v57_v41, %v53_v40  ;;  %v660_v48 = vpack.c.bf16 %v59_v43, %v55_v42  ;;  %v52_v50 = vld [vmem:[%s1079_s1 + $0xc0] sm:$0xff]  ;;  %v54_v52 = vld [vmem:[%s1079_s1 + $0xd0] sm:$0xff]  ;;  %v96_v53 = vcombine.high %v27_v49, %v27_v49  ;;  %v893_v54 = vrot.slane %v27_v49, %v102_v47  ;;  %v61_v56 = vld [vmem:[%s1079_s1 + $0x108] sm:$0xff] }
   0xc   :  { %v56_v51 = vld [vmem:[%s1079_s1 + $0xe0] sm:$0xff]  ;;  %v58_v55 = vld [vmem:[%s1079_s1 + $0xf0] sm:$0xff]  ;;  %v65_v57 = vld [vmem:[%s1079_s1 + $0x128] sm:$0xff] }
   0xd   :  { %v63_v58 = vld [vmem:[%s1079_s1 + $0x118] sm:$0xff]  ;;  %v111_v60 = vcombine.high %v893_v54, %v893_v54  ;;  %v914_v61 = vrot.slane %v96_v53, %v102_v47  ;;  %v631_v62 = vpack.c.bf16 %v56_v51, %v52_v50 }
   0xe   :  { %624 = vmatpush1.bf16.xpose.msra.mxu1 %v623_v27  ;;  %v67_v59 = vld [vmem:[%s1079_s1 + $0x138] sm:$0xff] }
   0xf   :  { %654 = vmatpush1.bf16.xpose.msra.mxu0 %v653_v28  ;;  %626 = vmatprep.subr.bf16.mxu1 %v625_v29 }
  0x10   :  { %657 = vmatprep.subr.msk.bf16.mxu0 %vm805_vm1, %v655_v33 }
  0x16   :  { %628 = vmatpush1.bf16.xpose.msra.mxu1 %v627_v44 }
  0x17   :  { %659 = vmatpush1.bf16.xpose.msra.mxu0 %v658_v45  ;;  %630 = vmatprep.subr.bf16.mxu1 %v629_v46 }
  0x18   :  { %662 = vmatprep.subr.msk.bf16.mxu0 %vm805_vm1, %v660_v48 }
  0x19   :  { %12 = vsyncpa [#allocation3], 0  ;;  %v663_v63 = vpack.c.bf16 %v58_v55, %v54_v52  ;;  %v633_v0 = vpack.c.bf16 %v65_v57, %v61_v56  ;;  %228 = vmatprep.mubr.f32.mxu1 %v111_v60  ;;  %v112_v1 = vcombine.high %v914_v61, %v914_v61  ;;  %v665_v2 = vpack.c.bf16 %v67_v59, %v63_v58  ;;  %v60_v3 = vld [vmem:[%s1079_s1 + $0x100] sm:$0xff]  ;;  %v62_v5 = vld [vmem:[%s1079_s1 + $0x110] sm:$0xff]  ;;  %s744_s9 = smov [#allocation2]  }
  0x1a   :  { %v64_v4 = vld [vmem:[%s1079_s1 + $0x120] sm:$0xff]  ;;  %v66_v6 = vld [vmem:[%s1079_s1 + $0x130] sm:$0xff]  ;;  %v69_v7 = vld [vmem:[%s1079_s1 + $0x148] sm:$0xff]  ;;  %vm323_vm2 = vcmask 982016   ;;  %v741_v40 = vmov 0.0|0.0   ;;  %vm743_vm4 = vmmov 0  }
  0x1b   :  { %552 = vmatprep.mubr.msk.f32.mxu0 %vm116_vm0, %v112_v1  ;;  %v73_v8 = vld [vmem:[%s1079_s1 + $0x168] sm:$0xff]  ;;  %v71_v10 = vld [vmem:[%s1079_s1 + $0x158] sm:$0xff]  ;;  %v635_v12 = vpack.c.bf16 %v64_v4, %v60_v3  ;;  %v668_v13 = vpack.c.bf16 %v66_v6, %v62_v5  ;;  %v68_v16 = vld [vmem:[%s1079_s1 + $0x140] sm:$0xff]  ;;  %vm440_vm5 = vcmask 687104   ;;  %vm520_vm7 = vcmask 74752  }
  0x1c   :  { %v75_v11 = vld [vmem:[%s1079_s1 + $0x178] sm:$0xff]  ;;  %v637_v14 = vpack.c.bf16 %v73_v8, %v69_v7  ;;  %v72_v17 = vld [vmem:[%s1079_s1 + $0x160] sm:$0xff]  ;;  %v70_v18 = vld [vmem:[%s1079_s1 + $0x150] sm:$0xff] }
  0x1d   :  { %v670_v15 = vpack.c.bf16 %v75_v11, %v71_v10  ;;  %v74_v19 = vld [vmem:[%s1079_s1 + $0x170] sm:$0xff]  ;;  %v77_v20 = vld [vmem:[%s1079_s1 + $0x188] sm:$0xff]  ;;  %v79_v22 = vld [vmem:[%s1079_s1 + $0x198] sm:$0xff]  ;;  %v639_v24 = vpack.c.bf16 %v72_v17, %v68_v16 }
  0x1e   :  { %632 = vmatpush1.bf16.xpose.msra.mxu1 %v631_v62  ;;  %v81_v21 = vld [vmem:[%s1079_s1 + $0x1a8] sm:$0xff]  ;;  %v83_v23 = vld [vmem:[%s1079_s1 + $0x1b8] sm:$0xff]  ;;  %v673_v25 = vpack.c.bf16 %v74_v19, %v70_v18  ;;  %v76_v28 = vld [vmem:[%s1079_s1 + $0x180] sm:$0xff] }
  0x1f   :  { %664 = vmatpush1.bf16.xpose.msra.mxu0 %v663_v63  ;;  %634 = vmatprep.subr.bf16.mxu1 %v633_v0  ;;  %v641_v26 = vpack.c.bf16 %v81_v21, %v77_v20  ;;  %v675_v27 = vpack.c.bf16 %v83_v23, %v79_v22  ;;  %v80_v29 = vld [vmem:[%s1079_s1 + $0x1a0] sm:$0xff]  ;;  %v78_v30 = vld [vmem:[%s1079_s1 + $0x190] sm:$0xff]  ;;  %v85_v34 = vld [vmem:[%s1079_s1 + $0x1c8] sm:$0xff] }
  0x20   :  { %667 = vmatprep.subr.msk.bf16.mxu0 %vm805_vm1, %v665_v2  ;;  %v82_v31 = vld [vmem:[%s1079_s1 + $0x1b0] sm:$0xff]  ;;  %v643_v32 = vpack.c.bf16 %v80_v29, %v76_v28  ;;  %v87_v35 = vld [vmem:[%s1079_s1 + $0x1d8] sm:$0xff]  ;;  %v84_v9 = vld [vmem:[%s1079_s1 + $0x1c0] sm:$0xff] }
  0x21   :  { %v678_v33 = vpack.c.bf16 %v82_v31, %v78_v30  ;;  %v86_v36 = vld [vmem:[%s1079_s1 + $0x1d0] sm:$0xff]  ;;  %v305_v37 = vld [vmem:[%s1081_s3] sm:$0xff]  ;;  %v306_v38 = vld [vmem:[%s1081_s3 + $0x8] sm:$0xff] }
  0x22   :  { %v681_v39 = vpack.c.bf16 %v306_v38, %v305_v37  ;;  %vm1006_vm3 = vmpackc.low %vm323_vm2, %vm323_vm2  ;;  %v307_v42 = vld [vmem:[%s1081_s3 + $0x10] sm:$0xff]  ;;  %v308_v43 = vld [vmem:[%s1081_s3 + $0x18] sm:$0xff] }
  0x23   :  { %v685_v44 = vpack.c.bf16 %v308_v43, %v307_v42  ;;  %v309_v45 = vld [vmem:[%s1081_s3 + $0x20] sm:$0xff]  ;;  %v310_v46 = vld [vmem:[%s1081_s3 + $0x28] sm:$0xff]  ;;  %v311_v48 = vld [vmem:[%s1081_s3 + $0x30] sm:$0xff] }
  0x24   :  { %v689_v47 = vpack.c.bf16 %v310_v46, %v309_v45  ;;  %v312_v49 = vld [vmem:[%s1081_s3 + $0x38] sm:$0xff]  ;;  %v313_v51 = vld [vmem:[%s1081_s3 + $0x40] sm:$0xff]  ;;  %v314_v52 = vld [vmem:[%s1081_s3 + $0x48] sm:$0xff] }
  0x25   :  { %v693_v50 = vpack.c.bf16 %v312_v49, %v311_v48  ;;  %v697_v53 = vpack.c.bf16 %v314_v52, %v313_v51  ;;  %v315_v55 = vld [vmem:[%s1081_s3 + $0x50] sm:$0xf]  ;;  %v536_v56 = vld [vmem:[%s1080_s2] ss:$0 sm:$0xff]  ;;  %v432_v1 = vld [vmem:[%s1083_s5 + $0x8] sm:$0x3] }
  0x26   :  { %636 = vmatpush1.bf16.xpose.msra.mxu1 %v635_v12  ;;  %v431_v0 = vld [vmem:[%s1083_s5] sm:$0xff]  ;;  %vm702_vm6 = vmpackc.low %vm440_vm5, %vm440_vm5  ;;  %s528_s5 = sshll.u32 %s744_s9, 4  ;;  %s529_s5 = int_to_ptr.vmem [resolvable:$true] %s528_s5 }
  0x27   :  { %669 = vmatpush1.bf16.xpose.msra.mxu0 %v668_v13  ;;  %638 = vmatprep.subr.bf16.mxu1 %v637_v14  ;;  %v701_v2 = vpack.c.bf16 %v432_v1, %v431_v0  ;;  %v553_v3 = vld [vmem:[%s1082_s4] ss:$0 sm:$0xff]  ;;  %s716_s10 = scalar_lea.vmem %s529_s5, 32  ;;  %p721_p1 = scmp.lt.s32.totalorder %s529_s5, %s529_s5 }
  0x28   :  { %672 = vmatprep.subr.msk.bf16.mxu0 %vm805_vm1, %v670_v15  ;;  %v566_v8 = vld [vmem:[%s1084_s6] ss:$0 sm:$0xff]  ;;  %p717_p0 = scmp.ne.s32.totalorder %s529_s5, %s716_s10  ;;  %p722_p2 = scmp.lt.s32.totalorder %s716_s10, %s716_s10 }
  0x2a   :  { %p723_p3 = por %p722_p2, %p721_p1 }
  0x2c   :  { %p724_p4 = pnand %p723_p3, %p717_p0 }
  0x2e   :  { %640 = vmatpush1.bf16.xpose.msra.mxu1 %v639_v24 }
  0x2f   :  { %674 = vmatpush1.bf16.xpose.msra.mxu0 %v673_v25  ;;  %642 = vmatprep.subr.bf16.mxu1 %v641_v26 }
  0x30   :  { %677 = vmatprep.subr.msk.bf16.mxu0 %vm805_vm1, %v675_v27 }
  0x36   :  { %644 = vmatpush1.bf16.xpose.msra.mxu1 %v643_v32 }
  0x37   :  { %679 = vmatpush1.bf16.xpose.msra.mxu0 %v678_v33  ;;  %192 = vmatprep.subr.mxu1 %v85_v34 }
  0x38   :  { %551 = vmatprep.subr.msk.mxu0 %vm116_vm0, %v87_v35 }
  0x3e   :  { %193 = vmatpush1.xpose.msra.mxu1 %v84_v9 }
  0x3f   :  { %263 = vmatpush1.xpose.msra.mxu0 %v86_v36  ;;  %700 = vmatprep.subr.bf16.mxu1 %v741_v40 }
  0x40   :  { %680 = vmatprep.subr.bf16.mxu0 %v741_v40 }
  0x41   :  { %229 = vmatmul.mubr.f32.vlgmr.msra.gmra.mrb[0].mxu1 %v893_v54  ;;  %v742_v54 = vmov 0.0  }
  0x42   :  { %299 = vmatmul.mubr.f32.vlgmr.msra.gmra.mrb[0].mxu0 %v914_v61  ;;  %614 = vmatprep.mubr.msk.f32.mxu1 %vm743_vm4, %v742_v54 }
  0x43   :  { %683 = vmatpush3.bf16.xpose.msk.msra.mxu0 %vm1006_vm3, %v681_v39  ;;  %607 = vmatprep.mubr.msk.f32.mxu0 %vm743_vm4, %v742_v54 }
  0x44   :  { %684 = vmatprep.subr.bf16.mxu0 %v741_v40  ;;  %703 = vmatpush3.bf16.xpose.msk.msra.mxu1 %vm702_vm6, %v701_v2 }
  0x4b   :  { %687 = vmatpush3.bf16.xpose.msk.msra.mxu0 %vm1006_vm3, %v685_v44 }
  0x4c   :  { %688 = vmatprep.subr.bf16.mxu0 %v741_v40 }
  0x53   :  { %691 = vmatpush3.bf16.xpose.msk.msra.mxu0 %vm1006_vm3, %v689_v47 }
  0x54   :  { %692 = vmatprep.subr.bf16.mxu0 %v741_v40 }
  0x5b   :  { %695 = vmatpush3.bf16.xpose.msk.msra.mxu0 %vm1006_vm3, %v693_v50 }
  0x5c   :  { %696 = vmatprep.subr.bf16.mxu0 %v741_v40 }
  0x63   :  { %699 = vmatpush3.bf16.xpose.msk.msra.mxu0 %vm1006_vm3, %v697_v53 }
  0x64   :  { %605 = vmatprep.subr.mxu0 %v742_v54 }
  0x6b   :  { %606 = vmatpush3.xpose.msk.msra.mxu0 %vm323_vm2, %v315_v55 }
 0x114   :  { %v230_v57 = vpop.f32.mrb[0].mxu1 }
 0x115   :  { %v231_v58 = vadd.f32 %v536_v56, %v230_v57  ;;  %v232_v59 = vpop.f32.mrb[1].mxu1  ;;  %v300_v60 = vpop.f32.mrb[0].mxu0 }
 0x116   :  { %v302_v61 = vpop.f32.mrb[1].mxu0 }
 0x117   :  { %v301_v62 = vadd.f32 %v300_v60, %v231_v58 }
 0x119   :  { %712 = vtanh.f32 %v301_v62 }
 0x123   :  { %v713_v63 = vpop.eup %712 }
 0x124   :  { %608 = vmatmul.mubr.msk.f32.vlgmr.msra.gmra.mrb[2].mxu0 %vm323_vm2, %v713_v63 }
 0x1f7   :  { %v426_v4 = vpop.f32.mrb[2].mxu0 }
 0x1f8   :  { %v427_v5 = vadd.f32 %v553_v3, %v426_v4  ;;  %v609_v6 = vpop.f32.mrb[3].mxu0 }
 0x1fa   :  { %714 = vtanh.f32 %v427_v5 }
 0x204   :  { %v715_v7 = vpop.eup %714 }
 0x205   :  { %615 = vmatmul.mubr.msk.f32.vlgmr.msra.gmra.mrb[2].mxu1 %vm440_vm5, %v715_v7 }
 0x2d8   :  { %v516_v10 = vpop.f32.mrb[2].mxu1 }
 0x2d9   :  { %v517_v11 = vadd.f32 %v566_v8, %v516_v10  ;;  %v616_v12 = vpop.f32.mrb[3].mxu1 }
 0x2db   :  { %521 = vst.msk [vmem:[#allocation2] sm:$0x3] %vm520_vm7, %v517_v11 }
 0x2dc   :  { %727 = shalt.err (!%p724_p4)
}
 0x2dd   :  { %s728_s12 = scalar_lea.hbm %s1085_s7, 32 }
 0x2de   :  { %p729_p5 = scmp.ne.s32.totalorder %s1085_s7, %s728_s12  ;;  %p732_p6 = scmp.lt.u32.totalorder %s728_s12, %s1085_s7 }
 0x2e0   :  { %p734_p7 = pnand %p732_p6, %p729_p5 }
 0x2e2   :  { %737 = shalt.err (!%p734_p7)
}
 0x2e3   :  { %531 = dma.vmem_to_hbm [thread:$0]  %s529_s5, 32, %s1085_s7, [#allocation3]  }
 0x2e4   :  { %738 = dma.done.wait [#allocation3], 32  }
 0x2e5   :  { %739 = vsyncadd [#allocation3], 4294967264 }
 0x2e6   :  { %535 = vsyncpa [#allocation3], 1 }

</bundles_post_ra>
